<compile_context>
chip_gen: v5e
topology: v5e:2x2
jax: 0.10.0
libtpu: 0.0.40
codegen_flags: <defaults>
</compile_context>

<pallas_src>
import functools
import math

import jax
import jax.numpy as jnp
from jax.experimental import pallas as pl
from jax.experimental.pallas import tpu as pltpu

BN_EPS = 1e-5


def _hsigmoid(x):
    # This repo's Hsigmoid is relu6(x + 3) / 3 (note: /3, not the usual /6).
    return jnp.clip(x + 3.0, 0.0, 6.0) / 3.0


def _unit_kernel(xflat_ref, scale_ref, wres_ref, bias_ref, wconv_ref,
                 o_ref,
                 xcol_ref,
                 *, M, K, Wp, pad, Cin):
    """One grid step == one batch element.

    xflat_ref : (1, FLAT, Cin) bf16  zero-padded NHWC image, rows flattened (halo tile)
    wres_ref  : (1, Cin, Cout) bf16  folded dynamic-branch matrix (per batch)
    bias_ref  : (1, 1, Cout)   f32   scale*bconv + b_res (per batch)
    xcol_ref  : (M, K*K*Cin)   bf16  VMEM scratch: im2col built from row-shifted slices
    """
    KCin = K * Cin

    # ---- dbb_reparam KxK conv: per-di assembly + contraction (lets LLO overlap them) ----
    conv = None
    for di in range(K):
        for dj in range(K):
            idx = di * K + dj
            off = di * Wp + dj            # tap (di,dj) == row offset of the halo tile
            xcol_ref[:, idx * Cin:(idx + 1) * Cin] = xflat_ref[0, off:off + M, :]
        part = jnp.dot(xcol_ref[:, di * KCin:(di + 1) * KCin],
                       wconv_ref[di * KCin:(di + 1) * KCin, :],
                       preferred_element_type=jnp.float32)          # (M, Cout) f32
        conv = part if conv is None else conv + part

    # ---- folded DynamicBranch: one full-width matmul on the center tap ----
    c_idx = pad * K + pad                                            # center tap column block
    xc = xcol_ref[:, c_idx * Cin:(c_idx + 1) * Cin]                  # (M, Cin) bf16, already built
    res = jnp.dot(xc, wres_ref[0], preferred_element_type=jnp.float32)

    # ---- out = scale.expand_as(out)*out + res ; biases pre-folded ; nonlinear == Identity ----
    o_ref[0] = scale_ref[0] * conv + res + bias_ref[0]


def unit_forward(x_nchw, params, *, kernel_size, dim):
    B, Cin, H, W = x_nchw.shape
    Cout = params["wconv"].shape[-1]
    K = kernel_size
    p = K // 2
    Hp, Wp = H + 2 * p, W + 2 * p
    M = H * Wp                     # rows per batch (includes Wp-W junk columns, cut later)
    FLAT = (Hp + 1) * Wp           # +1 slack row so every shifted slice stays in bounds
    KKC = K * K * Cin

    x = x_nchw.astype(jnp.float32)

    # ---- hoisted scalar branch (tiny matmuls would starve the MXU in-kernel) ----
    y = jnp.mean(x, axis=(2, 3))                               # (B, Cin) global avg pool
    y = y @ params["wfc1"]
    y = y * _hsigmoid(y @ params["wse"])                       # SEModule_small
    phi = (y @ params["wphi"]).reshape(B, dim, dim)
    scale = _hsigmoid(y @ params["wscale"]).reshape(B, 1, Cout).astype(jnp.float32)

    # ---- fold BN1/BN2 (inference mode) ----
    g1, b1, m1, v1 = params["bn1"]
    s1 = g1 / jnp.sqrt(v1 + BN_EPS)
    wq_eff = params["wq"] * s1[None, :]                        # (Cin, dim) f32
    o1 = b1 - m1 * s1                                          # (dim,)
    g2, b2, m2, v2 = params["bn2"]
    s2 = g2 / jnp.sqrt(v2 + BN_EPS)                            # (dim,)
    o2 = b2 - m2 * s2                                          # (dim,)

    # ---- fold the whole dynamic-branch chain into per-batch W_res / b_res ----
    #   res = ((x@wq_eff + o1) @ A + o2) @ wp ,  A = phi^T diag(s2) + I
    #       = x @ (wq_eff @ A @ wp) + (o1 @ A + o2) @ wp
    A = (jnp.transpose(phi, (0, 2, 1)) * s2[None, None, :]
         + jnp.eye(dim, dtype=jnp.float32)[None])                              # (B, dim, dim)
    wres = jnp.einsum("cd,bde,eo->bco", wq_eff, A, params["wp"]).astype(jnp.bfloat16)  # (B,Cin,Cout)
    bres = jnp.einsum("d,bde,eo->bo", o1, A, params["wp"]) + (o2 @ params["wp"])       # (B, Cout)
    bias_all = (scale[:, 0, :] * params["bconv"].reshape(1, Cout)
                + bres).reshape(B, 1, Cout).astype(jnp.float32)

    # ---- halo tile: zero-pad NHWC, flatten rows, cast to bf16 ONCE in the wrapper ----
    x_nhwc = jnp.transpose(x, (0, 2, 3, 1))
    xpad = jnp.pad(x_nhwc, ((0, 0), (p, p + 1), (p, p), (0, 0)))   # extra bottom slack row
    xflat = xpad.reshape(B, FLAT, Cin).astype(jnp.bfloat16)        # bf16 halo tile in HBM

    wconv_flat = params["wconv"].reshape(KKC, Cout).astype(jnp.bfloat16)  # position-major

    kern = functools.partial(_unit_kernel, M=M, K=K, Wp=Wp, pad=p, Cin=Cin)

    flops = int(2 * B * M * (KKC * Cout + Cin * Cout))
    bytes_accessed = int(xflat.size * 2 + B * M * Cout * 4
                         + wconv_flat.size * 2 + wres.size * 2)

    out_flat = pl.pallas_call(
        kern,
        out_shape=jax.ShapeDtypeStruct((B, M, Cout), jnp.float32),
        grid=(B,),
        in_specs=[
            pl.BlockSpec((1, FLAT, Cin), lambda b: (b, 0, 0)),   # xflat (bf16 halo tile)
            pl.BlockSpec((1, 1, Cout), lambda b: (b, 0, 0)),     # scale (per batch)
            pl.BlockSpec((1, Cin, Cout), lambda b: (b, 0, 0)),   # W_res (per batch, folded)
            pl.BlockSpec((1, 1, Cout), lambda b: (b, 0, 0)),     # bias_all (per batch)
            pl.BlockSpec((KKC, Cout), lambda b: (0, 0)),         # wconv (K*K*Cin, Cout)
        ],
        out_specs=pl.BlockSpec((1, M, Cout), lambda b: (b, 0, 0)),
        scratch_shapes=[pltpu.VMEM((M, KKC), jnp.bfloat16)],
        compiler_params=pltpu.CompilerParams(
            dimension_semantics=("parallel",),
            vmem_limit_bytes=48 * 1024 * 1024),
        cost_estimate=pl.CostEstimate(flops=flops, transcendentals=0,
                                      bytes_accessed=bytes_accessed),
    )(xflat, scale, wres, bias_all, wconv_flat)

    out = out_flat.reshape(B, H, Wp, Cout)[:, :, :W, :]   # drop wrap-around junk columns
    return jnp.transpose(out, (0, 3, 1, 2))               # back to NCHW


def unit_reference(x_nchw, params, *, kernel_size, dim):
    """Pure-JAX f32 ground truth of the same forward (for verification)."""
    B, Cin, H, W = x_nchw.shape
    Cout = params["wconv"].shape[-1]
    K = kernel_size
    p = K // 2
    HW = H * W
    x = jnp.transpose(x_nchw, (0, 2, 3, 1)).astype(jnp.float32)
    xf = x.reshape(B, HW, Cin)

    y = jnp.mean(xf, axis=1)
    y = y @ params["wfc1"]
    y = y * _hsigmoid(y @ params["wse"])
    phi = (y @ params["wphi"]).reshape(B, dim, dim)
    scale = _hsigmoid(y @ params["wscale"])

    r = jnp.einsum("bpc,cd->bpd", xf, params["wq"])
    g1, b1, m1, v1 = params["bn1"]
    r = (r - m1) * (g1 / jnp.sqrt(v1 + BN_EPS)) + b1
    mm = jnp.einsum("bpd,bed->bpe", r, phi)               # == r @ phi.T
    g2, b2, m2, v2 = params["bn2"]
    mm = (mm - m2) * (g2 / jnp.sqrt(v2 + BN_EPS)) + b2
    res = jnp.einsum("bpd,do->bpo", mm + r, params["wp"])

    xp = jnp.pad(x, ((0, 0), (p, p), (p, p), (0, 0)))
    out = jnp.zeros((B, HW, Cout), jnp.float32)
    for di in range(K):
        for dj in range(K):
            patch = xp[:, di:di + H, dj:dj + W, :].reshape(B, HW, Cin)
            out = out + jnp.einsum("bpc,co->bpo", patch, params["wconv"][di * K + dj])
    out = out + params["bconv"]
    final = scale[:, None, :] * out + res
    return final.reshape(B, H, W, Cout).transpose(0, 3, 1, 2)


def make_params(key, Cin, Cout, K, dim, sq):
    ks = jax.random.split(key, 16)
    n = lambda k, shp, s=0.1: (jax.random.normal(k, shp, jnp.float32) * s)
    bn = lambda kg, kb, km, kv, d: jnp.stack([
        1.0 + n(kg, (d,)),                      # gamma
        n(kb, (d,)),                            # beta
        n(km, (d,)),                            # running_mean
        0.5 + jnp.abs(n(kv, (d,), 0.5)),        # running_var (>0)
    ], axis=0)
    return {
        "wfc1":   n(ks[0], (Cin, sq)),
        "wse":    n(ks[1], (sq, sq)),
        "wphi":   n(ks[2], (sq, dim * dim)),
        "wscale": n(ks[3], (sq, Cout)),
        "wq":     n(ks[4], (Cin, dim)),
        "bn1":    bn(ks[5], ks[6], ks[7], ks[8], dim),
        "bn2":    bn(ks[9], ks[10], ks[11], ks[12], dim),
        "wp":     n(ks[13], (dim, Cout)),
        "wconv":  n(ks[14], (K * K, Cin, Cout), 0.05),   # (kh*kw, Cin, Cout), position-major
        "bconv":  n(ks[15], (1, Cout)),
    }


if __name__ == "__main__":
    # Unit(in_channels=128, out_channels=128, kernel_size=3, padding=1, deploy=True)
    B, Cin, H, W = 4, 128, 16, 16
    Cout, K = 128, 3
    dim = int(math.sqrt(Cin))                      # 11
    sq = max(Cin, dim * dim) // 16                 # 8

    key = jax.random.PRNGKey(0)
    kx, kp = jax.random.split(key)
    x = jax.random.normal(kx, (B, Cin, H, W), jnp.float32)
    params = make_params(kp, Cin, Cout, K, dim, sq)

    out = unit_forward(x, params, kernel_size=K, dim=dim)
    out = jax.block_until_ready(out)

    ref = unit_reference(x, params, kernel_size=K, dim=dim)
    assert out.shape == (B, Cout, H, W)
    # bf16 MXU operands vs f32 ground truth -> loose-ish tolerance; structural bugs give O(1).
    max_err = float(jnp.max(jnp.abs(out - ref)))
    assert jnp.allclose(out, ref, rtol=5e-2, atol=5e-2), f"mismatch vs reference, max|err|={max_err}"

    print("KERNEL_OK")
</pallas_src>

<mosaic_0001>
module attributes {stable_mosaic.version = 11 : i64} {
  func.func @_unit_kernel(%arg0: i32, %arg1: memref<1x342x128xbf16, #tpu.memory_space<vmem>>, %arg2: memref<1x1x128xf32, #tpu.memory_space<vmem>>, %arg3: memref<1x128x128xbf16, #tpu.memory_space<vmem>>, %arg4: memref<1x1x128xf32, #tpu.memory_space<vmem>>, %arg5: memref<1152x128xbf16, #tpu.memory_space<vmem>>, %arg6: memref<1x288x128xf32, #tpu.memory_space<vmem>>, %arg7: memref<288x1152xbf16, #tpu.memory_space<vmem>>) attributes {dimension_semantics = [#tpu.dimension_semantics<parallel>], iteration_bounds = array<i64: 4>, scalar_prefetch = 0 : i64, scratch_operands = 1 : i64, tpu.core_type = #tpu.core_type<tc>, window_params = [{transform_indices = @transform_0, window_bounds = array<i64: 1, 342, 128>}, {transform_indices = @transform_1, window_bounds = array<i64: 1, 1, 128>}, {transform_indices = @transform_2, window_bounds = array<i64: 1, 128, 128>}, {transform_indices = @transform_3, window_bounds = array<i64: 1, 1, 128>}, {pipeline_mode = #tpu.pipeline_mode<synchronous>, transform_indices = @transform_4, window_bounds = array<i64: 1152, 128>}, {transform_indices = @transform_5, window_bounds = array<i64: 1, 288, 128>}]} {
    %c0 = arith.constant 0 : index
    %c0_0 = arith.constant 0 : index
    %c0_1 = arith.constant 0 : index
    %0 = vector.load %arg1[%c0, %c0_0, %c0_1] : memref<1x342x128xbf16, #tpu.memory_space<vmem>>, vector<1x288x128xbf16>
    %1 = vector.shape_cast %0 : vector<1x288x128xbf16> to vector<288x128xbf16>
    %c0_2 = arith.constant 0 : index
    %c0_3 = arith.constant 0 : index
    %2 = vector.load %arg7[%c0_2, %c0_3] : memref<288x1152xbf16, #tpu.memory_space<vmem>>, vector<288x128xbf16>
    tpu.vector_store %arg7[%c0_2, %c0_3], %1 {strides = array<i32>} : memref<288x1152xbf16, #tpu.memory_space<vmem>>, vector<288x128xbf16>,
    %c0_4 = arith.constant 0 : index
    %c1 = arith.constant 1 : index
    %c0_5 = arith.constant 0 : index
    %3 = vector.load %arg1[%c0_4, %c1, %c0_5] : memref<1x342x128xbf16, #tpu.memory_space<vmem>>, vector<1x288x128xbf16>
    %4 = vector.shape_cast %3 : vector<1x288x128xbf16> to vector<288x128xbf16>
    %c0_6 = arith.constant 0 : index
    %c128 = arith.constant 128 : index
    %5 = vector.load %arg7[%c0_6, %c128] : memref<288x1152xbf16, #tpu.memory_space<vmem>>, vector<288x128xbf16>
    tpu.vector_store %arg7[%c0_6, %c128], %4 {strides = array<i32>} : memref<288x1152xbf16, #tpu.memory_space<vmem>>, vector<288x128xbf16>,
    %c0_7 = arith.constant 0 : index
    %c2 = arith.constant 2 : index
    %c0_8 = arith.constant 0 : index
    %6 = vector.load %arg1[%c0_7, %c2, %c0_8] : memref<1x342x128xbf16, #tpu.memory_space<vmem>>, vector<1x288x128xbf16>
    %7 = vector.shape_cast %6 : vector<1x288x128xbf16> to vector<288x128xbf16>
    %c0_9 = arith.constant 0 : index
    %c256 = arith.constant 256 : index
    %8 = vector.load %arg7[%c0_9, %c256] : memref<288x1152xbf16, #tpu.memory_space<vmem>>, vector<288x128xbf16>
    tpu.vector_store %arg7[%c0_9, %c256], %7 {strides = array<i32>} : memref<288x1152xbf16, #tpu.memory_space<vmem>>, vector<288x128xbf16>,
    %c0_10 = arith.constant 0 : index
    %c0_11 = arith.constant 0 : index
    %9 = vector.load %arg7[%c0_10, %c0_11] : memref<288x1152xbf16, #tpu.memory_space<vmem>>, vector<288x384xbf16>
    %c0_12 = arith.constant 0 : index
    %c0_13 = arith.constant 0 : index
    %10 = vector.load %arg5[%c0_12, %c0_13] : memref<1152x128xbf16, #tpu.memory_space<vmem>>, vector<384x128xbf16>
    %cst = arith.constant dense<0.000000e+00> : vector<288x128xf32>
    %11 = tpu.matmul %9, %10, %cst {dimension_numbers = #tpu.dot_dimension_numbers<[1], [0], [0], [1], [0, 0, 1, 1], [], []>} : vector<288x384xbf16>, vector<384x128xbf16>, vector<288x128xf32> -> vector<288x128xf32>
    %c0_14 = arith.constant 0 : index
    %c18 = arith.constant 18 : index
    %c0_15 = arith.constant 0 : index
    %12 = vector.load %arg1[%c0_14, %c18, %c0_15] : memref<1x342x128xbf16, #tpu.memory_space<vmem>>, vector<1x288x128xbf16>
    %13 = vector.shape_cast %12 : vector<1x288x128xbf16> to vector<288x128xbf16>
    %c0_16 = arith.constant 0 : index
    %c384 = arith.constant 384 : index
    %14 = vector.load %arg7[%c0_16, %c384] : memref<288x1152xbf16, #tpu.memory_space<vmem>>, vector<288x128xbf16>
    tpu.vector_store %arg7[%c0_16, %c384], %13 {strides = array<i32>} : memref<288x1152xbf16, #tpu.memory_space<vmem>>, vector<288x128xbf16>,
    %c0_17 = arith.constant 0 : index
    %c19 = arith.constant 19 : index
    %c0_18 = arith.constant 0 : index
    %15 = vector.load %arg1[%c0_17, %c19, %c0_18] : memref<1x342x128xbf16, #tpu.memory_space<vmem>>, vector<1x288x128xbf16>
    %16 = vector.shape_cast %15 : vector<1x288x128xbf16> to vector<288x128xbf16>
    %c0_19 = arith.constant 0 : index
    %c512 = arith.constant 512 : index
    %17 = vector.load %arg7[%c0_19, %c512] : memref<288x1152xbf16, #tpu.memory_space<vmem>>, vector<288x128xbf16>
    tpu.vector_store %arg7[%c0_19, %c512], %16 {strides = array<i32>} : memref<288x1152xbf16, #tpu.memory_space<vmem>>, vector<288x128xbf16>,
    %c0_20 = arith.constant 0 : index
    %c20 = arith.constant 20 : index
    %c0_21 = arith.constant 0 : index
    %18 = vector.load %arg1[%c0_20, %c20, %c0_21] : memref<1x342x128xbf16, #tpu.memory_space<vmem>>, vector<1x288x128xbf16>
    %19 = vector.shape_cast %18 : vector<1x288x128xbf16> to vector<288x128xbf16>
    %c0_22 = arith.constant 0 : index
    %c640 = arith.constant 640 : index
    %20 = vector.load %arg7[%c0_22, %c640] : memref<288x1152xbf16, #tpu.memory_space<vmem>>, vector<288x128xbf16>
    tpu.vector_store %arg7[%c0_22, %c640], %19 {strides = array<i32>} : memref<288x1152xbf16, #tpu.memory_space<vmem>>, vector<288x128xbf16>,
    %c0_23 = arith.constant 0 : index
    %c384_24 = arith.constant 384 : index
    %21 = vector.load %arg7[%c0_23, %c384_24] : memref<288x1152xbf16, #tpu.memory_space<vmem>>, vector<288x384xbf16>
    %c384_25 = arith.constant 384 : index
    %c0_26 = arith.constant 0 : index
    %22 = vector.load %arg5[%c384_25, %c0_26] : memref<1152x128xbf16, #tpu.memory_space<vmem>>, vector<384x128xbf16>
    %cst_27 = arith.constant dense<0.000000e+00> : vector<288x128xf32>
    %23 = tpu.matmul %21, %22, %cst_27 {dimension_numbers = #tpu.dot_dimension_numbers<[1], [0], [0], [1], [0, 0, 1, 1], [], []>} : vector<288x384xbf16>, vector<384x128xbf16>, vector<288x128xf32> -> vector<288x128xf32>
    %24 = arith.addf %11, %23 : vector<288x128xf32>
    %c0_28 = arith.constant 0 : index
    %c36 = arith.constant 36 : index
    %c0_29 = arith.constant 0 : index
    %25 = vector.load %arg1[%c0_28, %c36, %c0_29] : memref<1x342x128xbf16, #tpu.memory_space<vmem>>, vector<1x288x128xbf16>
    %26 = vector.shape_cast %25 : vector<1x288x128xbf16> to vector<288x128xbf16>
    %c0_30 = arith.constant 0 : index
    %c768 = arith.constant 768 : index
    %27 = vector.load %arg7[%c0_30, %c768] : memref<288x1152xbf16, #tpu.memory_space<vmem>>, vector<288x128xbf16>
    tpu.vector_store %arg7[%c0_30, %c768], %26 {strides = array<i32>} : memref<288x1152xbf16, #tpu.memory_space<vmem>>, vector<288x128xbf16>,
    %c0_31 = arith.constant 0 : index
    %c37 = arith.constant 37 : index
    %c0_32 = arith.constant 0 : index
    %28 = vector.load %arg1[%c0_31, %c37, %c0_32] : memref<1x342x128xbf16, #tpu.memory_space<vmem>>, vector<1x288x128xbf16>
    %29 = vector.shape_cast %28 : vector<1x288x128xbf16> to vector<288x128xbf16>
    %c0_33 = arith.constant 0 : index
    %c896 = arith.constant 896 : index
    %30 = vector.load %arg7[%c0_33, %c896] : memref<288x1152xbf16, #tpu.memory_space<vmem>>, vector<288x128xbf16>
    tpu.vector_store %arg7[%c0_33, %c896], %29 {strides = array<i32>} : memref<288x1152xbf16, #tpu.memory_space<vmem>>, vector<288x128xbf16>,
    %c0_34 = arith.constant 0 : index
    %c38 = arith.constant 38 : index
    %c0_35 = arith.constant 0 : index
    %31 = vector.load %arg1[%c0_34, %c38, %c0_35] : memref<1x342x128xbf16, #tpu.memory_space<vmem>>, vector<1x288x128xbf16>
    %32 = vector.shape_cast %31 : vector<1x288x128xbf16> to vector<288x128xbf16>
    %c0_36 = arith.constant 0 : index
    %c1024 = arith.constant 1024 : index
    %33 = vector.load %arg7[%c0_36, %c1024] : memref<288x1152xbf16, #tpu.memory_space<vmem>>, vector<288x128xbf16>
    tpu.vector_store %arg7[%c0_36, %c1024], %32 {strides = array<i32>} : memref<288x1152xbf16, #tpu.memory_space<vmem>>, vector<288x128xbf16>,
    %c0_37 = arith.constant 0 : index
    %c768_38 = arith.constant 768 : index
    %34 = vector.load %arg7[%c0_37, %c768_38] : memref<288x1152xbf16, #tpu.memory_space<vmem>>, vector<288x384xbf16>
    %c768_39 = arith.constant 768 : index
    %c0_40 = arith.constant 0 : index
    %35 = vector.load %arg5[%c768_39, %c0_40] : memref<1152x128xbf16, #tpu.memory_space<vmem>>, vector<384x128xbf16>
    %cst_41 = arith.constant dense<0.000000e+00> : vector<288x128xf32>
    %36 = tpu.matmul %34, %35, %cst_41 {dimension_numbers = #tpu.dot_dimension_numbers<[1], [0], [0], [1], [0, 0, 1, 1], [], []>} : vector<288x384xbf16>, vector<384x128xbf16>, vector<288x128xf32> -> vector<288x128xf32>
    %37 = arith.addf %24, %36 : vector<288x128xf32>
    %c0_42 = arith.constant 0 : index
    %c512_43 = arith.constant 512 : index
    %38 = vector.load %arg7[%c0_42, %c512_43] : memref<288x1152xbf16, #tpu.memory_space<vmem>>, vector<288x128xbf16>
    %c0_44 = arith.constant 0 : index
    %c0_45 = arith.constant 0 : index
    %c0_46 = arith.constant 0 : index
    %39 = vector.load %arg3[%c0_44, %c0_45, %c0_46] : memref<1x128x128xbf16, #tpu.memory_space<vmem>>, vector<1x128x128xbf16>
    %40 = vector.shape_cast %39 : vector<1x128x128xbf16> to vector<128x128xbf16>
    %cst_47 = arith.constant dense<0.000000e+00> : vector<288x128xf32>
    %41 = tpu.matmul %38, %40, %cst_47 {dimension_numbers = #tpu.dot_dimension_numbers<[1], [0], [0], [1], [0, 0, 1, 1], [], []>} : vector<288x128xbf16>, vector<128x128xbf16>, vector<288x128xf32> -> vector<288x128xf32>
    %c0_48 = arith.constant 0 : index
    %c0_49 = arith.constant 0 : index
    %c0_50 = arith.constant 0 : index
    %42 = vector.load %arg2[%c0_48, %c0_49, %c0_50] : memref<1x1x128xf32, #tpu.memory_space<vmem>>, vector<1x1x128xf32>
    %43 = vector.shape_cast %42 : vector<1x1x128xf32> to vector<1x128xf32>
    %44 = vector.broadcast %43 : vector<1x128xf32> to vector<288x128xf32>
    %45 = arith.mulf %44, %37 : vector<288x128xf32>
    %46 = arith.addf %45, %41 : vector<288x128xf32>
    %c0_51 = arith.constant 0 : index
    %c0_52 = arith.constant 0 : index
    %c0_53 = arith.constant 0 : index
    %47 = vector.load %arg4[%c0_51, %c0_52, %c0_53] : memref<1x1x128xf32, #tpu.memory_space<vmem>>, vector<1x1x128xf32>
    %48 = vector.shape_cast %47 : vector<1x1x128xf32> to vector<1x128xf32>
    %49 = vector.broadcast %48 : vector<1x128xf32> to vector<288x128xf32>
    %50 = arith.addf %46, %49 : vector<288x128xf32>
    %c0_54 = arith.constant 0 : index
    %c0_55 = arith.constant 0 : index
    %c0_56 = arith.constant 0 : index
    %51 = vector.load %arg6[%c0_54, %c0_55, %c0_56] : memref<1x288x128xf32, #tpu.memory_space<vmem>>, vector<1x288x128xf32>
    %52 = vector.shape_cast %51 : vector<1x288x128xf32> to vector<288x128xf32>
    %53 = vector.shape_cast %50 : vector<288x128xf32> to vector<1x288x128xf32>
    tpu.vector_store %arg6[%c0_54, %c0_55, %c0_56], %53 {strides = array<i32>} : memref<1x288x128xf32, #tpu.memory_space<vmem>>, vector<1x288x128xf32>,
    return
  }
  func.func @transform_0(%arg0: i32) -> (i32, i32, i32) {
    %c0_i32 = arith.constant 0 : i32
    %c0_i32_0 = arith.constant 0 : i32
    %c0_i32_1 = arith.constant 0 : i32
    return %arg0, %c0_i32, %c0_i32_0 : i32, i32, i32
  }
  func.func @transform_1(%arg0: i32) -> (i32, i32, i32) {
    %c0_i32 = arith.constant 0 : i32
    %c0_i32_0 = arith.constant 0 : i32
    %c0_i32_1 = arith.constant 0 : i32
    return %arg0, %c0_i32, %c0_i32_0 : i32, i32, i32
  }
  func.func @transform_2(%arg0: i32) -> (i32, i32, i32) {
    %c0_i32 = arith.constant 0 : i32
    %c0_i32_0 = arith.constant 0 : i32
    %c0_i32_1 = arith.constant 0 : i32
    return %arg0, %c0_i32, %c0_i32_0 : i32, i32, i32
  }
  func.func @transform_3(%arg0: i32) -> (i32, i32, i32) {
    %c0_i32 = arith.constant 0 : i32
    %c0_i32_0 = arith.constant 0 : i32
    %c0_i32_1 = arith.constant 0 : i32
    return %arg0, %c0_i32, %c0_i32_0 : i32, i32, i32
  }
  func.func @transform_4(%arg0: i32) -> (i32, i32) {
    %c0_i32 = arith.constant 0 : i32
    %c0_i32_0 = arith.constant 0 : i32
    %c0_i32_1 = arith.constant 0 : i32
    return %c0_i32, %c0_i32_0 : i32, i32
  }
  func.func @transform_5(%arg0: i32) -> (i32, i32, i32) {
    %c0_i32 = arith.constant 0 : i32
    %c0_i32_0 = arith.constant 0 : i32
    %c0_i32_1 = arith.constant 0 : i32
    return %arg0, %c0_i32, %c0_i32_0 : i32, i32, i32
  }
}

</mosaic_0001>

<bundles_post_ra>
// kernel: tpu_custom_call.1
= control target key start
LH: loop header
LB: loop body
LE: loop exit
PB: predicated region body
PF: predicated region fallthrough
CT: control target
= control target key end

     0   :  { %10 = vsyncpa [#allocation4], 0  ;;  %s10304_s0 = inlined_call_operand.vmem [shape: bf16[4,342,128], index: 0, kind: input, shape index: {}]   ;;  %s10305_s1 = inlined_call_operand.vmem [shape: f32[4,1,128], index: 1, kind: input, shape index: {}]   ;;  %s10306_s2 = inlined_call_operand.vmem [shape: bf16[4,128,128], index: 2, kind: input, shape index: {}]   ;;  %s10307_s3 = inlined_call_operand.vmem [shape: f32[4,1,128], index: 3, kind: input, shape index: {}]   ;;  %s10308_s4 = inlined_call_operand.vmem [shape: bf16[1152,128], index: 4, kind: input, shape index: {}]   ;;  %s10309_s5 = inlined_call_operand.hbm [shape: f32[4,288,128], index: 5, kind: output, shape index: {}]  }
   0x1   :  { %12 = vsyncpa [#allocation4 + $0x1], 0  ;;  %s7689_s18 = smov 0   ;;  %s7691_s19 = smov 0  }
   0x2   :  { %s7693_s20 = smov 0   ;;  %s7695_s21 = smov 0  }
   0x3 LB: > { %s7710_s22 = sadd.s32 4294967295, %s7655_s21   ;;  %s6213_s23 = sadd.s32 4294967294, %s7655_s21   ;;  %s7655_s21 = sphi %s7695_s21, %s10397_s21   ;;  %s7651_s20 = sphi %s7693_s20, %s10396_s20   ;;  %s7647_s19 = sphi %s7691_s19, %s10395_s19   ;;  %s7643_s18 = sphi %s7689_s18, %s10394_s18  }
   0x4   : > { %s7714_s24 = sadd.s32 1, %s7655_s21   ;;  %s150_s25 = sadd.s32 1, %s7651_s20 }
   0x5   : > { %s147_s26 = ssub.s32 %s7655_s21, %s7714_s24  ;;  %p160_p0 = scmp.ne.s32.totalorder %s7651_s20, %s7647_s19 }
   0x6   : > { %p148_p1 = scmp.eq.s32.totalorder %s147_s26, 0  ;;  %p161_p2 = scmp.eq.s32.totalorder %s7710_s22, 3 }
   0x7   : > { %p166_p3 = scmp.ne.s32.totalorder %s7647_s19, %s7643_s18  ;;  %p167_p4 = scmp.eq.s32.totalorder %s6213_s23, 3 }
   0x8   : > { %s7725_s27 = scalar_select %p148_p1, %s7651_s20, %s150_s25  }
   0x9   : > { %p7727_p5 = por %p161_p2, %p160_p0  ;;  %p7731_p6 = por %p167_p4, %p166_p3 }
   0xa   : > { %p6216_p7 = scmp.ge.s32.totalorder %s7655_s21, 1  ;;  %p216_p8 = scmp.lt.s32.totalorder %s7655_s21, 5 }
   0xc   : > { %p217_p9 = pnand %p6216_p7, %p216_p8 }
   0xe   : > { %220 = sbr.rel (%p217_p9) target bundleno = 916 (0x394), region = 40 }
  0x13   : > { %v7408_v0 = vld [vmem:[%s10308_s4 + $0xf8] sm:$0xff]  ;;  %p255_p10 = scmp.lt.s32.totalorder %s7710_s22, 3  ;;  %v7407_v2 = vld [vmem:[%s10308_s4 + $0xf0] sm:$0xff]  ;;  %vm893_vm0 = vcmask 1042432   ;;  %vm894_vm1 = vcmask 1046532   ;;  %v7406_v4 = vld [vmem:[%s10308_s4 + $0xe8] sm:$0xff] }
  0x14   : > { %v7416_v1 = vld [vmem:[%s10308_s4 + $0x138] sm:$0xff]  ;;  %2742 = vmatpush.bf16.msra.mxu0 %v7408_v0  ;;  %7529 = vmatpush.bf16.msra.mxu2 %v7408_v0  ;;  %v7415_v3 = vld [vmem:[%s10308_s4 + $0x130] sm:$0xff]  ;;  %v7414_v5 = vld [vmem:[%s10308_s4 + $0x128] sm:$0xff]  ;;  %vm1489_vm3 = vsmask.f32 2304  ;;  %vm2006_vm6 = vcmask 1041408  }
  0x15   : > { %s7748_s11 = scalar_select %p255_p10, %s7710_s22, 3  ;;  %2841 = vmatpush.bf16.msra.mxu1 %v7416_v1  ;;  %7537 = vmatpush.bf16.msra.mxu3 %v7416_v1  ;;  %vm7765_vm2 = vmor %vm893_vm0, %vm894_vm1  ;;  %vm1490_vm4 = vsmask.f32 6416  ;;  %v7405_v14 = vld [vmem:[%s10308_s4 + $0xe0] sm:$0xff]  ;;  %v7404_v32 = vld [vmem:[%s10308_s4 + $0xd8] sm:$0xff]  ;;  %vm2007_vm7 = vcmask 1045508  }
  0x16   : > { %v7413_v18 = vld [vmem:[%s10308_s4 + $0x120] sm:$0xff]  ;;  %v7412_v37 = vld [vmem:[%s10308_s4 + $0x118] sm:$0xff]  ;;  %vm7818_vm5 = vmor %vm1489_vm3, %vm1490_vm4  ;;  %vm380_vm9 = vsmask.f32 3328  ;;  %vm381_vm10 = vsmask.f32 7440 }
  0x17   : > { %s7546_s14 = smul.u32 172, %s7748_s11  ;;  %v7403_v55 = vld [vmem:[%s10308_s4 + $0xd0] sm:$0xff]  ;;  %vm8339_vm8 = vmor %vm2006_vm6, %vm2007_vm7  ;;  %s7268_s10 = sshll.u32 %s7748_s11, 6  ;;  %vm4060_vm12 = vsmask.f32 1280  ;;  %vm4577_vm15 = vcmask 1040384  }
  0x18   : > { %2743 = vmatpush.bf16.msra.mxu0 %v7407_v2  ;;  %7530 = vmatpush.bf16.msra.mxu2 %v7407_v2  ;;  %v7411_v56 = vld [vmem:[%s10308_s4 + $0x110] sm:$0xff]  ;;  %vm8352_vm11 = vmor %vm380_vm9, %vm381_vm10  ;;  %s8421_s16 = scalar_lea.vmem %s10306_s2, %s7268_s10  ;;  %vm4061_vm13 = vsmask.f32 5392  ;;  %vm4578_vm0 = vcmask 1044484   ;;  %s9484_s6 = scalar_lea.vmem %s10305_s1, %s7748_s11 }
  0x19   : > { %s7763_s30 = scalar_lea.vmem %s10304_s0, %s7546_s14  ;;  %2842 = vmatpush.bf16.msra.mxu1 %v7415_v3  ;;  %7538 = vmatpush.bf16.msra.mxu3 %v7415_v3  ;;  %vm9348_vm14 = vmor %vm4060_vm12, %vm4061_vm13  ;;  %s9500_s9 = scalar_lea.vmem %s10307_s3, %s7748_s11 }
  0x1a   : > { %v1197_v7 = vld [vmem:[%s7763_s30 + $0x8] sm:$0xe]  ;;  %v1198_v8 = vld [vmem:[%s7763_s30 + $0xc] sm:$0xf]  ;;  %v7772_v9 = vld [vmem:[%s7763_s30 + $0x10] sm:$0xf] }
  0x1b   : > { %v6221_v10 = vrot.slane %v1197_v7, 9  ;;  %v1273_v11 = vrot.slane %v1198_v8, 5  ;;  %v1276_v12 = vrot.slane %v7772_v9, 5  ;;  %v7776_v13 = vld [vmem:[%s7763_s30 + $0x50] sm:$0xf]  ;;  %v7402_v8 = vld [vmem:[%s10308_s4 + $0xc8] sm:$0xff]  ;;  %vm9363_vm1 = vmor %vm4577_vm15, %vm4578_vm0 }
  0x1c   : > { %v1216_v15 = vld [vmem:[%s7763_s30 + $0x54] sm:$0xf]  ;;  %v7783_v16 = vld [vmem:[%s7763_s30 + $0x58] sm:$0xf]  ;;  %v1324_v17 = vrot.slane %v7776_v13, 5  ;;  %2744 = vmatpush.bf16.msra.mxu0 %v7406_v4  ;;  %7531 = vmatpush.bf16.msra.mxu2 %v7406_v4  ;;  %s252_s11 = sand.u32 1, %s7647_s19  }
  0x1d   : > { %v1274_v19 = vsel %vm7765_vm2, %v6221_v10, %v1273_v11  ;;  %v1275_v20 = vrot.slane %v1273_v11, 4  ;;  %v1327_v21 = vrot.slane %v1216_v15, 5  ;;  %v1330_v22 = vrot.slane %v7783_v16, 5  ;;  %v1452_v23 = vld [vmem:[%s7763_s30 + $0x8] sm:$0xe]  ;;  %2843 = vmatpush.bf16.msra.mxu1 %v7414_v5  ;;  %7539 = vmatpush.bf16.msra.mxu3 %v7414_v5  ;;  %s9849_s10 = smul.u32 288, %s252_s11 }
  0x1e   : > { %1416 = vst [vmem:[#allocation2 + $0xc] sm:$0xf] %v1274_v19  ;;  %v1326_v24 = vrot.slane %v1324_v17, 4  ;;  %v1453_v25 = vld [vmem:[%s7763_s30 + $0xc] sm:$0xf]  ;;  %v1493_v26 = vshrl.u32 %v1452_v23, 16 }
  0x1f   : > { %v1277_v27 = vsel %vm7765_vm2, %v1275_v20, %v1276_v12  ;;  %v1329_v28 = vrot.slane %v1327_v21, 4  ;;  %v1454_v29 = vld [vmem:[%s7763_s30 + $0x10] sm:$0xf]  ;;  %v1496_v30 = vshll.u32 %v1452_v23, 16  ;;  %v1502_v31 = vshrl.u32 %v1453_v25, 16  ;;  %s9870_s12 = scalar_lea.vmem [#allocation3], %s9849_s10 }
  0x20   : > { %1417 = vst [vmem:[#allocation2 + $0x30] sm:$0xf] %v1277_v27  ;;  %v1328_v33 = vsel %vm7765_vm2, %v1326_v24, %v1327_v21  ;;  %v1495_v34 = vrot.slane %v1493_v26, 5  ;;  %v1505_v35 = vshll.u32 %v1453_v25, 16  ;;  %v1512_v36 = vshrl.u32 %v1454_v29, 16  ;;  %2745 = vmatpush.bf16.msra.mxu0 %v7405_v14  ;;  %7532 = vmatpush.bf16.msra.mxu2 %v7405_v14  ;;  %v7401_v26 = vld [vmem:[%s10308_s4 + $0xc0] sm:$0xff] }
  0x21   : > { %v1331_v38 = vsel %vm7765_vm2, %v1329_v28, %v1330_v22  ;;  %1434 = vst [vmem:[#allocation2 + $0x294] sm:$0xf] %v1328_v33  ;;  %v1498_v39 = vrot.slane %v1496_v30, 6  ;;  %v1504_v40 = vrot.slane %v1502_v31, 5  ;;  %v1515_v41 = vshll.u32 %v1454_v29, 16  ;;  %2844 = vmatpush.bf16.msra.mxu1 %v7413_v18  ;;  %7540 = vmatpush.bf16.msra.mxu3 %v7413_v18  ;;  %s6118_s17 = sshll.u32 %s9870_s12, 4  ;;  %s6119_s17 = int_to_ptr.vmem [resolvable:$true] %s6118_s17 }
  0x22   : > { %1435 = vst [vmem:[#allocation2 + $0x2b8] sm:$0xf] %v1331_v38  ;;  %v1507_v42 = vrot.slane %v1505_v35, 6  ;;  %v1514_v43 = vrot.slane %v1512_v36, 5  ;;  %v1470_v44 = vld [vmem:[%s7763_s30 + $0x50] sm:$0xf] }
  0x23   : > { %v1499_v45 = vor.u32 %v1498_v39, %v1495_v34  ;;  %v1517_v46 = vrot.slane %v1515_v41, 6  ;;  %v1471_v47 = vld [vmem:[%s7763_s30 + $0x54] sm:$0xf]  ;;  %v1472_v48 = vld [vmem:[%s7763_s30 + $0x58] sm:$0xf]  ;;  %v1672_v49 = vshrl.u32 %v1470_v44, 16 }
  0x24   : > { %v1508_v51 = vor.u32 %v1507_v42, %v1504_v40  ;;  %v1675_v52 = vshll.u32 %v1470_v44, 16  ;;  %v1682_v53 = vshrl.u32 %v1471_v47, 16  ;;  %v1685_v54 = vshll.u32 %v1471_v47, 16  ;;  %2746 = vmatpush.bf16.msra.mxu0 %v7404_v32  ;;  %7533 = vmatpush.bf16.msra.mxu2 %v7404_v32  ;;  %v1200_v1 = vld [vmem:[%s7763_s30 + $0x14] sm:$0xf]  ;;  %v7409_v35 = vld [vmem:[%s10308_s4 + $0x100] sm:$0xff] }
  0x25   : > { %v1500_v57 = vrot.slane %v1499_v45, 4  ;;  %v7828_v58 = vor.u32 %v1517_v46, %v1514_v43  ;;  %v1674_v59 = vrot.slane %v1672_v49, 5  ;;  %v1692_v60 = vshrl.u32 %v1472_v48, 16  ;;  %2845 = vmatpush.bf16.msra.mxu1 %v7412_v37  ;;  %7541 = vmatpush.bf16.msra.mxu3 %v7412_v37  ;;  %v7834_v5 = vld [vmem:[%s7763_s30 + $0x18] sm:$0xf]  ;;  %s6106_s23 = scalar_lea.sflag [#allocation4], %s252_s11 }
  0x26   : > { %v1510_v61 = vrot.slane %v1508_v51, 4  ;;  %v1677_v62 = vrot.slane %v1675_v52, 6  ;;  %v1684_v63 = vrot.slane %v1682_v53, 5  ;;  %v1687_v0 = vrot.slane %v1685_v54, 6  ;;  %v1218_v9 = vld [vmem:[%s7763_s30 + $0x5c] sm:$0xf] }
  0x27   : > { %v1509_v2 = vsel %vm7818_vm5, %v1500_v57, %v1508_v51  ;;  %v1694_v3 = vrot.slane %v1692_v60, 5  ;;  %v1695_v4 = vshll.u32 %v1472_v48, 16  ;;  %v1278_v7 = vrot.slane %v1276_v12, 4  ;;  %v7410_v12 = vld [vmem:[%s10308_s4 + $0x108] sm:$0xff]  ;;  %v7852_v20 = vld [vmem:[#allocation2 + $0x2c] sm:$0xf0] }
  0x28   : > { %v1519_v10 = vsel %vm7818_vm5, %v1510_v61, %v7828_v58  ;;  %1896 = vst [vmem:[#allocation2 + $0x10] sm:$0xf] %v1509_v2  ;;  %v7844_v11 = vor.u32 %v1677_v62, %v1674_v59  ;;  %v1688_v14 = vor.u32 %v1687_v0, %v1684_v63  ;;  %2747 = vmatpush.bf16.msra.mxu0 %v7403_v55  ;;  %v1279_v18 = vrot.slane %v1200_v1, 5  ;;  %v7850_v19 = vld [vmem:[#allocation2 + $0xc] sm:$0xf]  ;;  %v7330_v44 = vld [vmem:[%s10308_s4 + $0x38] sm:$0xff] }
  0x29   : > { %7534 = vmatpush.bf16.msra.mxu2 %v7403_v55  ;;  %1897 = vst [vmem:[#allocation2 + $0x34] sm:$0xf] %v1519_v10  ;;  %v1697_v15 = vrot.slane %v1695_v4, 6  ;;  %2846 = vmatpush.bf16.msra.mxu1 %v7411_v56  ;;  %v1282_v24 = vrot.slane %v7834_v5, 5  ;;  %v7857_v25 = vld [vmem:[%s7763_s30 + $0x60] sm:$0xf]  ;;  %v6226_v49 = vor.u32 %v7852_v20, %v7850_v19 }
  0x2a   : > { %7542 = vmatpush.bf16.msra.mxu3 %v7411_v56  ;;  %v1680_v21 = vrot.slane %v7844_v11, 4  ;;  %v1690_v23 = vrot.slane %v1688_v14, 4  ;;  %v7862_v27 = vld [vmem:[#allocation2 + $0x294] sm:$0xf]  ;;  %v7864_v28 = vld [vmem:[#allocation2 + $0x2b4] sm:$0xf0]  ;;  %v1280_v30 = vsel %vm7765_vm2, %v1278_v7, %v1279_v18 }
  0x2b   : > { %v7866_v29 = vor.u32 %v1697_v15, %v1694_v3  ;;  %v1281_v31 = vrot.slane %v1279_v18, 4  ;;  %v1332_v32 = vrot.slane %v1330_v22, 4  ;;  %v1455_v33 = vld [vmem:[%s7763_s30 + $0x14] sm:$0xf]  ;;  %v1456_v34 = vld [vmem:[%s7763_s30 + $0x18] sm:$0xf]  ;;  %v6334_v55 = vor.u32 %v7864_v28, %v7862_v27 }
  0x2c   : > { %v1689_v36 = vsel %vm7818_vm5, %v1680_v21, %v1688_v14  ;;  %1418 = vst [vmem:[#allocation2 + $0x54] sm:$0xf] %v1280_v30  ;;  %v1333_v37 = vrot.slane %v1218_v9, 5  ;;  %v1336_v38 = vrot.slane %v7857_v25, 5  ;;  %v1520_v39 = vrot.slane %v7828_v58, 4  ;;  %2748 = vmatpush.bf16.msra.mxu0 %v7402_v8  ;;  %v7424_v22 = vld [vmem:[%s10308_s4 + $0x178] sm:$0xff] }
  0x2d   : > { %7535 = vmatpush.bf16.msra.mxu2 %v7402_v8  ;;  %v1699_v16 = vsel %vm7818_vm5, %v1690_v23, %v7866_v29  ;;  %1914 = vst [vmem:[#allocation2 + $0x298] sm:$0xf] %v1689_v36  ;;  %v1283_v40 = vsel %vm7765_vm2, %v1281_v31, %v1282_v24  ;;  %v1522_v41 = vshrl.u32 %v1455_v33, 16  ;;  %v1525_v42 = vshll.u32 %v1455_v33, 16  ;;  %v1473_v43 = vld [vmem:[%s7763_s30 + $0x5c] sm:$0xf]  ;;  %2847 = vmatpush.bf16.msra.mxu1 %v7410_v12 }
  0x2e   : > { %7543 = vmatpush.bf16.msra.mxu3 %v7410_v12  ;;  %1915 = vst [vmem:[#allocation2 + $0x2bc] sm:$0xf] %v1699_v16  ;;  %v1334_v45 = vsel %vm7765_vm2, %v1332_v32, %v1333_v37  ;;  %v1335_v46 = vrot.slane %v1333_v37, 4  ;;  %v1532_v47 = vshrl.u32 %v1456_v34, 16  ;;  %v1535_v48 = vshll.u32 %v1456_v34, 16  ;;  %v7338_v52 = vld [vmem:[%s10308_s4 + $0x78] sm:$0xff] }
  0x2f   : > { %v7347_v51 = vld [vmem:[#allocation2 + $0x10] sm:$0xf]  ;;  %1419 = vst [vmem:[#allocation2 + $0x78] sm:$0xf] %v1283_v40  ;;  %v1524_v53 = vrot.slane %v1522_v41, 5  ;;  %v1527_v54 = vrot.slane %v1525_v42, 6 }
  0x30   : > { %v6227_v56 = vld [vmem:[#allocation2 + $0x30] sm:$0xf0]  ;;  %v1337_v57 = vsel %vm7765_vm2, %v1335_v46, %v1336_v38  ;;  %1436 = vst [vmem:[#allocation2 + $0x2dc] sm:$0xf] %v1334_v45  ;;  %v1534_v58 = vrot.slane %v1532_v47, 5  ;;  %v1537_v59 = vrot.slane %v1535_v48, 6  ;;  %2749 = vmatpush.bf16.msra.mxu0 %v7401_v26 }
  0x31   : > { %7536 = vmatpush.bf16.msra.mxu2 %v7401_v26  ;;  %v6230_v60 = vor.u32 %v7347_v51, %v6227_v56  ;;  %v7346_v61 = vld [vmem:[%s10308_s4 + $0xb8] sm:$0xff]  ;;  %1437 = vst [vmem:[#allocation2 + $0x300] sm:$0xf] %v1337_v57  ;;  %v1528_v62 = vor.u32 %v1527_v54, %v1524_v53  ;;  %v1474_v63 = vld [vmem:[%s7763_s30 + $0x60] sm:$0xf]  ;;  %v1702_v0 = vshrl.u32 %v1473_v43, 16  ;;  %2848 = vmatpush.bf16.msra.mxu1 %v7409_v35 }
  0x32   : > { %7544 = vmatpush.bf16.msra.mxu3 %v7409_v35  ;;  %v7912_v1 = vor.u32 %v1537_v59, %v1534_v58  ;;  %v1705_v2 = vshll.u32 %v1473_v43, 16  ;;  %v1712_v3 = vshrl.u32 %v1474_v63, 16  ;;  %v1715_v4 = vshll.u32 %v1474_v63, 16  ;;  %v7423_v7 = vld [vmem:[%s10308_s4 + $0x170] sm:$0xff]  ;;  %v1202_v8 = vld [vmem:[%s7763_s30 + $0x1c] sm:$0xf] }
  0x33   : > { %v1529_v10 = vsel %vm7818_vm5, %v1520_v39, %v1528_v62  ;;  %v1530_v14 = vrot.slane %v1528_v62, 4  ;;  %v1700_v15 = vrot.slane %v7866_v29, 4  ;;  %v1704_v18 = vrot.slane %v1702_v0, 5  ;;  %v7329_v9 = vld [vmem:[%s10308_s4 + $0x30] sm:$0xff]  ;;  %v7925_v12 = vld [vmem:[%s7763_s30 + $0x20] sm:$0xf]  ;;  %2750 = vmatmul.bf16.vlgmr.msra.gmra.mxu0 %v6226_v49 }
  0x34   : > { %2795 = vmatmul.bf16.vlgmr.msra.gmra.mxu2 %v6334_v55  ;;  %v7374_v19 = vld [vmem:[#allocation2 + $0x298] sm:$0xf]  ;;  %1898 = vst [vmem:[#allocation2 + $0x58] sm:$0xf] %v1529_v10  ;;  %v1707_v20 = vrot.slane %v1705_v2, 6  ;;  %v1714_v21 = vrot.slane %v1712_v3, 5  ;;  %2849 = vmatmul.bf16.vlgmr.msra.gmra.mxu1 %v6230_v60 }
  0x35   : > { %2940 = vmatpush.bf16.msrb.mxu2 %v7424_v22  ;;  %v6335_v23 = vld [vmem:[#allocation2 + $0x2b8] sm:$0xf0]  ;;  %3570 = vmatpush.bf16.msrb.mxu0 %v7338_v52  ;;  %v1539_v26 = vsel %vm7818_vm5, %v1530_v14, %v7912_v1  ;;  %v1717_v27 = vrot.slane %v1715_v4, 6  ;;  %v7337_v28 = vld [vmem:[%s10308_s4 + $0x70] sm:$0xff]  ;;  %v1284_v29 = vrot.slane %v1282_v24, 4  ;;  %v1285_v30 = vrot.slane %v1202_v8, 5 }
  0x36   : > { %3471 = vmatpush.bf16.msrb.mxu3 %v7330_v44  ;;  %v6338_v31 = vor.u32 %v7374_v19, %v6335_v23  ;;  %3669 = vmatpush.bf16.msrb.mxu1 %v7346_v61  ;;  %1899 = vst [vmem:[#allocation2 + $0x7c] sm:$0xf] %v1539_v26  ;;  %v1708_v32 = vor.u32 %v1707_v20, %v1704_v18  ;;  %v1288_v33 = vrot.slane %v7925_v12, 5  ;;  %v1338_v34 = vrot.slane %v1336_v38, 4  ;;  %v1220_v36 = vld [vmem:[%s7763_s30 + $0x64] sm:$0xf] }
  0x37   : > { %v7938_v35 = vor.u32 %v1717_v27, %v1714_v21  ;;  %v1286_v5 = vsel %vm7765_vm2, %v1284_v29, %v1285_v30  ;;  %v1287_v24 = vrot.slane %v1285_v30, 4  ;;  %v1339_v25 = vrot.slane %v1220_v36, 5  ;;  %v7945_v38 = vld [vmem:[#allocation2 + $0x54] sm:$0xf]  ;;  %v7351_v16 = vld [vmem:[#allocation2 + $0x74] sm:$0xf0] }
  0x38   : > { %2894 = vmatmul.bf16.vlgmr.msra.gmra.mxu3 %v6338_v31  ;;  %v1709_v37 = vsel %vm7818_vm5, %v1700_v15, %v1708_v32  ;;  %v1710_v39 = vrot.slane %v1708_v32, 4  ;;  %1420 = vst [vmem:[#allocation2 + $0x9c] sm:$0xf] %v1286_v5  ;;  %v7952_v40 = vld [vmem:[%s7763_s30 + $0x68] sm:$0xf]  ;;  %v7345_v56 = vld [vmem:[%s10308_s4 + $0xb0] sm:$0xff]  ;;  %v6238_v60 = vor.u32 %v7351_v16, %v7945_v38 }
  0x39   : > { %2941 = vmatpush.bf16.msrb.mxu2 %v7423_v7  ;;  %1916 = vst [vmem:[#allocation2 + $0x2e0] sm:$0xf] %v1709_v37  ;;  %3571 = vmatpush.bf16.msrb.mxu0 %v7337_v28  ;;  %v1289_v22 = vsel %vm7765_vm2, %v1287_v24, %v1288_v33  ;;  %v1457_v41 = vld [vmem:[%s7763_s30 + $0x1c] sm:$0xf]  ;;  %v1340_v44 = vsel %vm7765_vm2, %v1338_v34, %v1339_v25  ;;  %v1341_v45 = vrot.slane %v1339_v25, 4  ;;  %v1342_v46 = vrot.slane %v7952_v40, 5 }
  0x3a   : > { %3472 = vmatpush.bf16.msrb.mxu3 %v7329_v9  ;;  %v6345_v42 = vld [vmem:[#allocation2 + $0x2dc] sm:$0xf]  ;;  %v1719_v43 = vsel %vm7818_vm5, %v1710_v39, %v7938_v35  ;;  %1421 = vst [vmem:[#allocation2 + $0xc0] sm:$0xf] %v1289_v22  ;;  %v1458_v47 = vld [vmem:[%s7763_s30 + $0x20] sm:$0xf]  ;;  %3670 = vmatpush.bf16.msrb.mxu1 %v7345_v56 }
  0x3b   : > { %v7378_v48 = vld [vmem:[#allocation2 + $0x2fc] sm:$0xf0]  ;;  %1917 = vst [vmem:[#allocation2 + $0x304] sm:$0xf] %v1719_v43  ;;  %v1542_v49 = vshrl.u32 %v1457_v41, 16  ;;  %v1343_v52 = vsel %vm7765_vm2, %v1341_v45, %v1342_v46  ;;  %v1545_v53 = vshll.u32 %v1457_v41, 16 }
  0x3c   : > { %v7350_v51 = vld [vmem:[#allocation2 + $0x58] sm:$0xf]  ;;  %1438 = vst [vmem:[#allocation2 + $0x324] sm:$0xf] %v1340_v44  ;;  %v1552_v54 = vshrl.u32 %v1458_v47, 16  ;;  %v1555_v55 = vshll.u32 %v1458_v47, 16  ;;  %v6346_v3 = vor.u32 %v7378_v48, %v6345_v42 }
  0x3d   : > { %v6239_v57 = vld [vmem:[#allocation2 + $0x78] sm:$0xf0]  ;;  %1439 = vst [vmem:[#allocation2 + $0x348] sm:$0xf] %v1343_v52  ;;  %v1540_v58 = vrot.slane %v7912_v1, 4  ;;  %v1544_v59 = vrot.slane %v1542_v49, 5 }
  0x3e   : > { %v1547_v61 = vrot.slane %v1545_v53, 6  ;;  %v1554_v62 = vrot.slane %v1552_v54, 5  ;;  %v1557_v63 = vrot.slane %v1555_v55, 6  ;;  %v1475_v0 = vld [vmem:[%s7763_s30 + $0x64] sm:$0xf]  ;;  %v7422_v2 = vld [vmem:[%s10308_s4 + $0x168] sm:$0xff]  ;;  %v6242_v20 = vor.u32 %v7350_v51, %v6239_v57 }
  0x3f   : > { %v1476_v4 = vld [vmem:[%s7763_s30 + $0x68] sm:$0xf]  ;;  %v1720_v7 = vrot.slane %v7938_v35, 4  ;;  %v1722_v8 = vshrl.u32 %v1475_v0, 16  ;;  %v1725_v10 = vshll.u32 %v1475_v0, 16  ;;  %2942 = vmatpush.bf16.msrb.mxu2 %v7422_v2  ;;  %v1290_v5 = vrot.slane %v1288_v33, 4 }
  0x40   : > { %v1548_v1 = vor.u32 %v1547_v61, %v1544_v59  ;;  %v7977_v14 = vor.u32 %v1557_v63, %v1554_v62  ;;  %v1732_v15 = vshrl.u32 %v1476_v4, 16  ;;  %v1735_v18 = vshll.u32 %v1476_v4, 16  ;;  %v7328_v9 = vld [vmem:[%s10308_s4 + $0x28] sm:$0xff]  ;;  %v7377_v21 = vld [vmem:[#allocation2 + $0x2e0] sm:$0xf]  ;;  %s7613_s7 = scalar_lea.hbm %s10309_s5, 1152 }
  0x41   : > { %v7336_v19 = vld [vmem:[%s10308_s4 + $0x68] sm:$0xff]  ;;  %v1724_v23 = vrot.slane %v1722_v8, 5  ;;  %v1727_v26 = vrot.slane %v1725_v10, 6  ;;  %v1204_v27 = vld [vmem:[%s7763_s30 + $0x24] sm:$0xf]  ;;  %3473 = vmatpush.bf16.msrb.mxu3 %v7328_v9  ;;  %v1344_v42 = vrot.slane %v1342_v46, 4 }
  0x42   : > { %v6347_v28 = vld [vmem:[#allocation2 + $0x300] sm:$0xf0]  ;;  %v1549_v29 = vsel %vm7818_vm5, %v1540_v58, %v1548_v1  ;;  %v1550_v30 = vrot.slane %v1548_v1, 4  ;;  %v1734_v31 = vrot.slane %v1732_v15, 5  ;;  %3572 = vmatpush.bf16.msrb.mxu0 %v7336_v19  ;;  %v7989_v32 = vld [vmem:[%s7763_s30 + $0x28] sm:$0xf] }
  0x43   : > { %1900 = vst [vmem:[#allocation2 + $0xa0] sm:$0xf] %v1549_v29  ;;  %v1728_v34 = vor.u32 %v1727_v26, %v1724_v23  ;;  %v1737_v35 = vrot.slane %v1735_v18, 6  ;;  %2755 = vmatmul.bf16.gmra.mxu0 %v6238_v60  ;;  %v6350_v24 = vor.u32 %v7377_v21, %v6347_v28  ;;  %v1291_v37 = vrot.slane %v1204_v27, 5  ;;  %v1222_v25 = vld [vmem:[%s7763_s30 + $0x6c] sm:$0xf] }
  0x44   : > { %2800 = vmatmul.bf16.gmra.mxu2 %v6346_v3  ;;  %v1559_v36 = vsel %vm7818_vm5, %v1550_v30, %v7977_v14  ;;  %v1294_v39 = vrot.slane %v7989_v32, 5  ;;  %2854 = vmatmul.bf16.gmra.mxu1 %v6242_v20  ;;  %v8003_v33 = vld [vmem:[%s7763_s30 + $0x70] sm:$0xf]  ;;  %v1345_v43 = vrot.slane %v1222_v25, 5  ;;  %v1459_v47 = vld [vmem:[%s7763_s30 + $0x24] sm:$0xf] }
  0x45   : > { %1901 = vst [vmem:[#allocation2 + $0xc4] sm:$0xf] %v1559_v36  ;;  %v1729_v38 = vsel %vm7818_vm5, %v1720_v7, %v1728_v34  ;;  %v1730_v16 = vrot.slane %v1728_v34, 4  ;;  %v8000_v12 = vor.u32 %v1737_v35, %v1734_v31  ;;  %v1292_v22 = vsel %vm7765_vm2, %v1290_v5, %v1291_v37  ;;  %v1460_v49 = vld [vmem:[%s7763_s30 + $0x28] sm:$0xf]  ;;  %v7421_v3 = vld [vmem:[%s10308_s4 + $0x160] sm:$0xff] }
  0x46   : > { %1918 = vst [vmem:[#allocation2 + $0x328] sm:$0xf] %v1729_v38  ;;  %v1293_v41 = vrot.slane %v1291_v37, 4  ;;  %v1348_v45 = vrot.slane %v8003_v33, 5  ;;  %v1346_v40 = vsel %vm7765_vm2, %v1344_v42, %v1345_v43  ;;  %v1347_v46 = vrot.slane %v1345_v43, 4  ;;  %v7344_v58 = vld [vmem:[%s10308_s4 + $0xa8] sm:$0xff]  ;;  %2943 = vmatpush.bf16.msrb.mxu2 %v7421_v3 }
  0x47   : > { %v1739_v44 = vsel %vm7818_vm5, %v1730_v16, %v8000_v12  ;;  %1422 = vst [vmem:[#allocation2 + $0xe4] sm:$0xf] %v1292_v22  ;;  %v1562_v51 = vshrl.u32 %v1459_v47, 16  ;;  %v1565_v52 = vshll.u32 %v1459_v47, 16  ;;  %v1572_v53 = vshrl.u32 %v1460_v49, 16  ;;  %3671 = vmatpush.bf16.msrb.mxu1 %v7344_v58  ;;  %v7327_v18 = vld [vmem:[%s10308_s4 + $0x20] sm:$0xff] }
  0x48   : > { %2899 = vmatmul.bf16.gmra.mxu3 %v6350_v24  ;;  %1919 = vst [vmem:[#allocation2 + $0x34c] sm:$0xf] %v1739_v44  ;;  %v1295_v48 = vsel %vm7765_vm2, %v1293_v41, %v1294_v39  ;;  %v1575_v54 = vshll.u32 %v1460_v49, 16  ;;  %v1349_v55 = vsel %vm7765_vm2, %v1347_v46, %v1348_v45  ;;  %v1560_v56 = vrot.slane %v7977_v14, 4  ;;  %v6249_v59 = vld [vmem:[#allocation2 + $0x9c] sm:$0xf] }
  0x49   : > { %1423 = vst [vmem:[#allocation2 + $0x108] sm:$0xf] %v1295_v48  ;;  %v1564_v57 = vrot.slane %v1562_v51, 5  ;;  %v7354_v60 = vld [vmem:[#allocation2 + $0xbc] sm:$0xf0]  ;;  %v1567_v63 = vrot.slane %v1565_v52, 6  ;;  %3474 = vmatpush.bf16.msrb.mxu3 %v7327_v18 }
  0x4a   : > { %1440 = vst [vmem:[#allocation2 + $0x36c] sm:$0xf] %v1346_v40  ;;  %v6357_v61 = vld [vmem:[#allocation2 + $0x324] sm:$0xf]  ;;  %v7381_v62 = vld [vmem:[#allocation2 + $0x344] sm:$0xf0]  ;;  %v6250_v34 = vor.u32 %v7354_v60, %v6249_v59 }
  0x4b   : > { %1441 = vst [vmem:[#allocation2 + $0x390] sm:$0xf] %v1349_v55  ;;  %v1574_v0 = vrot.slane %v1572_v53, 5  ;;  %v1577_v2 = vrot.slane %v1575_v54, 6  ;;  %v7353_v4 = vld [vmem:[#allocation2 + $0xa0] sm:$0xf]  ;;  %v1568_v1 = vor.u32 %v1567_v63, %v1564_v57  ;;  %v6358_v35 = vor.u32 %v7381_v62, %v6357_v61 }
  0x4c   : > { %v1477_v7 = vld [vmem:[%s7763_s30 + $0x6c] sm:$0xf]  ;;  %v1478_v8 = vld [vmem:[%s7763_s30 + $0x70] sm:$0xf]  ;;  %v6251_v10 = vld [vmem:[#allocation2 + $0xc0] sm:$0xf0] }
  0x4d   : > { %v8034_v14 = vor.u32 %v1577_v2, %v1574_v0  ;;  %v1742_v15 = vshrl.u32 %v1477_v7, 16  ;;  %v7335_v9 = vld [vmem:[%s10308_s4 + $0x60] sm:$0xff]  ;;  %v7380_v19 = vld [vmem:[#allocation2 + $0x328] sm:$0xf]  ;;  %v1740_v20 = vrot.slane %v8000_v12, 4  ;;  %v1745_v21 = vshll.u32 %v1477_v7, 16 }
  0x4e   : > { %v1752_v23 = vshrl.u32 %v1478_v8, 16  ;;  %v1755_v26 = vshll.u32 %v1478_v8, 16  ;;  %v1569_v27 = vsel %vm7818_vm5, %v1560_v56, %v1568_v1  ;;  %v1570_v28 = vrot.slane %v1568_v1, 4  ;;  %3573 = vmatpush.bf16.msrb.mxu0 %v7335_v9  ;;  %v1206_v30 = vld [vmem:[%s7763_s30 + $0x2c] sm:$0xf]  ;;  %v7420_v1 = vld [vmem:[%s10308_s4 + $0x158] sm:$0xff] }
  0x4f   : > { %v1744_v29 = vrot.slane %v1742_v15, 5  ;;  %v1296_v31 = vrot.slane %v1294_v39, 4  ;;  %v6359_v5 = vld [vmem:[#allocation2 + $0x348] sm:$0xf0]  ;;  %1902 = vst [vmem:[#allocation2 + $0xe8] sm:$0xf] %v1569_v27  ;;  %v6254_v37 = vor.u32 %v7353_v4, %v6251_v10  ;;  %2944 = vmatpush.bf16.msrb.mxu2 %v7420_v1 }
  0x50   : > { %v1747_v24 = vrot.slane %v1745_v21, 6  ;;  %v1754_v36 = vrot.slane %v1752_v23, 5  ;;  %v1579_v25 = vsel %vm7818_vm5, %v1570_v28, %v8034_v14  ;;  %v1757_v38 = vrot.slane %v1755_v26, 6  ;;  %v1207_v16 = vld [vmem:[%s7763_s30 + $0x30] sm:$0xf]  ;;  %v7343_v10 = vld [vmem:[%s10308_s4 + $0xa0] sm:$0xff] }
  0x51   : > { %v1297_v12 = vrot.slane %v1206_v30, 5  ;;  %1903 = vst [vmem:[#allocation2 + $0x10c] sm:$0xf] %v1579_v25  ;;  %v1300_v32 = vrot.slane %v1207_v16, 5  ;;  %v1350_v39 = vrot.slane %v1348_v45, 4  ;;  %v6362_v41 = vor.u32 %v7380_v19, %v6359_v5  ;;  %v7326_v15 = vld [vmem:[%s10308_s4 + $0x18] sm:$0xff]  ;;  %3672 = vmatpush.bf16.msrb.mxu1 %v7343_v10 }
  0x52   : > { %v1748_v22 = vor.u32 %v1747_v24, %v1744_v29  ;;  %v8054_v42 = vor.u32 %v1757_v38, %v1754_v36  ;;  %v1224_v47 = vld [vmem:[%s7763_s30 + $0x74] sm:$0xf]  ;;  %v8060_v48 = vld [vmem:[%s7763_s30 + $0x78] sm:$0xf]  ;;  %v1461_v51 = vld [vmem:[%s7763_s30 + $0x2c] sm:$0xf]  ;;  %3475 = vmatpush.bf16.msrb.mxu3 %v7326_v15 }
  0x53   : > { %v1298_v43 = vsel %vm7765_vm2, %v1296_v31, %v1297_v12  ;;  %v1299_v44 = vrot.slane %v1297_v12, 4  ;;  %2760 = vmatmul.bf16.gmra.mxu0 %v6250_v34  ;;  %v1351_v33 = vrot.slane %v1224_v47, 5  ;;  %v1354_v45 = vrot.slane %v8060_v48, 5  ;;  %v1462_v52 = vld [vmem:[%s7763_s30 + $0x30] sm:$0xf] }
  0x54   : > { %2805 = vmatmul.bf16.gmra.mxu2 %v6358_v35  ;;  %v1749_v40 = vsel %vm7818_vm5, %v1740_v20, %v1748_v22  ;;  %v1750_v46 = vrot.slane %v1748_v22, 4  ;;  %1424 = vst [vmem:[#allocation2 + $0x12c] sm:$0xf] %v1298_v43  ;;  %2859 = vmatmul.bf16.gmra.mxu1 %v6254_v37  ;;  %v1582_v56 = vshrl.u32 %v1461_v51, 16  ;;  %v1585_v57 = vshll.u32 %v1461_v51, 16 }
  0x55   : > { %1920 = vst [vmem:[#allocation2 + $0x370] sm:$0xf] %v1749_v40  ;;  %v1301_v49 = vsel %vm7765_vm2, %v1299_v44, %v1300_v32  ;;  %v1352_v54 = vsel %vm7765_vm2, %v1350_v39, %v1351_v33  ;;  %v1353_v55 = vrot.slane %v1351_v33, 4  ;;  %v1479_v58 = vld [vmem:[%s7763_s30 + $0x74] sm:$0xf]  ;;  %v1592_v60 = vshrl.u32 %v1462_v52, 16 }
  0x56   : > { %v1759_v53 = vsel %vm7818_vm5, %v1750_v46, %v8054_v42  ;;  %1425 = vst [vmem:[#allocation2 + $0x150] sm:$0xf] %v1301_v49  ;;  %v1595_v61 = vshll.u32 %v1462_v52, 16  ;;  %v1480_v62 = vld [vmem:[%s7763_s30 + $0x78] sm:$0xf]  ;;  %v1580_v63 = vrot.slane %v8034_v14, 4 }
  0x57   : > { %1921 = vst [vmem:[#allocation2 + $0x394] sm:$0xf] %v1759_v53  ;;  %v1355_v59 = vsel %vm7765_vm2, %v1353_v55, %v1354_v45  ;;  %v1584_v0 = vrot.slane %v1582_v56, 5  ;;  %v1587_v2 = vrot.slane %v1585_v57, 6  ;;  %v6261_v3 = vld [vmem:[#allocation2 + $0xe4] sm:$0xf] }
  0x58   : > { %2904 = vmatmul.bf16.gmra.mxu3 %v6362_v41  ;;  %1442 = vst [vmem:[#allocation2 + $0x3b4] sm:$0xf] %v1352_v54  ;;  %v7357_v4 = vld [vmem:[#allocation2 + $0x104] sm:$0xf0]  ;;  %v1594_v7 = vrot.slane %v1592_v60, 5  ;;  %v1597_v8 = vrot.slane %v1595_v61, 6 }
  0x59   : > { %1443 = vst [vmem:[#allocation2 + $0x3d8] sm:$0xf] %v1355_v59  ;;  %v6369_v14 = vld [vmem:[#allocation2 + $0x36c] sm:$0xf]  ;;  %v7384_v18 = vld [vmem:[#allocation2 + $0x38c] sm:$0xf0]  ;;  %v1588_v9 = vor.u32 %v1587_v2, %v1584_v0  ;;  %v6262_v25 = vor.u32 %v7357_v4, %v6261_v3 }
  0x5a   : > { %v1762_v19 = vshrl.u32 %v1479_v58, 16  ;;  %v1765_v20 = vshll.u32 %v1479_v58, 16  ;;  %v1772_v21 = vshrl.u32 %v1480_v62, 16  ;;  %v8090_v23 = vor.u32 %v1597_v8, %v1594_v7  ;;  %v1208_v28 = vld [vmem:[%s7763_s30 + $0x34] sm:$0xf] }
  0x5b   : > { %v1760_v26 = vrot.slane %v8054_v42, 4  ;;  %v1775_v27 = vshll.u32 %v1480_v62, 16  ;;  %v1302_v29 = vrot.slane %v1300_v32, 4  ;;  %v7356_v30 = vld [vmem:[#allocation2 + $0xe8] sm:$0xf]  ;;  %v1589_v31 = vsel %vm7818_vm5, %v1580_v63, %v1588_v9 }
  0x5c   : > { %v1590_v34 = vrot.slane %v1588_v9, 4  ;;  %v1764_v35 = vrot.slane %v1762_v19, 5  ;;  %v1767_v5 = vrot.slane %v1765_v20, 6  ;;  %v6263_v24 = vld [vmem:[#allocation2 + $0x108] sm:$0xf0]  ;;  %v1774_v36 = vrot.slane %v1772_v21, 5 }
  0x5d   : > { %1904 = vst [vmem:[#allocation2 + $0x130] sm:$0xf] %v1589_v31  ;;  %v1777_v37 = vrot.slane %v1775_v27, 6  ;;  %v7383_v38 = vld [vmem:[#allocation2 + $0x370] sm:$0xf]  ;;  %v1303_v32 = vrot.slane %v1208_v28, 5  ;;  %v6370_v39 = vor.u32 %v7384_v18, %v6369_v14  ;;  %v6266_v47 = vor.u32 %v7356_v30, %v6263_v24 }
  0x5e   : > { %v1599_v16 = vsel %vm7818_vm5, %v1590_v34, %v8090_v23  ;;  %v1768_v12 = vor.u32 %v1767_v5, %v1764_v35  ;;  %v8100_v22 = vld [vmem:[%s7763_s30 + $0x38] sm:$0xf]  ;;  %v6371_v41 = vld [vmem:[#allocation2 + $0x390] sm:$0xf0]  ;;  %v1356_v44 = vrot.slane %v1354_v45, 4  ;;  %v1600_v7 = vrot.slane %v8090_v23, 4 }
  0x5f   : > { %1905 = vst [vmem:[#allocation2 + $0x154] sm:$0xf] %v1599_v16  ;;  %v8102_v42 = vor.u32 %v1777_v37, %v1774_v36  ;;  %v1306_v43 = vrot.slane %v8100_v22, 5  ;;  %v1304_v33 = vsel %vm7765_vm2, %v1302_v29, %v1303_v32  ;;  %v1226_v49 = vld [vmem:[%s7763_s30 + $0x7c] sm:$0xf]  ;;  %v1305_v52 = vrot.slane %v1303_v32, 4 }
  0x60   : > { %v1769_v40 = vsel %vm7818_vm5, %v1760_v26, %v1768_v12  ;;  %v1770_v46 = vrot.slane %v1768_v12, 4  ;;  %v8113_v51 = vld [vmem:[%s7763_s30 + $0x80] sm:$0xf]  ;;  %v1357_v53 = vrot.slane %v1226_v49, 5  ;;  %v6374_v55 = vor.u32 %v7383_v38, %v6371_v41  ;;  %1426 = vst [vmem:[#allocation2 + $0x174] sm:$0xf] %v1304_v33 }
  0x61   : > { %1922 = vst [vmem:[#allocation2 + $0x3b8] sm:$0xf] %v1769_v40  ;;  %v1360_v54 = vrot.slane %v8113_v51, 5  ;;  %v1463_v45 = vld [vmem:[%s7763_s30 + $0x34] sm:$0xf]  ;;  %v1307_v57 = vsel %vm7765_vm2, %v1305_v52, %v1306_v43  ;;  %v7334_v14 = vld [vmem:[%s10308_s4 + $0x58] sm:$0xff] }
  0x62   : > { %v1779_v48 = vsel %vm7818_vm5, %v1770_v46, %v8102_v42  ;;  %v1464_v56 = vld [vmem:[%s7763_s30 + $0x38] sm:$0xf]  ;;  %v1358_v58 = vsel %vm7765_vm2, %v1356_v44, %v1357_v53  ;;  %v1359_v59 = vrot.slane %v1357_v53, 4  ;;  %v1602_v60 = vshrl.u32 %v1463_v45, 16  ;;  %1427 = vst [vmem:[#allocation2 + $0x198] sm:$0xf] %v1307_v57  ;;  %3574 = vmatpush.bf16.msrb.mxu0 %v7334_v14 }
  0x63   : > { %2765 = vmatmul.bf16.gmra.mxu0 %v6262_v25  ;;  %1923 = vst [vmem:[#allocation2 + $0x3dc] sm:$0xf] %v1779_v48  ;;  %v1605_v61 = vshll.u32 %v1463_v45, 16  ;;  %v1612_v62 = vshrl.u32 %v1464_v56, 16  ;;  %v1481_v63 = vld [vmem:[%s7763_s30 + $0x7c] sm:$0xf] }
  0x64   : > { %2810 = vmatmul.bf16.gmra.mxu2 %v6370_v39  ;;  %2864 = vmatmul.bf16.gmra.mxu1 %v6266_v47  ;;  %v1361_v0 = vsel %vm7765_vm2, %v1359_v59, %v1360_v54  ;;  %1444 = vst [vmem:[#allocation2 + $0x3fc] sm:$0xf] %v1358_v58  ;;  %v1604_v2 = vrot.slane %v1602_v60, 5  ;;  %v1615_v3 = vshll.u32 %v1464_v56, 16  ;;  %v1482_v4 = vld [vmem:[%s7763_s30 + $0x80] sm:$0xf] }
  0x65   : > { %1445 = vst [vmem:[#allocation2 + $0x420] sm:$0xf] %v1361_v0  ;;  %v1607_v8 = vrot.slane %v1605_v61, 6  ;;  %v1614_v10 = vrot.slane %v1612_v62, 5  ;;  %v1782_v15 = vshrl.u32 %v1481_v63, 16  ;;  %v7342_v18 = vld [vmem:[%s10308_s4 + $0x98] sm:$0xff] }
  0x66   : > { %v1617_v1 = vrot.slane %v1615_v3, 6  ;;  %v7419_v9 = vld [vmem:[%s10308_s4 + $0x150] sm:$0xff]  ;;  %v1785_v20 = vshll.u32 %v1481_v63, 16  ;;  %v1792_v21 = vshrl.u32 %v1482_v4, 16  ;;  %v1795_v23 = vshll.u32 %v1482_v4, 16  ;;  %3673 = vmatpush.bf16.msrb.mxu1 %v7342_v18 }
  0x67   : > { %v1608_v19 = vor.u32 %v1607_v8, %v1604_v2  ;;  %v7325_v26 = vld [vmem:[%s10308_s4 + $0x10] sm:$0xff]  ;;  %v6273_v27 = vld [vmem:[#allocation2 + $0x12c] sm:$0xf]  ;;  %v1780_v30 = vrot.slane %v8102_v42, 4  ;;  %v1784_v31 = vrot.slane %v1782_v15, 5  ;;  %v1308_v35 = vrot.slane %v1306_v43, 4  ;;  %2945 = vmatpush.bf16.msrb.mxu2 %v7419_v9 }
  0x68   : > { %2909 = vmatmul.bf16.gmra.mxu3 %v6374_v55  ;;  %v7360_v28 = vld [vmem:[#allocation2 + $0x14c] sm:$0xf0]  ;;  %v8144_v29 = vor.u32 %v1617_v1, %v1614_v10  ;;  %v1210_v34 = vld [vmem:[%s7763_s30 + $0x3c] sm:$0xf]  ;;  %v6381_v5 = vld [vmem:[#allocation2 + $0x3b4] sm:$0xf] }
  0x69   : > { %v1609_v24 = vsel %vm7818_vm5, %v1600_v7, %v1608_v19  ;;  %v1610_v36 = vrot.slane %v1608_v19, 4  ;;  %v1787_v37 = vrot.slane %v1785_v20, 6  ;;  %v1794_v25 = vrot.slane %v1792_v21, 5  ;;  %3476 = vmatpush.bf16.msrb.mxu3 %v7325_v26  ;;  %v7387_v38 = vld [vmem:[#allocation2 + $0x3d4] sm:$0xf0] }
  0x6a   : > { %1906 = vst [vmem:[#allocation2 + $0x178] sm:$0xf] %v1609_v24  ;;  %v1797_v16 = vrot.slane %v1795_v23, 6  ;;  %v1309_v12 = vrot.slane %v1210_v34, 5  ;;  %v7359_v22 = vld [vmem:[#allocation2 + $0x130] sm:$0xf]  ;;  %v6274_v33 = vor.u32 %v7360_v28, %v6273_v27  ;;  %v6382_v56 = vor.u32 %v7387_v38, %v6381_v5 }
  0x6b   : > { %v1619_v32 = vsel %vm7818_vm5, %v1610_v36, %v8144_v29  ;;  %v1788_v39 = vor.u32 %v1787_v37, %v1784_v31  ;;  %v8154_v41 = vld [vmem:[%s7763_s30 + $0x40] sm:$0xf]  ;;  %v1228_v42 = vld [vmem:[%s7763_s30 + $0x84] sm:$0xf]  ;;  %v6275_v43 = vld [vmem:[#allocation2 + $0x150] sm:$0xf0] }
  0x6c   : > { %1907 = vst [vmem:[#allocation2 + $0x19c] sm:$0xf] %v1619_v32  ;;  %v8157_v44 = vor.u32 %v1797_v16, %v1794_v25  ;;  %v1310_v47 = vsel %vm7765_vm2, %v1308_v35, %v1309_v12  ;;  %v1311_v40 = vrot.slane %v1309_v12, 4  ;;  %v1312_v46 = vrot.slane %v8154_v41, 5  ;;  %v7386_v49 = vld [vmem:[#allocation2 + $0x3b8] sm:$0xf] }
  0x6d   : > { %v6383_v52 = vld [vmem:[#allocation2 + $0x3d8] sm:$0xf0]  ;;  %v1789_v53 = vsel %vm7818_vm5, %v1780_v30, %v1788_v39  ;;  %v1790_v55 = vrot.slane %v1788_v39, 4  ;;  %1428 = vst [vmem:[#allocation2 + $0x1bc] sm:$0xf] %v1310_v47  ;;  %v1362_v45 = vrot.slane %v1360_v54, 4  ;;  %v6278_v61 = vor.u32 %v7359_v22, %v6275_v43 }
  0x6e   : > { %v8165_v48 = vld [vmem:[%s7763_s30 + $0x88] sm:$0xf]  ;;  %1924 = vst [vmem:[#allocation2 + $0x400] sm:$0xf] %v1789_v53  ;;  %v1313_v57 = vsel %vm7765_vm2, %v1311_v40, %v1312_v46  ;;  %v1363_v58 = vrot.slane %v1228_v42, 5  ;;  %v1620_v4 = vrot.slane %v8144_v29, 4  ;;  %v6386_v10 = vor.u32 %v7386_v49, %v6383_v52 }
  0x6f   : > { %v1366_v59 = vrot.slane %v8165_v48, 5  ;;  %v1465_v60 = vld [vmem:[%s7763_s30 + $0x3c] sm:$0xf]  ;;  %v1799_v62 = vsel %vm7818_vm5, %v1790_v55, %v8157_v44  ;;  %1429 = vst [vmem:[#allocation2 + $0x1e0] sm:$0xf] %v1313_v57  ;;  %v1800_v27 = vrot.slane %v8157_v44, 4 }
  0x70   : > { %v1466_v63 = vld [vmem:[%s7763_s30 + $0x40] sm:$0xf]  ;;  %v1622_v51 = vshrl.u32 %v1465_v60, 16  ;;  %1925 = vst [vmem:[#allocation2 + $0x424] sm:$0xf] %v1799_v62  ;;  %v1364_v54 = vsel %vm7765_vm2, %v1362_v45, %v1363_v58  ;;  %v1365_v0 = vrot.slane %v1363_v58, 4 }
  0x71   : > { %v1625_v2 = vshll.u32 %v1465_v60, 16  ;;  %v1632_v3 = vshrl.u32 %v1466_v63, 16  ;;  %1446 = vst [vmem:[#allocation2 + $0x444] sm:$0xf] %v1364_v54  ;;  %v1635_v8 = vshll.u32 %v1466_v63, 16  ;;  %v7333_v38 = vld [vmem:[%s10308_s4 + $0x50] sm:$0xff] }
  0x72   : > { %v1624_v7 = vrot.slane %v1622_v51, 5  ;;  %v1367_v1 = vsel %vm7765_vm2, %v1365_v0, %v1366_v59  ;;  %v1483_v18 = vld [vmem:[%s7763_s30 + $0x84] sm:$0xf]  ;;  %v1484_v9 = vld [vmem:[%s7763_s30 + $0x88] sm:$0xf]  ;;  %3575 = vmatpush.bf16.msrb.mxu0 %v7333_v38  ;;  %v7341_v42 = vld [vmem:[%s10308_s4 + $0x90] sm:$0xff] }
  0x73   : > { %2770 = vmatmul.bf16.gmra.mxu0 %v6274_v33  ;;  %v1627_v15 = vrot.slane %v1625_v2, 6  ;;  %v1634_v14 = vrot.slane %v1632_v3, 5  ;;  %1447 = vst [vmem:[#allocation2 + $0x468] sm:$0xf] %v1367_v1  ;;  %v1637_v19 = vrot.slane %v1635_v8, 6  ;;  %v1802_v21 = vshrl.u32 %v1483_v18, 16  ;;  %3674 = vmatpush.bf16.msrb.mxu1 %v7341_v42 }
  0x74   : > { %2815 = vmatmul.bf16.gmra.mxu2 %v6382_v56  ;;  %2869 = vmatmul.bf16.gmra.mxu1 %v6278_v61  ;;  %v1805_v23 = vshll.u32 %v1483_v18, 16  ;;  %v1812_v28 = vshrl.u32 %v1484_v9, 16  ;;  %v1815_v29 = vshll.u32 %v1484_v9, 16  ;;  %v8191_v30 = vld [vmem:[#allocation2 + $0x174] sm:$0xf]  ;;  %v7418_v43 = vld [vmem:[%s10308_s4 + $0x148] sm:$0xff] }
  0x75   : > { %v1628_v20 = vor.u32 %v1627_v15, %v1624_v7  ;;  %v8188_v26 = vor.u32 %v1637_v19, %v1634_v14  ;;  %v8193_v31 = vld [vmem:[#allocation2 + $0x194] sm:$0xf0]  ;;  %v8195_v34 = vld [vmem:[#allocation2 + $0x3fc] sm:$0xf]  ;;  %v8197_v35 = vld [vmem:[#allocation2 + $0x41c] sm:$0xf0]  ;;  %2946 = vmatpush.bf16.msrb.mxu2 %v7418_v43 }
  0x76   : > { %v8199_v5 = vld [vmem:[#allocation2 + $0x178] sm:$0xf]  ;;  %v1804_v37 = vrot.slane %v1802_v21, 5  ;;  %v1807_v25 = vrot.slane %v1805_v23, 6  ;;  %v8206_v16 = vld [vmem:[#allocation2 + $0x198] sm:$0xf0]  ;;  %v6286_v56 = vor.u32 %v8193_v31, %v8191_v30  ;;  %v6394_v57 = vor.u32 %v8197_v35, %v8195_v34 }
  0x77   : > { %v1629_v24 = vsel %vm7818_vm5, %v1620_v4, %v1628_v20  ;;  %v1630_v36 = vrot.slane %v1628_v20, 4  ;;  %v1814_v12 = vrot.slane %v1812_v28, 5  ;;  %v1817_v22 = vrot.slane %v1815_v29, 6  ;;  %v1467_v47 = vld [vmem:[%s7763_s30 + $0x44] sm:$0xf]  ;;  %v7324_v49 = vld [vmem:[%s10308_s4 + $0x8] sm:$0xff] }
  0x78   : > { %2914 = vmatmul.bf16.gmra.mxu3 %v6386_v10  ;;  %1908 = vst [vmem:[#allocation2 + $0x1c0] sm:$0xf] %v1629_v24  ;;  %v1808_v39 = vor.u32 %v1807_v25, %v1804_v37  ;;  %v1314_v44 = vrot.slane %v1312_v46, 4  ;;  %v1468_v40 = vld [vmem:[%s7763_s30 + $0x48] sm:$0xf]  ;;  %v1368_v45 = vrot.slane %v1366_v59, 4  ;;  %v6290_v58 = vor.u32 %v8199_v5, %v8206_v16 }
  0x79   : > { %v1639_v32 = vsel %vm7818_vm5, %v1630_v36, %v8188_v26  ;;  %v8221_v33 = vor.u32 %v1817_v22, %v1814_v12  ;;  %v1212_v52 = vld [vmem:[%s7763_s30 + $0x44] sm:$0xf]  ;;  %v8230_v41 = vld [vmem:[%s7763_s30 + $0x48] sm:$0xf]  ;;  %3477 = vmatpush.bf16.msrb.mxu3 %v7324_v49  ;;  %v1230_v61 = vld [vmem:[%s7763_s30 + $0x8c] sm:$0xf] }
  0x7a   : > { %1909 = vst [vmem:[#allocation2 + $0x1e4] sm:$0xf] %v1639_v32  ;;  %v1809_v53 = vsel %vm7818_vm5, %v1800_v27, %v1808_v39  ;;  %v1810_v55 = vrot.slane %v1808_v39, 4  ;;  %v1315_v46 = vrot.slane %v1212_v52, 5  ;;  %v1318_v60 = vrot.slane %v8230_v41, 5 }
  0x7b   : > { %1926 = vst [vmem:[#allocation2 + $0x448] sm:$0xf] %v1809_v53  ;;  %v7389_v62 = vld [vmem:[#allocation2 + $0x400] sm:$0xf]  ;;  %v8248_v51 = vld [vmem:[%s7763_s30 + $0x90] sm:$0xf] }
  0x7c   : > { %v1819_v48 = vsel %vm7818_vm5, %v1810_v55, %v8221_v33  ;;  %v1316_v59 = vsel %vm7765_vm2, %v1314_v44, %v1315_v46  ;;  %v1317_v63 = vrot.slane %v1315_v46, 4  ;;  %v1369_v54 = vrot.slane %v1230_v61, 5  ;;  %v1485_v0 = vld [vmem:[%s7763_s30 + $0x8c] sm:$0xf]  ;;  %v6395_v8 = vld [vmem:[#allocation2 + $0x420] sm:$0xf0] }
  0x7d   : > { %1927 = vst [vmem:[#allocation2 + $0x46c] sm:$0xf] %v1819_v48  ;;  %v1372_v2 = vrot.slane %v8248_v51, 5  ;;  %v1642_v3 = vshrl.u32 %v1467_v47, 16  ;;  %v1645_v4 = vshll.u32 %v1467_v47, 16  ;;  %v1652_v7 = vshrl.u32 %v1468_v40, 16 }
  0x7e   : > { %v1319_v10 = vsel %vm7765_vm2, %v1317_v63, %v1318_v60  ;;  %1430 = vst [vmem:[#allocation2 + $0x204] sm:$0xf] %v1316_v59  ;;  %v1370_v1 = vsel %vm7765_vm2, %v1368_v45, %v1369_v54  ;;  %v1371_v15 = vrot.slane %v1369_v54, 4  ;;  %v1655_v14 = vshll.u32 %v1468_v40, 16  ;;  %v1486_v30 = vld [vmem:[%s7763_s30 + $0x90] sm:$0xf] }
  0x7f   : > { %1431 = vst [vmem:[#allocation2 + $0x228] sm:$0xf] %v1319_v10  ;;  %v1640_v18 = vrot.slane %v8188_v26, 4  ;;  %v1644_v9 = vrot.slane %v1642_v3, 5  ;;  %v1647_v19 = vrot.slane %v1645_v4, 6  ;;  %v1654_v20 = vrot.slane %v1652_v7, 5 }
  0x80   : > { %v1373_v21 = vsel %vm7765_vm2, %v1371_v15, %v1372_v2  ;;  %1448 = vst [vmem:[#allocation2 + $0x48c] sm:$0xf] %v1370_v1  ;;  %v1657_v23 = vrot.slane %v1655_v14, 6  ;;  %v1822_v27 = vshrl.u32 %v1485_v0, 16  ;;  %v6398_v28 = vor.u32 %v7389_v62, %v6395_v8  ;;  %v1469_v38 = vld [vmem:[%s7763_s30 + $0x4c] sm:$0xf] }
  0x81   : > { %1449 = vst [vmem:[#allocation2 + $0x4b0] sm:$0xf] %v1373_v21  ;;  %v1648_v29 = vor.u32 %v1647_v19, %v1644_v9  ;;  %v1825_v31 = vshll.u32 %v1485_v0, 16  ;;  %v1832_v35 = vshrl.u32 %v1486_v30, 16  ;;  %v1835_v5 = vshll.u32 %v1486_v30, 16  ;;  %v7332_v47 = vld [vmem:[%s10308_s4 + $0x48] sm:$0xff] }
  0x82   : > { %v8264_v26 = vor.u32 %v1657_v23, %v1654_v20  ;;  %v1824_v34 = vrot.slane %v1822_v27, 5  ;;  %v1820_v37 = vrot.slane %v8221_v33, 4  ;;  %v8270_v22 = vld [vmem:[#allocation2 + $0x1bc] sm:$0xf]  ;;  %v1662_v42 = vshrl.u32 %v1469_v38, 16  ;;  %v7340_v40 = vld [vmem:[%s10308_s4 + $0x88] sm:$0xff]  ;;  %3576 = vmatpush.bf16.msrb.mxu0 %v7332_v47 }
  0x83   : > { %2775 = vmatmul.bf16.gmra.mxu0 %v6286_v56  ;;  %v1649_v24 = vsel %vm7818_vm5, %v1640_v18, %v1648_v29  ;;  %v1650_v36 = vrot.slane %v1648_v29, 4  ;;  %v1827_v25 = vrot.slane %v1825_v31, 6  ;;  %v1834_v16 = vrot.slane %v1832_v35, 5  ;;  %v8275_v43 = vld [vmem:[#allocation2 + $0x1dc] sm:$0xf0]  ;;  %3675 = vmatpush.bf16.msrb.mxu1 %v7340_v40 }
  0x84   : > { %2820 = vmatmul.bf16.gmra.mxu2 %v6394_v57  ;;  %2874 = vmatmul.bf16.gmra.mxu1 %v6290_v58  ;;  %1910 = vst [vmem:[#allocation2 + $0x208] sm:$0xf] %v1649_v24  ;;  %v1837_v12 = vrot.slane %v1835_v5, 6  ;;  %v1214_v52 = vld [vmem:[%s7763_s30 + $0x4c] sm:$0xf]  ;;  %v1664_v56 = vrot.slane %v1662_v42, 5  ;;  %v6298_v54 = vor.u32 %v8275_v43, %v8270_v22 }
  0x85   : > { %v1659_v32 = vsel %vm7818_vm5, %v1650_v36, %v8264_v26  ;;  %v1828_v39 = vor.u32 %v1827_v25, %v1824_v34  ;;  %v1487_v53 = vld [vmem:[%s7763_s30 + $0x94] sm:$0xf]  ;;  %v6405_v55 = vld [vmem:[#allocation2 + $0x444] sm:$0xf]  ;;  %v7393_v46 = vld [vmem:[#allocation2 + $0x464] sm:$0xf0] }
  0x86   : > { %1911 = vst [vmem:[#allocation2 + $0x22c] sm:$0xf] %v1659_v32  ;;  %v8277_v44 = vor.u32 %v1837_v12, %v1834_v16  ;;  %v1321_v45 = vrot.slane %v1214_v52, 5  ;;  %v1665_v57 = vshll.u32 %v1469_v38, 16  ;;  %v1488_v58 = vld [vmem:[%s7763_s30 + $0x98] sm:$0x3]  ;;  %v6406_v18 = vor.u32 %v7393_v46, %v6405_v55 }
  0x87   : > { %v1829_v33 = vsel %vm7818_vm5, %v1820_v37, %v1828_v39  ;;  %v1830_v49 = vrot.slane %v1828_v39, 4  ;;  %v1320_v62 = vrot.slane %v1318_v60, 4  ;;  %v1232_v48 = vld [vmem:[%s7763_s30 + $0x94] sm:$0xf]  ;;  %v1233_v59 = vld [vmem:[%s7763_s30 + $0x98] sm:$0x1] }
  0x88   : > { %2919 = vmatmul.bf16.gmra.mxu3 %v6398_v28  ;;  %1928 = vst [vmem:[#allocation2 + $0x490] sm:$0xf] %v1829_v33  ;;  %v1374_v63 = vrot.slane %v1372_v2, 4  ;;  %v1323_v0 = vrot.slane %v1321_v45, 4  ;;  %v1375_v3 = vrot.slane %v1232_v48, 5  ;;  %v1378_v4 = vrot.slane %v1233_v59, 5 }
  0x89   : > { %v1839_v61 = vsel %vm7818_vm5, %v1830_v49, %v8277_v44  ;;  %v7365_v7 = vld [vmem:[#allocation2 + $0x1c0] sm:$0xf]  ;;  %v1322_v8 = vsel %vm7765_vm2, %v1320_v62, %v1321_v45  ;;  %v1660_v10 = vrot.slane %v8264_v26, 4  ;;  %v1667_v41 = vrot.slane %v1665_v57, 6  ;;  %v6299_v1 = vld [vmem:[#allocation2 + $0x1e0] sm:$0xf0] }
  0x8a   : > { %1929 = vst [vmem:[#allocation2 + $0x4b4] sm:$0xf] %v1839_v61  ;;  %v1842_v60 = vshrl.u32 %v1487_v53, 16  ;;  %v1325_v51 = vsel %vm7765_vm2, %v1323_v0, %v1324_v17  ;;  %v1376_v2 = vsel %vm7765_vm2, %v1374_v63, %v1375_v3  ;;  %v1377_v15 = vrot.slane %v1375_v3, 4  ;;  %v7392_v9 = vld [vmem:[#allocation2 + $0x448] sm:$0xf] }
  0x8b   : > { %1432 = vst [vmem:[#allocation2 + $0x24c] sm:$0xf] %v1322_v8  ;;  %v1845_v14 = vshll.u32 %v1487_v53, 16  ;;  %v1668_v19 = vor.u32 %v1667_v41, %v1664_v56  ;;  %v1852_v21 = vshrl.u32 %v1488_v58, 16  ;;  %v1840_v13 = vrot.slane %v8277_v44, 4  ;;  %v7417_v5 = vld [vmem:[%s10308_s4 + $0x140] sm:$0xff] }
  0x8c   : > { %1433 = vst [vmem:[#allocation2 + $0x270] sm:$0xf] %v1325_v51  ;;  %v1844_v20 = vrot.slane %v1842_v60, 5  ;;  %v1379_v23 = vsel %vm7765_vm2, %v1377_v15, %v1378_v4  ;;  %v1855_v17 = vshll.u32 %v1488_v58, 16  ;;  %v6302_v28 = vor.u32 %v7365_v7, %v6299_v1  ;;  %v6407_v29 = vld [vmem:[#allocation2 + $0x468] sm:$0xf0]  ;;  %2947 = vmatpush.bf16.msrb.mxu2 %v7417_v5 }
  0x8d   : > { %1450 = vst [vmem:[#allocation2 + $0x4d4] sm:$0xf] %v1376_v2  ;;  %v1847_v27 = vrot.slane %v1845_v14, 6  ;;  %v1669_v30 = vsel %vm7818_vm5, %v1660_v10, %v1668_v19  ;;  %v1670_v31 = vrot.slane %v1668_v19, 4  ;;  %v1854_v26 = vrot.slane %v1852_v21, 5  ;;  %v7323_v24 = vld [vmem:[%s10308_s4] sm:$0xff] }
  0x8e   : > { %1451 = vst [vmem:[#allocation2 + $0x4f8] sm:$0xf] %v1379_v23  ;;  %v1857_v35 = vrot.slane %v1855_v17, 6  ;;  %v6410_v37 = vor.u32 %v7392_v9, %v6407_v29  ;;  %v343_v16 = vld [vmem:[%s7763_s30] sm:$0xf]  ;;  %3478 = vmatpush.bf16.msrb.mxu3 %v7323_v24 }
  0x8f   : > { %1912 = vst [vmem:[#allocation2 + $0x250] sm:$0xf] %v1669_v30  ;;  %v1848_v34 = vor.u32 %v1847_v27, %v1844_v20  ;;  %v1679_v36 = vsel %vm7818_vm5, %v1670_v31, %v7844_v11  ;;  %v344_v22 = vld [vmem:[%s7763_s30 + $0x4] sm:$0xf]  ;;  %v384_v32 = vshrl.u32 %v343_v16, 16  ;;  %v387_v11 = vshll.u32 %v343_v16, 16 }
  0x90   : > { %1913 = vst [vmem:[#allocation2 + $0x274] sm:$0xf] %v1679_v36  ;;  %v1858_v12 = vor.u32 %v1857_v35, %v1854_v26  ;;  %v1933_v42 = vld [vmem:[%s7763_s30 + $0xc] sm:$0xf]  ;;  %v393_v43 = vshll.u32 %v344_v22, 16  ;;  %v397_v55 = vshrl.u32 %v344_v22, 16 }
  0x91   : > { %v1849_v25 = vsel %vm7818_vm5, %v1840_v13, %v1848_v34  ;;  %v1850_v38 = vrot.slane %v1848_v34, 4  ;;  %v2011_v44 = vrot.slane %v1933_v42, 6  ;;  %v386_v47 = vrot.slane %v384_v32, 4  ;;  %v6309_v40 = vld [vmem:[#allocation2 + $0x204] sm:$0xf]  ;;  %v7486_v16 = vld [vmem:[%s10308_s4 + $0x1b8] sm:$0xff] }
  0x92   : > { %1930 = vst [vmem:[#allocation2 + $0x4d8] sm:$0xf] %v1849_v25  ;;  %v7369_v33 = vld [vmem:[#allocation2 + $0x224] sm:$0xf0]  ;;  %v8333_v52 = vld [vmem:[%s7763_s30 + $0x10] sm:$0xf]  ;;  %5313 = vmatpush.bf16.msra.mxu2 %v7486_v16 }
  0x93   : > { %2780 = vmatmul.bf16.gmra.mxu0 %v6298_v54  ;;  %v1859_v39 = vsel %vm7818_vm5, %v1850_v38, %v1858_v12  ;;  %v1932_v49 = vld [vmem:[%s7763_s30 + $0x8] sm:$0xc]  ;;  %v389_v53 = vrot.slane %v387_v11, 5  ;;  %v6417_v46 = vld [vmem:[#allocation2 + $0x48c] sm:$0xf]  ;;  %v2013_v56 = vrot.slane %v2011_v44, 4  ;;  %v6310_v1 = vor.u32 %v7369_v33, %v6309_v40 }
  0x94   : > { %2825 = vmatmul.bf16.gmra.mxu2 %v6406_v18  ;;  %2879 = vmatmul.bf16.gmra.mxu1 %v6302_v28  ;;  %1931 = vst [vmem:[#allocation2 + $0x4fc] sm:$0xf] %v1859_v39  ;;  %v7396_v45 = vld [vmem:[#allocation2 + $0x4ac] sm:$0xf0]  ;;  %v6222_v50 = vrot.slane %v1932_v49, 10  ;;  %v7331_v62 = vld [vmem:[%s10308_s4 + $0x40] sm:$0xff] }
  0x95   : > { %v345_v57 = vld [vmem:[%s7763_s30 + $0x8] sm:$0xf]  ;;  %v6311_v61 = vld [vmem:[#allocation2 + $0x228] sm:$0xf0]  ;;  %v2014_v59 = vrot.slane %v8333_v52, 6  ;;  %v390_v63 = vor.u32 %v389_v53, %v386_v47  ;;  %v395_v54 = vrot.slane %v393_v43, 5  ;;  %3577 = vmatpush.bf16.msrb.mxu0 %v7331_v62  ;;  %v6418_v14 = vor.u32 %v7396_v45, %v6417_v46 }
  0x96   : > { %v7368_v58 = vld [vmem:[#allocation2 + $0x208] sm:$0xf]  ;;  %v2012_v0 = vsel %vm8339_vm8, %v6222_v50, %v2011_v44  ;;  %v271_v3 = vld [vmem:[%s7763_s30] sm:$0xf]  ;;  %v272_v4 = vld [vmem:[%s7763_s30 + $0x4] sm:$0xf] }
  0x97   : > { %v2015_v7 = vsel %vm8339_vm8, %v2013_v56, %v2014_v59  ;;  %2154 = vst [vmem:[#allocation2 + $0x14] sm:$0xf] %v2012_v0  ;;  %v391_v10 = vrot.slane %v390_v63, 4  ;;  %v399_v41 = vrot.slane %v397_v55, 4  ;;  %v403_v60 = vshll.u32 %v345_v57, 16  ;;  %v7339_v26 = vld [vmem:[%s10308_s4 + $0x80] sm:$0xff] }
  0x98   : > { %2924 = vmatmul.bf16.gmra.mxu3 %v6410_v37  ;;  %v7395_v51 = vld [vmem:[#allocation2 + $0x490] sm:$0xf]  ;;  %v6419_v2 = vld [vmem:[#allocation2 + $0x4b0] sm:$0xf0]  ;;  %2155 = vst [vmem:[#allocation2 + $0x38] sm:$0xf] %v2015_v7  ;;  %v6314_v21 = vor.u32 %v7368_v58, %v6311_v61  ;;  %3676 = vmatpush.bf16.msrb.mxu1 %v7339_v26 }
  0x99   : > { %v820_v15 = vld [vmem:[%s7763_s30 + $0x4] sm:$0xf]  ;;  %307 = vst [vmem:[#allocation2] sm:$0xf] %v271_v3  ;;  %v396_v18 = vsel %vm8352_vm11, %v391_v10, %v395_v54  ;;  %v400_v9 = vor.u32 %v399_v41, %v395_v54  ;;  %v405_v19 = vrot.slane %v403_v60, 5  ;;  %v6422_v31 = vor.u32 %v7395_v51, %v6419_v2  ;;  %v7494_v12 = vld [vmem:[%s10308_s4 + $0x1f8] sm:$0xff] }
  0x9a   : > { %v819_v20 = vld [vmem:[%s7763_s30] sm:$0xe]  ;;  %308 = vst [vmem:[#allocation2 + $0x24] sm:$0xf] %v272_v4  ;;  %v8361_v23 = vld [vmem:[%s7763_s30 + $0x8] sm:$0xf]  ;;  %5412 = vmatpush.bf16.msra.mxu3 %v7494_v12 }
  0x9b   : > { %v6220_v13 = vrot.slane %v819_v20, 9  ;;  %v898_v27 = vrot.slane %v820_v15, 5  ;;  %v401_v17 = vrot.slane %v400_v9, 4  ;;  %783 = vst [vmem:[#allocation2 + $0x4] sm:$0xf] %v396_v18  ;;  %v901_v28 = vrot.slane %v8361_v23, 5 }
  0x9c   : > { %v346_v35 = vld [vmem:[%s7763_s30 + $0xc] sm:$0xf]  ;;  %v407_v24 = vshrl.u32 %v345_v57, 16  ;;  %v1935_v32 = vld [vmem:[%s7763_s30 + $0x14] sm:$0xf]  ;;  %v2016_v53 = vrot.slane %v2014_v59, 4 }
  0x9d   : > { %v899_v29 = vsel %vm7765_vm2, %v6220_v13, %v898_v27  ;;  %v900_v30 = vrot.slane %v898_v27, 4  ;;  %v406_v34 = vsel %vm8352_vm11, %v401_v17, %v405_v19  ;;  %v413_v36 = vshll.u32 %v346_v35, 16  ;;  %v8384_v11 = vld [vmem:[%s7763_s30 + $0x10] sm:$0xf]  ;;  %v8387_v42 = vld [vmem:[%s7763_s30 + $0x18] sm:$0xf] }
  0x9e   : > { %1041 = vst [vmem:[#allocation2 + $0x8] sm:$0xf] %v899_v29  ;;  %v417_v37 = vshrl.u32 %v346_v35, 16  ;;  %v409_v25 = vrot.slane %v407_v24, 4  ;;  %v2017_v43 = vrot.slane %v1935_v32, 6  ;;  %v423_v47 = vshll.u32 %v8384_v11, 16 }
  0x9f   : > { %784 = vst [vmem:[#allocation2 + $0x28] sm:$0xf] %v406_v34  ;;  %v902_v5 = vsel %vm7765_vm2, %v900_v30, %v901_v28  ;;  %v415_v38 = vrot.slane %v413_v36, 5  ;;  %v6321_v40 = vld [vmem:[#allocation2 + $0x24c] sm:$0xf]  ;;  %v2020_v55 = vrot.slane %v8387_v42, 6 }
  0xa0   : > { %1042 = vst [vmem:[#allocation2 + $0x2c] sm:$0xf] %v902_v5  ;;  %v419_v22 = vrot.slane %v417_v37, 4  ;;  %v410_v39 = vor.u32 %v409_v25, %v405_v19  ;;  %v7372_v33 = vld [vmem:[#allocation2 + $0x26c] sm:$0xf0]  ;;  %v7502_v50 = vld [vmem:[%s10308_s4 + $0x238] sm:$0xff]  ;;  %v2018_v52 = vsel %vm8339_vm8, %v2016_v53, %v2017_v43 }
  0xa1   : > { %v6429_v49 = vld [vmem:[#allocation2 + $0x4d4] sm:$0xf]  ;;  %v7399_v45 = vld [vmem:[#allocation2 + $0x4f4] sm:$0xf0]  ;;  %v2019_v56 = vrot.slane %v2017_v43, 4  ;;  %v8397_v58 = vrot.slane %v423_v47, 5  ;;  %5511 = vmatpush.bf16.msra.mxu0 %v7502_v50  ;;  %v6322_v10 = vor.u32 %v7372_v33, %v6321_v40 }
  0xa2   : > { %v420_v44 = vor.u32 %v419_v22, %v415_v38  ;;  %v411_v46 = vrot.slane %v410_v39, 4  ;;  %v7371_v61 = vld [vmem:[#allocation2 + $0x250] sm:$0xf]  ;;  %v6323_v62 = vld [vmem:[#allocation2 + $0x270] sm:$0xf0]  ;;  %v6430_v41 = vor.u32 %v7399_v45, %v6429_v49  ;;  %v7528_v27 = vld [vmem:[%s8421_s16 + $0x38] sm:$0xff] }
  0xa3   : > { %2785 = vmatmul.bf16.gmra.mxu0 %v6310_v1  ;;  %v273_v59 = vld [vmem:[%s7763_s30 + $0x8] sm:$0xf]  ;;  %v2021_v63 = vsel %vm8339_vm8, %v2019_v56, %v2020_v55  ;;  %2156 = vst [vmem:[#allocation2 + $0x5c] sm:$0xf] %v2018_v52  ;;  %v274_v54 = vld [vmem:[%s7763_s30 + $0xc] sm:$0xf]  ;;  %v6326_v15 = vor.u32 %v7371_v61, %v6323_v62  ;;  %5854 = vmatpush.bf16.msra.mxu1 %v7528_v27 }
  0xa4   : > { %2830 = vmatmul.bf16.gmra.mxu2 %v6418_v14  ;;  %2884 = vmatmul.bf16.gmra.mxu1 %v6314_v21  ;;  %v421_v57 = vrot.slane %v420_v44, 4  ;;  %v822_v0 = vld [vmem:[%s7763_s30 + $0xc] sm:$0xf]  ;;  %v7398_v3 = vld [vmem:[#allocation2 + $0x4d8] sm:$0xf]  ;;  %v416_v4 = vsel %vm8352_vm11, %v411_v46, %v415_v38  ;;  %v903_v14 = vrot.slane %v901_v28, 4 }
  0xa5   : > { %2157 = vst [vmem:[#allocation2 + $0x80] sm:$0xf] %v2021_v63  ;;  %v904_v7 = vrot.slane %v822_v0, 5  ;;  %v6431_v60 = vld [vmem:[#allocation2 + $0x4f8] sm:$0xf0]  ;;  %v427_v28 = vshrl.u32 %v8384_v11, 16 }
  0xa6   : > { %309 = vst [vmem:[#allocation2 + $0x48] sm:$0xf] %v273_v59  ;;  %v426_v1 = vsel %vm8352_vm11, %v421_v57, %v8397_v58  ;;  %v8414_v51 = vld [vmem:[%s7763_s30 + $0x10] sm:$0xf]  ;;  %v6434_v23 = vor.u32 %v7398_v3, %v6431_v60  ;;  %v348_v17 = vld [vmem:[%s7763_s30 + $0x14] sm:$0xf] }
  0xa7   : > { %310 = vst [vmem:[#allocation2 + $0x6c] sm:$0xf] %v274_v54  ;;  %v906_v18 = vrot.slane %v904_v7, 4  ;;  %v907_v9 = vrot.slane %v8414_v51, 5  ;;  %v905_v21 = vsel %vm7765_vm2, %v903_v14, %v904_v7  ;;  %v433_v29 = vshll.u32 %v348_v17, 16 }
  0xa8   : > { %2929 = vmatmul.bf16.gmra.mxu3 %v6422_v31  ;;  %785 = vst [vmem:[#allocation2 + $0x4c] sm:$0xf] %v416_v4  ;;  %v437_v30 = vshrl.u32 %v348_v17, 16  ;;  %v429_v26 = vrot.slane %v427_v28, 4  ;;  %v1937_v34 = vld [vmem:[%s7763_s30 + $0x1c] sm:$0xf] }
  0xa9   : > { %786 = vst [vmem:[#allocation2 + $0x70] sm:$0xf] %v426_v1  ;;  %v908_v13 = vsel %vm7765_vm2, %v906_v18, %v907_v9  ;;  %v8439_v35 = vld [vmem:[%s7763_s30 + $0x18] sm:$0xf]  ;;  %v435_v5 = vrot.slane %v433_v29, 5  ;;  %v2023_v36 = vrot.slane %v1937_v34, 6 }
  0xaa   : > { %1043 = vst [vmem:[#allocation2 + $0x50] sm:$0xf] %v905_v21  ;;  %v430_v37 = vor.u32 %v429_v26, %v8397_v58  ;;  %v439_v25 = vrot.slane %v437_v30, 4  ;;  %v8443_v16 = vld [vmem:[%s7763_s30 + $0x20] sm:$0xf]  ;;  %v443_v12 = vshll.u32 %v8439_v35, 16 }
  0xab   : > { %1044 = vst [vmem:[#allocation2 + $0x74] sm:$0xf] %v908_v13  ;;  %v6233_v11 = vld [vmem:[#allocation2 + $0x14] sm:$0xf]  ;;  %v7349_v39 = vld [vmem:[#allocation2 + $0x34] sm:$0xf0] }
  0xac   : > { %v7269_v43 = vld [vmem:[#allocation2 + $0x4] sm:$0xf]  ;;  %v2022_v44 = vrot.slane %v2020_v55, 4  ;;  %v2025_v47 = vrot.slane %v2023_v36, 4  ;;  %v6539_v33 = vld [vmem:[#allocation2 + $0x24] sm:$0xf0]  ;;  %v440_v50 = vor.u32 %v439_v25, %v435_v5  ;;  %v6234_v0 = vor.u32 %v7349_v39, %v6233_v11 }
  0xad   : > { %v6545_v49 = vld [vmem:[#allocation2 + $0x8] sm:$0xf]  ;;  %v7271_v53 = vld [vmem:[#allocation2 + $0x28] sm:$0xf0]  ;;  %v2026_v46 = vrot.slane %v8443_v16, 6  ;;  %v431_v45 = vrot.slane %v430_v37, 4  ;;  %v6542_v4 = vor.u32 %v7269_v43, %v6539_v33 }
  0xae   : > { %v2024_v56 = vsel %vm8339_vm8, %v2022_v44, %v2023_v36  ;;  %v275_v57 = vld [vmem:[%s7763_s30 + $0x10] sm:$0xf]  ;;  %v276_v58 = vld [vmem:[%s7763_s30 + $0x14] sm:$0xf]  ;;  %v8457_v61 = vrot.slane %v443_v12, 5  ;;  %v441_v55 = vrot.slane %v440_v50, 4  ;;  %v6546_v60 = vor.u32 %v7271_v53, %v6545_v49 }
  0xaf   : > { %v2027_v42 = vsel %vm8339_vm8, %v2025_v47, %v2026_v46  ;;  %2158 = vst [vmem:[#allocation2 + $0xa4] sm:$0xf] %v2024_v56  ;;  %v824_v62 = vld [vmem:[%s7763_s30 + $0x14] sm:$0xf]  ;;  %v6537_v59 = vld [vmem:[#allocation2] sm:$0xf]  ;;  %v436_v63 = vsel %vm8352_vm11, %v431_v45, %v435_v5 }
  0xb0   : > { %v2751_v2 = vpop.f32.mrf.mxu0  ;;  %2159 = vst [vmem:[#allocation2 + $0xc8] sm:$0xf] %v2027_v42  ;;  %v910_v54 = vrot.slane %v824_v62, 5  ;;  %v7270_v3 = vld [vmem:[#allocation2 + $0x20] sm:$0xf0]  ;;  %v446_v7 = vsel %vm8352_vm11, %v441_v55, %v8457_v61  ;;  %v909_v1 = vrot.slane %v907_v9, 4 }
  0xb1   : > { %v2850_v19 = vpop.f32.mrf.mxu1  ;;  %311 = vst [vmem:[#allocation2 + $0x90] sm:$0xf] %v275_v57  ;;  %v6538_v9 = vor.u32 %v7270_v3, %v6537_v59  ;;  %v447_v27 = vshrl.u32 %v8439_v35, 16  ;;  %v8485_v26 = vld [vmem:[%s7763_s30 + $0x20] sm:$0xf]  ;;  %v7485_v45 = vld [vmem:[%s10308_s4 + $0x1b0] sm:$0xff] }
  0xb2   : > { %v8426_v20 = vadd.f32 %v2850_v19, %v2751_v2  ;;  %312 = vst [vmem:[#allocation2 + $0xb4] sm:$0xf] %v276_v58  ;;  %v912_v2 = vrot.slane %v910_v54, 4  ;;  %v911_v21 = vsel %vm7765_vm2, %v909_v1, %v910_v54  ;;  %v8489_v16 = vld [vmem:[%s7763_s30 + $0x28] sm:$0xf]  ;;  %v463_v35 = vshll.u32 %v8485_v26, 16  ;;  %5314 = vmatpush.bf16.msra.mxu2 %v7485_v45 }
  0xb3   : > { %2790 = vmatmul.bf16.gmra.mxu0 %v6322_v10  ;;  %v8468_v10 = vld [vmem:[%s7763_s30 + $0x18] sm:$0xf]  ;;  %787 = vst [vmem:[#allocation2 + $0x94] sm:$0xf] %v436_v63  ;;  %v449_v30 = vrot.slane %v447_v27, 4  ;;  %v2032_v33 = vrot.slane %v8489_v16, 6 }
  0xb4   : > { %2835 = vmatmul.bf16.gmra.mxu2 %v6430_v41  ;;  %2889 = vmatmul.bf16.gmra.mxu1 %v6326_v15  ;;  %v913_v15 = vrot.slane %v8468_v10, 5  ;;  %788 = vst [vmem:[#allocation2 + $0xb8] sm:$0xf] %v446_v7  ;;  %v6245_v11 = vld [vmem:[#allocation2 + $0x5c] sm:$0xf]  ;;  %v7493_v50 = vld [vmem:[%s10308_s4 + $0x1f0] sm:$0xff] }
  0xb5   : > { %1045 = vst [vmem:[#allocation2 + $0x98] sm:$0xf] %v911_v21  ;;  %v450_v36 = vor.u32 %v449_v30, %v8457_v61  ;;  %v7352_v39 = vld [vmem:[#allocation2 + $0x7c] sm:$0xf0]  ;;  %v7272_v43 = vld [vmem:[#allocation2 + $0x4c] sm:$0xf]  ;;  %5413 = vmatpush.bf16.msra.mxu3 %v7493_v50 }
  0xb6   : > { %v914_v13 = vsel %vm7765_vm2, %v912_v2, %v913_v15  ;;  %v6551_v44 = vld [vmem:[#allocation2 + $0x6c] sm:$0xf0]  ;;  %v277_v42 = vld [vmem:[%s7763_s30 + $0x18] sm:$0xf]  ;;  %v278_v55 = vld [vmem:[%s7763_s30 + $0x1c] sm:$0xf] }
  0xb7   : > { %v2796_v31 = vpop.f32.mrf.mxu2  ;;  %1046 = vst [vmem:[#allocation2 + $0xbc] sm:$0xf] %v914_v13  ;;  %v6557_v53 = vld [vmem:[#allocation2 + $0x50] sm:$0xf]  ;;  %v451_v56 = vrot.slane %v450_v36, 4  ;;  %v8511_v62 = vrot.slane %v463_v35, 5  ;;  %v6554_v10 = vor.u32 %v7272_v43, %v6551_v44 }
  0xb8   : > { %2934 = vmatmul.bf16.gmra.mxu3 %v6434_v23  ;;  %v2753_v24 = vpop.f32.mrf.mxu0  ;;  %v350_v23 = vld [vmem:[%s7763_s30 + $0x1c] sm:$0xf]  ;;  %v915_v54 = vrot.slane %v913_v15, 4  ;;  %v6549_v7 = vld [vmem:[#allocation2 + $0x48] sm:$0xf] }
  0xb9   : > { %v2852_v38 = vpop.f32.mrf.mxu1  ;;  %v453_v17 = vshll.u32 %v350_v23, 16  ;;  %v457_v28 = vshrl.u32 %v350_v23, 16  ;;  %v826_v59 = vld [vmem:[%s7763_s30 + $0x1c] sm:$0xf]  ;;  %313 = vst [vmem:[#allocation2 + $0xd8] sm:$0xf] %v277_v42 }
  0xba   : > { %v8446_v32 = vadd.f32 %v2852_v38, %v2753_v24  ;;  %v2028_v24 = vrot.slane %v2026_v46, 4  ;;  %v7274_v46 = vld [vmem:[#allocation2 + $0x70] sm:$0xf0]  ;;  %v916_v3 = vrot.slane %v826_v59, 5  ;;  %v7273_v2 = vld [vmem:[#allocation2 + $0x68] sm:$0xf0] }
  0xbb   : > { %v2895_v22 = vpop.f32.mrf.mxu3  ;;  %v455_v34 = vrot.slane %v453_v17, 5  ;;  %v459_v25 = vrot.slane %v457_v28, 4  ;;  %314 = vst [vmem:[#allocation2 + $0xfc] sm:$0xf] %v278_v55  ;;  %v6550_v28 = vor.u32 %v7273_v2, %v6549_v7  ;;  %v352_v30 = vld [vmem:[%s7763_s30 + $0x24] sm:$0xf] }
  0xbc   : > { %v8450_v40 = vadd.f32 %v2895_v22, %v2796_v31  ;;  %v1939_v31 = vld [vmem:[%s7763_s30 + $0x24] sm:$0xf]  ;;  %v918_v15 = vrot.slane %v916_v3, 4  ;;  %v917_v23 = vsel %vm7765_vm2, %v915_v54, %v916_v3  ;;  %v279_v3 = vld [vmem:[%s7763_s30 + $0x20] sm:$0xf] }
  0xbd   : > { %v2029_v37 = vrot.slane %v1939_v31, 6  ;;  %v460_v57 = vor.u32 %v459_v25, %v455_v34  ;;  %1047 = vst [vmem:[#allocation2 + $0xe0] sm:$0xf] %v917_v23  ;;  %v467_v31 = vshrl.u32 %v8485_v26, 16  ;;  %v7527_v25 = vld [vmem:[%s8421_s16 + $0x30] sm:$0xff] }
  0xbe   : > { %5855 = vmatpush.bf16.msra.mxu1 %v7527_v25  ;;  %v8545_v26 = vld [vmem:[%s7763_s30 + $0x30] sm:$0xf]  ;;  %v6257_v50 = vld [vmem:[#allocation2 + $0xa4] sm:$0xf]  ;;  %v7277_v54 = vld [vmem:[#allocation2 + $0xb8] sm:$0xf0] }
  0xbf   : > { %v2798_v52 = vpop.f32.mrf.mxu2  ;;  %v2031_v47 = vrot.slane %v2029_v37, 4  ;;  %v2030_v58 = vsel %vm8339_vm8, %v2028_v24, %v2029_v37  ;;  %v469_v36 = vrot.slane %v467_v31, 4  ;;  %v828_v7 = vld [vmem:[%s7763_s30 + $0x24] sm:$0xf]  ;;  %315 = vst [vmem:[#allocation2 + $0x120] sm:$0xf] %v279_v3 }
  0xc0   : > { %v2756_v41 = vpop.f32.mrf.mxu0  ;;  %2160 = vst [vmem:[#allocation2 + $0xec] sm:$0xf] %v2030_v58  ;;  %v6563_v58 = vld [vmem:[#allocation2 + $0xb4] sm:$0xf0]  ;;  %v922_v2 = vrot.slane %v828_v7, 5 }
  0xc1   : > { %v2855_v14 = vpop.f32.mrf.mxu1  ;;  %v2033_v61 = vsel %vm8339_vm8, %v2031_v47, %v2032_v33  ;;  %v470_v43 = vor.u32 %v469_v36, %v8511_v62  ;;  %v8572_v23 = vld [vmem:[%s7763_s30 + $0x28] sm:$0xf]  ;;  %v354_v25 = vld [vmem:[%s7763_s30 + $0x2c] sm:$0xf] }
  0xc2   : > { %v8473_v19 = vadd.f32 %v2855_v14, %v2756_v41  ;;  %2161 = vst [vmem:[#allocation2 + $0x110] sm:$0xf] %v2033_v61  ;;  %v6558_v14 = vor.u32 %v7274_v46, %v6557_v53  ;;  %v2034_v61 = vrot.slane %v2032_v33, 4  ;;  %v280_v33 = vld [vmem:[%s7763_s30 + $0x24] sm:$0xf]  ;;  %v925_v31 = vrot.slane %v8572_v23, 5 }
  0xc3   : > { %v2897_v18 = vpop.f32.mrf.mxu3  ;;  %3578 = vmatmul.bf16.vlgmr.msrb.gmra.mxu0 %v6542_v4  ;;  %v6246_v4 = vor.u32 %v7352_v39, %v6245_v11  ;;  %v8541_v39 = vld [vmem:[%s7763_s30 + $0x28] sm:$0xf]  ;;  %v471_v59 = vrot.slane %v470_v43, 4  ;;  %316 = vst [vmem:[#allocation2 + $0x144] sm:$0xf] %v280_v33 }
  0xc4   : > { %v8479_v51 = vadd.f32 %v2897_v18, %v2798_v52  ;;  %2948 = vmatmul.bf16.vlgmr.msrb.gmra.mxu2 %v6234_v0  ;;  %3677 = vmatmul.bf16.vlgmr.msrb.gmra.mxu1 %v6546_v60  ;;  %v461_v52 = vrot.slane %v460_v57, 4  ;;  %v456_v0 = vsel %vm8352_vm11, %v451_v56, %v455_v34  ;;  %v8520_v60 = vld [vmem:[%s7763_s30 + $0x20] sm:$0xf]  ;;  %v473_v34 = vshll.u32 %v352_v30, 16  ;;  %v7355_v56 = vld [vmem:[#allocation2 + $0xc4] sm:$0xf0] }
  0xc5   : > { %v919_v18 = vrot.slane %v8520_v60, 5  ;;  %789 = vst [vmem:[#allocation2 + $0xdc] sm:$0xf] %v456_v0  ;;  %v483_v53 = vshll.u32 %v8541_v39, 16  ;;  %v7275_v57 = vld [vmem:[#allocation2 + $0x94] sm:$0xf] }
  0xc6   : > { %v466_v41 = vsel %vm8352_vm11, %v461_v52, %v8511_v62  ;;  %v475_v37 = vrot.slane %v473_v34, 5  ;;  %v6569_v62 = vld [vmem:[#allocation2 + $0x98] sm:$0xf]  ;;  %v2038_v52 = vrot.slane %v8545_v26, 6  ;;  %v6581_v33 = vld [vmem:[#allocation2 + $0xe0] sm:$0xf] }
  0xc7   : > { %v2801_v29 = vpop.f32.mrf.mxu2  ;;  %790 = vst [vmem:[#allocation2 + $0x100] sm:$0xf] %v466_v41  ;;  %v920_v27 = vsel %vm7765_vm2, %v918_v15, %v919_v18  ;;  %v6561_v41 = vld [vmem:[#allocation2 + $0x90] sm:$0xf]  ;;  %v7276_v15 = vld [vmem:[#allocation2 + $0xb0] sm:$0xf0] }
  0xc8   : > { %3479 = vmatmul.bf16.vlgmr.msrb.gmra.mxu3 %v6538_v9  ;;  %v2758_v5 = vpop.f32.mrf.mxu0  ;;  %1048 = vst [vmem:[#allocation2 + $0x104] sm:$0xf] %v920_v27  ;;  %v2040_v3 = vrot.slane %v2038_v52, 4 }
  0xc9   : > { %v2857_v38 = vpop.f32.mrf.mxu1 }
  0xca   : > { %v8492_v22 = vadd.f32 %v2857_v38, %v2758_v5  ;;  %v477_v5 = vshrl.u32 %v352_v30, 16  ;;  %v1941_v38 = vld [vmem:[%s7763_s30 + $0x2c] sm:$0xf]  ;;  %v924_v30 = vrot.slane %v922_v2, 4 }
  0xcb   : > { %v2900_v12 = vpop.f32.mrf.mxu3  ;;  %v2035_v11 = vrot.slane %v1941_v38, 6  ;;  %v487_v38 = vshrl.u32 %v8541_v39, 16 }
  0xcc   : > { %v8495_v49 = vadd.f32 %v2900_v12, %v2801_v29  ;;  %v7501_v29 = vld [vmem:[%s10308_s4 + $0x230] sm:$0xff]  ;;  %v479_v35 = vrot.slane %v477_v5, 4  ;;  %v926_v60 = vsel %vm7765_vm2, %v924_v30, %v925_v31  ;;  %v6573_v30 = vld [vmem:[#allocation2 + $0xd8] sm:$0xf] }
  0xcd   : > { %5512 = vmatpush.bf16.msra.mxu0 %v7501_v29  ;;  %v2037_v42 = vrot.slane %v2035_v11, 4  ;;  %v2036_v0 = vsel %vm8339_vm8, %v2034_v61, %v2035_v11  ;;  %v921_v29 = vrot.slane %v919_v18, 4  ;;  %1050 = vst [vmem:[#allocation2 + $0x14c] sm:$0xf] %v926_v60  ;;  %v489_v43 = vrot.slane %v487_v38, 4 }
  0xce   : > { %v480_v47 = vor.u32 %v479_v35, %v475_v37  ;;  %2162 = vst [vmem:[#allocation2 + $0x134] sm:$0xf] %v2036_v0  ;;  %v493_v35 = vshll.u32 %v354_v25, 16  ;;  %v8595_v61 = vld [vmem:[%s7763_s30 + $0x38] sm:$0xf] }
  0xcf   : > { %v2803_v63 = vpop.f32.mrf.mxu2  ;;  %v2039_v16 = vsel %vm8339_vm8, %v2037_v42, %v2038_v52  ;;  %v923_v36 = vsel %vm7765_vm2, %v921_v29, %v922_v2  ;;  %v6575_v0 = vld [vmem:[#allocation2 + $0xfc] sm:$0xf0]  ;;  %v7280_v7 = vld [vmem:[#allocation2 + $0x100] sm:$0xf0]  ;;  %v281_v52 = vld [vmem:[%s7763_s30 + $0x28] sm:$0xf] }
  0xd0   : > { %v2761_v1 = vpop.f32.mrf.mxu0  ;;  %2163 = vst [vmem:[#allocation2 + $0x158] sm:$0xf] %v2039_v16  ;;  %v7279_v60 = vld [vmem:[#allocation2 + $0xf8] sm:$0xf0]  ;;  %v8628_v38 = vld [vmem:[%s7763_s30 + $0x30] sm:$0xf] }
  0xd1   : > { %v2860_v21 = vpop.f32.mrf.mxu1  ;;  %1049 = vst [vmem:[#allocation2 + $0x128] sm:$0xf] %v923_v36 }
  0xd2   : > { %v8523_v9 = vadd.f32 %v2860_v21, %v2761_v1  ;;  %v476_v1 = vsel %vm8352_vm11, %v471_v59, %v475_v37  ;;  %v6566_v21 = vor.u32 %v7275_v57, %v6563_v58  ;;  %v6562_v37 = vor.u32 %v7276_v15, %v6561_v41  ;;  %v6269_v59 = vld [vmem:[#allocation2 + $0xec] sm:$0xf]  ;;  %317 = vst [vmem:[#allocation2 + $0x168] sm:$0xf] %v281_v52 }
  0xd3   : > { %v2902_v13 = vpop.f32.mrf.mxu3  ;;  %3583 = vmatmul.bf16.gmra.mxu0 %v6554_v10  ;;  %791 = vst [vmem:[#allocation2 + $0x124] sm:$0xf] %v476_v1  ;;  %v7492_v41 = vld [vmem:[%s10308_s4 + $0x1e8] sm:$0xff]  ;;  %v2044_v1 = vrot.slane %v8595_v61, 6 }
  0xd4   : > { %v8531_v17 = vadd.f32 %v2902_v13, %v2803_v63  ;;  %2953 = vmatmul.bf16.gmra.mxu2 %v6246_v4  ;;  %3682 = vmatmul.bf16.gmra.mxu1 %v6558_v14  ;;  %v481_v63 = vrot.slane %v480_v47, 4  ;;  %v8558_v4 = vrot.slane %v483_v53, 5  ;;  %v6258_v14 = vor.u32 %v7355_v56, %v6257_v50  ;;  %v8591_v47 = vld [vmem:[%s7763_s30 + $0x30] sm:$0xf]  ;;  %v282_v15 = vld [vmem:[%s7763_s30 + $0x2c] sm:$0xf] }
  0xd5   : > { %v495_v53 = vrot.slane %v493_v35, 5  ;;  %v503_v39 = vshll.u32 %v8591_v47, 16  ;;  %5414 = vmatpush.bf16.msra.mxu3 %v7492_v41  ;;  %318 = vst [vmem:[#allocation2 + $0x18c] sm:$0xf] %v282_v15  ;;  %v8650_v41 = vld [vmem:[%s7763_s30 + $0x38] sm:$0xf] }
  0xd6   : > { %v486_v13 = vsel %vm8352_vm11, %v481_v63, %v8558_v4  ;;  %v490_v56 = vor.u32 %v489_v43, %v8558_v4  ;;  %v7358_v63 = vld [vmem:[#allocation2 + $0x10c] sm:$0xf0]  ;;  %v523_v52 = vshll.u32 %v8650_v41, 16 }
  0xd7   : > { %v2806_v24 = vpop.f32.mrf.mxu2  ;;  %792 = vst [vmem:[#allocation2 + $0x148] sm:$0xf] %v486_v13  ;;  %v6270_v36 = vor.u32 %v7358_v63, %v6269_v59 }
  0xd8   : > { %3484 = vmatmul.bf16.gmra.mxu3 %v6550_v28  ;;  %v2763_v12 = vpop.f32.mrf.mxu0  ;;  %v6570_v28 = vor.u32 %v7277_v54, %v6569_v62  ;;  %v7278_v54 = vld [vmem:[#allocation2 + $0xdc] sm:$0xf]  ;;  %v491_v2 = vrot.slane %v490_v56, 4 }
  0xd9   : > { %v2862_v44 = vpop.f32.mrf.mxu1 }
  0xda   : > { %v8548_v45 = vadd.f32 %v2862_v44, %v2763_v12  ;;  %v497_v12 = vshrl.u32 %v354_v25, 16  ;;  %v1943_v44 = vld [vmem:[%s7763_s30 + $0x34] sm:$0xf] }
  0xdb   : > { %v2905_v46 = vpop.f32.mrf.mxu3  ;;  %v2041_v50 = vrot.slane %v1943_v44, 6  ;;  %v931_v44 = vrot.slane %v8628_v38, 5 }
  0xdc   : > { %v8552_v55 = vadd.f32 %v2905_v46, %v2806_v24  ;;  %v499_v57 = vrot.slane %v497_v12, 4  ;;  %v6582_v12 = vor.u32 %v7280_v7, %v6581_v33 }
  0xdd   : > { %v2043_v16 = vrot.slane %v2041_v50, 4  ;;  %v2042_v26 = vsel %vm8339_vm8, %v2040_v3, %v2041_v50  ;;  %v7500_v3 = vld [vmem:[%s10308_s4 + $0x228] sm:$0xff] }
  0xde   : > { %2164 = vst [vmem:[#allocation2 + $0x17c] sm:$0xf] %v2042_v26  ;;  %5513 = vmatpush.bf16.msra.mxu0 %v7500_v3 }
  0xdf   : > { %v2808_v10 = vpop.f32.mrf.mxu2  ;;  %v2045_v13 = vsel %vm8339_vm8, %v2043_v16, %v2044_v1  ;;  %v1945_v16 = vld [vmem:[%s7763_s30 + $0x3c] sm:$0xf] }
  0xe0   : > { %v2766_v27 = vpop.f32.mrf.mxu0  ;;  %2165 = vst [vmem:[#allocation2 + $0x1a0] sm:$0xf] %v2045_v13 }
  0xe1   : > { %v2865_v34 = vpop.f32.mrf.mxu1 }
  0xe2   : > { %v8577_v24 = vadd.f32 %v2865_v34, %v2766_v27  ;;  %v496_v34 = vsel %vm8352_vm11, %v491_v2, %v495_v53 }
  0xe3   : > { %v2907_v5 = vpop.f32.mrf.mxu3  ;;  %3588 = vmatmul.bf16.gmra.mxu0 %v6566_v21  ;;  %v8615_v21 = vrot.slane %v503_v39, 5  ;;  %793 = vst [vmem:[#allocation2 + $0x16c] sm:$0xf] %v496_v34  ;;  %v507_v39 = vshrl.u32 %v8591_v47, 16 }
  0xe4   : > { %v8585_v18 = vadd.f32 %v2907_v5, %v2808_v10  ;;  %2958 = vmatmul.bf16.gmra.mxu2 %v6258_v14  ;;  %3687 = vmatmul.bf16.gmra.mxu1 %v6570_v28  ;;  %v7484_v10 = vld [vmem:[%s10308_s4 + $0x1a8] sm:$0xff]  ;;  %v500_v14 = vor.u32 %v499_v57, %v495_v53 }
  0xe5   : > { %5315 = vmatpush.bf16.msra.mxu2 %v7484_v10  ;;  %v830_v28 = vld [vmem:[%s7763_s30 + $0x2c] sm:$0xf]  ;;  %v2047_v10 = vrot.slane %v1945_v16, 6 }
  0xe6   : > { %v501_v27 = vrot.slane %v500_v14, 4  ;;  %v928_v5 = vrot.slane %v830_v28, 5  ;;  %v8654_v14 = vld [vmem:[%s7763_s30 + $0x40] sm:$0xf]  ;;  %v7361_v28 = vld [vmem:[#allocation2 + $0x154] sm:$0xf0] }
  0xe7   : > { %v2811_v11 = vpop.f32.mrf.mxu2  ;;  %v2049_v34 = vrot.slane %v2047_v10, 4 }
  0xe8   : > { %3489 = vmatmul.bf16.gmra.mxu3 %v6562_v37  ;;  %v2768_v46 = vpop.f32.mrf.mxu0  ;;  %v6578_v37 = vor.u32 %v7278_v54, %v6575_v0  ;;  %v506_v25 = vsel %vm8352_vm11, %v501_v27, %v8615_v21  ;;  %v930_v43 = vrot.slane %v928_v5, 4  ;;  %v509_v54 = vrot.slane %v507_v39, 4  ;;  %v6281_v27 = vld [vmem:[#allocation2 + $0x134] sm:$0xf] }
  0xe9   : > { %v2867_v58 = vpop.f32.mrf.mxu1  ;;  %794 = vst [vmem:[#allocation2 + $0x190] sm:$0xf] %v506_v25  ;;  %v6282_v39 = vor.u32 %v7361_v28, %v6281_v27  ;;  %v527_v27 = vshrl.u32 %v8650_v41, 16 }
  0xea   : > { %v8598_v62 = vadd.f32 %v2867_v58, %v2768_v46  ;;  %v932_v57 = vsel %vm7765_vm2, %v930_v43, %v931_v44  ;;  %v356_v58 = vld [vmem:[%s7763_s30 + $0x34] sm:$0xf]  ;;  %v510_v47 = vor.u32 %v509_v54, %v8615_v21  ;;  %v2046_v21 = vrot.slane %v2044_v1, 4  ;;  %v283_v43 = vld [vmem:[%s7763_s30 + $0x30] sm:$0xf] }
  0xeb   : > { %v2910_v42 = vpop.f32.mrf.mxu3  ;;  %1052 = vst [vmem:[#allocation2 + $0x194] sm:$0xf] %v932_v57  ;;  %v517_v59 = vshrl.u32 %v356_v58, 16  ;;  %v284_v1 = vld [vmem:[%s7763_s30 + $0x34] sm:$0xf] }
  0xec   : > { %v8602_v4 = vadd.f32 %v2910_v42, %v2811_v11  ;;  %v927_v11 = vrot.slane %v925_v31, 4  ;;  %v6574_v31 = vor.u32 %v7279_v60, %v6573_v30  ;;  %v513_v42 = vshll.u32 %v356_v58, 16  ;;  %v6587_v30 = vld [vmem:[#allocation2 + $0x144] sm:$0xf0]  ;;  %v6585_v57 = vld [vmem:[#allocation2 + $0x120] sm:$0xf] }
  0xed   : > { %v519_v33 = vrot.slane %v517_v59, 4  ;;  %v7526_v60 = vld [vmem:[%s8421_s16 + $0x28] sm:$0xff]  ;;  %v511_v25 = vrot.slane %v510_v47, 4  ;;  %319 = vst [vmem:[#allocation2 + $0x1b0] sm:$0xf] %v283_v43 }
  0xee   : > { %v929_v56 = vsel %vm7765_vm2, %v927_v11, %v928_v5  ;;  %v515_v0 = vrot.slane %v513_v42, 5  ;;  %v2048_v11 = vsel %vm8339_vm8, %v2046_v21, %v2047_v10  ;;  %5856 = vmatpush.bf16.msra.mxu1 %v7526_v60  ;;  %v7282_v42 = vld [vmem:[#allocation2 + $0x140] sm:$0xf0]  ;;  %v8682_v54 = vld [vmem:[%s7763_s30 + $0x38] sm:$0xf]  ;;  %v529_v21 = vrot.slane %v527_v27, 4 }
  0xef   : > { %v2813_v29 = vpop.f32.mrf.mxu2  ;;  %1051 = vst [vmem:[#allocation2 + $0x170] sm:$0xf] %v929_v56 }
  0xf0   : > { %v2771_v35 = vpop.f32.mrf.mxu0  ;;  %v520_v26 = vor.u32 %v519_v33, %v515_v0  ;;  %2166 = vst [vmem:[#allocation2 + $0x1c4] sm:$0xf] %v2048_v11  ;;  %v933_v33 = vrot.slane %v931_v44, 4 }
  0xf1   : > { %v2870_v53 = vpop.f32.mrf.mxu1  ;;  %320 = vst [vmem:[#allocation2 + $0x1d4] sm:$0xf] %v284_v1 }
  0xf2   : > { %v8633_v50 = vadd.f32 %v2870_v53, %v2771_v35  ;;  %v521_v35 = vrot.slane %v520_v26, 4  ;;  %v8668_v53 = vrot.slane %v523_v52, 5  ;;  %v6586_v52 = vor.u32 %v7282_v42, %v6585_v57  ;;  %v7364_v57 = vld [vmem:[#allocation2 + $0x19c] sm:$0xf0] }
  0xf3   : > { %v2912_v46 = vpop.f32.mrf.mxu3  ;;  %3593 = vmatmul.bf16.gmra.mxu0 %v6578_v37  ;;  %v2050_v37 = vrot.slane %v8654_v14, 6 }
  0xf4   : > { %v8641_v23 = vadd.f32 %v2912_v46, %v2813_v29  ;;  %2963 = vmatmul.bf16.gmra.mxu2 %v6270_v36  ;;  %3692 = vmatmul.bf16.gmra.mxu1 %v6582_v12  ;;  %v7281_v29 = vld [vmem:[#allocation2 + $0x124] sm:$0xf]  ;;  %v6593_v36 = vld [vmem:[#allocation2 + $0x128] sm:$0xf]  ;;  %v7283_v12 = vld [vmem:[#allocation2 + $0x148] sm:$0xf0] }
  0xf5   : > { %v2051_v61 = vsel %vm8339_vm8, %v2049_v34, %v2050_v37  ;;  %v832_v46 = vld [vmem:[%s7763_s30 + $0x34] sm:$0xf]  ;;  %v6590_v59 = vor.u32 %v7281_v29, %v6587_v30  ;;  %v6594_v16 = vor.u32 %v7283_v12, %v6593_v36  ;;  %v1947_v34 = vld [vmem:[%s7763_s30 + $0x44] sm:$0xf]  ;;  %v8701_v36 = vld [vmem:[%s7763_s30 + $0x40] sm:$0xf]  ;;  %v530_v12 = vor.u32 %v529_v21, %v8668_v53 }
  0xf6   : > { %2167 = vst [vmem:[#allocation2 + $0x1e8] sm:$0xf] %v2051_v61  ;;  %v934_v58 = vrot.slane %v832_v46, 5  ;;  %v8705_v61 = vld [vmem:[%s7763_s30 + $0x48] sm:$0xf]  ;;  %v543_v41 = vshll.u32 %v8701_v36, 16 }
  0xf7   : > { %v2816_v63 = vpop.f32.mrf.mxu2 }
  0xf8   : > { %3494 = vmatmul.bf16.gmra.mxu3 %v6574_v31  ;;  %v2773_v7 = vpop.f32.mrf.mxu0  ;;  %v516_v31 = vsel %vm8352_vm11, %v511_v25, %v515_v0  ;;  %v937_v0 = vrot.slane %v8682_v54, 5  ;;  %v935_v26 = vsel %vm7765_vm2, %v933_v33, %v934_v58 }
  0xf9   : > { %v2872_v2 = vpop.f32.mrf.mxu1  ;;  %795 = vst [vmem:[#allocation2 + $0x1b4] sm:$0xf] %v516_v31  ;;  %v7284_v31 = vld [vmem:[#allocation2 + $0x16c] sm:$0xf] }
  0xfa   : > { %v8657_v13 = vadd.f32 %v2872_v2, %v2773_v7  ;;  %v936_v7 = vrot.slane %v934_v58, 4  ;;  %1053 = vst [vmem:[#allocation2 + $0x1b8] sm:$0xf] %v935_v26  ;;  %v6599_v58 = vld [vmem:[#allocation2 + $0x18c] sm:$0xf0]  ;;  %v8719_v26 = vrot.slane %v543_v41, 5 }
  0xfb   : > { %v2915_v15 = vpop.f32.mrf.mxu3  ;;  %v6602_v21 = vor.u32 %v7284_v31, %v6599_v58  ;;  %v7483_v58 = vld [vmem:[%s10308_s4 + $0x1a0] sm:$0xff] }
  0xfc   : > { %v8661_v5 = vadd.f32 %v2915_v15, %v2816_v63  ;;  %v526_v63 = vsel %vm8352_vm11, %v521_v35, %v8668_v53  ;;  %v938_v38 = vsel %vm7765_vm2, %v936_v7, %v937_v0  ;;  %v358_v15 = vld [vmem:[%s7763_s30 + $0x3c] sm:$0xf]  ;;  %v2053_v35 = vrot.slane %v1947_v34, 6  ;;  %5316 = vmatpush.bf16.msra.mxu2 %v7483_v58 }
  0xfd   : > { %796 = vst [vmem:[#allocation2 + $0x1d8] sm:$0xf] %v526_v63  ;;  %v533_v28 = vshll.u32 %v358_v15, 16  ;;  %v537_v29 = vshrl.u32 %v358_v15, 16  ;;  %v7286_v63 = vld [vmem:[#allocation2 + $0x190] sm:$0xf0] }
  0xfe   : > { %1054 = vst [vmem:[#allocation2 + $0x1dc] sm:$0xf] %v938_v38  ;;  %v2055_v53 = vrot.slane %v2053_v35, 4  ;;  %v834_v38 = vld [vmem:[%s7763_s30 + $0x3c] sm:$0xf] }
  0xff   : > { %v2818_v56 = vpop.f32.mrf.mxu2  ;;  %v535_v60 = vrot.slane %v533_v28, 5  ;;  %v539_v11 = vrot.slane %v537_v29, 4  ;;  %v6597_v15 = vld [vmem:[#allocation2 + $0x168] sm:$0xf]  ;;  %v940_v28 = vrot.slane %v834_v38, 5 }
 0x100   : > { %v2776_v3 = vpop.f32.mrf.mxu0 }
 0x101   : > { %v2875_v10 = vpop.f32.mrf.mxu1  ;;  %v540_v33 = vor.u32 %v539_v11, %v535_v60  ;;  %v939_v11 = vrot.slane %v937_v0, 4 }
 0x102   : > { %v8687_v2 = vadd.f32 %v2875_v10, %v2776_v3  ;;  %v2056_v3 = vrot.slane %v8705_v61, 6  ;;  %v285_v10 = vld [vmem:[%s7763_s30 + $0x38] sm:$0xf]  ;;  %v287_v61 = vld [vmem:[%s7763_s30 + $0x40] sm:$0xf] }
 0x103   : > { %v2917_v47 = vpop.f32.mrf.mxu3  ;;  %3598 = vmatmul.bf16.gmra.mxu0 %v6590_v59  ;;  %v6605_v59 = vld [vmem:[#allocation2 + $0x170] sm:$0xf]  ;;  %321 = vst [vmem:[#allocation2 + $0x1f8] sm:$0xf] %v285_v10  ;;  %v1949_v10 = vld [vmem:[%s7763_s30 + $0x4c] sm:$0xf] }
 0x104   : > { %v8695_v44 = vadd.f32 %v2917_v47, %v2818_v56  ;;  %2968 = vmatmul.bf16.gmra.mxu2 %v6282_v39  ;;  %3697 = vmatmul.bf16.gmra.mxu1 %v6594_v16  ;;  %v6293_v56 = vld [vmem:[#allocation2 + $0x17c] sm:$0xf]  ;;  %v2052_v39 = vrot.slane %v2050_v37, 4  ;;  %v531_v16 = vrot.slane %v530_v12, 4  ;;  %v2057_v14 = vsel %vm8339_vm8, %v2055_v53, %v2056_v3  ;;  %v360_v53 = vld [vmem:[%s7763_s30 + $0x44] sm:$0xf] }
 0x105   : > { %v286_v47 = vld [vmem:[%s7763_s30 + $0x3c] sm:$0xf]  ;;  %v541_v37 = vrot.slane %v540_v33, 4  ;;  %2169 = vst [vmem:[#allocation2 + $0x230] sm:$0xf] %v2057_v14  ;;  %v6294_v29 = vor.u32 %v7364_v57, %v6293_v56  ;;  %v6606_v12 = vor.u32 %v7286_v63, %v6605_v59  ;;  %v941_v57 = vsel %vm7765_vm2, %v939_v11, %v940_v28 }
 0x106   : > { %v2054_v7 = vsel %vm8339_vm8, %v2052_v39, %v2053_v35  ;;  %v536_v27 = vsel %vm8352_vm11, %v531_v16, %v535_v60  ;;  %322 = vst [vmem:[#allocation2 + $0x21c] sm:$0xf] %v286_v47  ;;  %v7491_v39 = vld [vmem:[%s10308_s4 + $0x1e0] sm:$0xff]  ;;  %v547_v59 = vshrl.u32 %v8701_v36, 16  ;;  %v553_v63 = vshll.u32 %v360_v53, 16 }
 0x107   : > { %v2821_v30 = vpop.f32.mrf.mxu2  ;;  %2168 = vst [vmem:[#allocation2 + $0x20c] sm:$0xf] %v2054_v7  ;;  %v546_v34 = vsel %vm8352_vm11, %v541_v37, %v8719_v26  ;;  %5415 = vmatpush.bf16.msra.mxu3 %v7491_v39  ;;  %v557_v16 = vshrl.u32 %v360_v53, 16  ;;  %v8757_v47 = vld [vmem:[%s7763_s30 + $0x48] sm:$0xf]  ;;  %v2059_v38 = vrot.slane %v1949_v10, 6 }
 0x108   : > { %3499 = vmatmul.bf16.gmra.mxu3 %v6586_v52  ;;  %v2778_v25 = vpop.f32.mrf.mxu0  ;;  %797 = vst [vmem:[#allocation2 + $0x1fc] sm:$0xf] %v536_v27  ;;  %v549_v7 = vrot.slane %v547_v59, 4  ;;  %v555_v14 = vrot.slane %v553_v63, 5  ;;  %v8761_v27 = vld [vmem:[%s7763_s30 + $0x50] sm:$0xf] }
 0x109   : > { %v2877_v43 = vpop.f32.mrf.mxu1  ;;  %798 = vst [vmem:[#allocation2 + $0x220] sm:$0xf] %v546_v34  ;;  %v7367_v34 = vld [vmem:[#allocation2 + $0x1e4] sm:$0xf0]  ;;  %v2058_v11 = vrot.slane %v2056_v3, 4 }
 0x10a   : > { %v8708_v46 = vadd.f32 %v2877_v43, %v2778_v25  ;;  %v8732_v25 = vld [vmem:[%s7763_s30 + $0x40] sm:$0xf]  ;;  %v942_v43 = vrot.slane %v940_v28, 4  ;;  %1055 = vst [vmem:[#allocation2 + $0x200] sm:$0xf] %v941_v57  ;;  %v563_v28 = vshll.u32 %v8757_v47, 16 }
 0x10b   : > { %v2920_v1 = vpop.f32.mrf.mxu3  ;;  %v943_v60 = vrot.slane %v8732_v25, 5  ;;  %v7499_v57 = vld [vmem:[%s10308_s4 + $0x220] sm:$0xff]  ;;  %v2060_v53 = vsel %vm8339_vm8, %v2058_v11, %v2059_v38  ;;  %v6609_v10 = vld [vmem:[#allocation2 + $0x1b0] sm:$0xf]  ;;  %323 = vst [vmem:[#allocation2 + $0x240] sm:$0xf] %v287_v61 }
 0x10c   : > { %v8712_v42 = vadd.f32 %v2920_v1, %v2821_v30  ;;  %v7285_v30 = vld [vmem:[#allocation2 + $0x188] sm:$0xf0]  ;;  %v288_v3 = vld [vmem:[%s7763_s30 + $0x44] sm:$0xf]  ;;  %v8779_v59 = vrot.slane %v563_v28, 5  ;;  %5514 = vmatpush.bf16.msra.mxu0 %v7499_v57 }
 0x10d   : > { %v944_v31 = vsel %vm7765_vm2, %v942_v43, %v943_v60  ;;  %v6598_v0 = vor.u32 %v7285_v30, %v6597_v15  ;;  %v559_v15 = vrot.slane %v557_v16, 4  ;;  %2170 = vst [vmem:[#allocation2 + $0x254] sm:$0xf] %v2060_v53  ;;  %v945_v57 = vrot.slane %v943_v60, 4 }
 0x10e   : > { %10338 = vst [vmem:[#allocation6_spill] sm:$0xff] %v8712_v42 }
 0x10f   : > { %v2823_v52 = vpop.f32.mrf.mxu2  ;;  %1056 = vst [vmem:[#allocation2 + $0x224] sm:$0xf] %v944_v31  ;;  %v7525_v31 = vld [vmem:[%s8421_s16 + $0x20] sm:$0xff]  ;;  %v560_v39 = vor.u32 %v559_v15, %v555_v14  ;;  %v7288_v15 = vld [vmem:[#allocation2 + $0x1d0] sm:$0xf0] }
 0x110   : > { %v2781_v35 = vpop.f32.mrf.mxu0  ;;  %5857 = vmatpush.bf16.msra.mxu1 %v7525_v31  ;;  %324 = vst [vmem:[#allocation2 + $0x264] sm:$0xf] %v288_v3 }
 0x111   : > { %v2880_v41 = vpop.f32.mrf.mxu1  ;;  %v561_v16 = vrot.slane %v560_v39, 4 }
 0x112   : > { %v8737_v56 = vadd.f32 %v2880_v41, %v2781_v35  ;;  %v7287_v35 = vld [vmem:[#allocation2 + $0x1b4] sm:$0xf]  ;;  %v6617_v41 = vld [vmem:[#allocation2 + $0x1b8] sm:$0xf] }
 0x113   : > { %v2922_v1 = vpop.f32.mrf.mxu3  ;;  %3603 = vmatmul.bf16.gmra.mxu0 %v6602_v21  ;;  %v6305_v21 = vld [vmem:[#allocation2 + $0x1c4] sm:$0xf]  ;;  %v566_v28 = vsel %vm8352_vm11, %v561_v16, %v8779_v59  ;;  %v8811_v16 = vld [vmem:[%s7763_s30 + $0x50] sm:$0xf] }
 0x114   : > { %v8745_v54 = vadd.f32 %v2922_v1, %v2823_v52  ;;  %2973 = vmatmul.bf16.gmra.mxu2 %v6294_v29  ;;  %3702 = vmatmul.bf16.gmra.mxu1 %v6606_v12  ;;  %v550_v52 = vor.u32 %v549_v7, %v8719_v26  ;;  %v6611_v12 = vld [vmem:[#allocation2 + $0x1d4] sm:$0xf0]  ;;  %v2061_v26 = vrot.slane %v2059_v38, 4  ;;  %v7289_v1 = vld [vmem:[#allocation2 + $0x1d8] sm:$0xf0] }
 0x115   : > { %800 = vst [vmem:[#allocation2 + $0x268] sm:$0xf] %v566_v28 }
 0x116   : > { %10339 = vst [vmem:[#allocation7_spill] sm:$0xff] %v8745_v54  ;;  %v551_v58 = vrot.slane %v550_v52, 4  ;;  %v6306_v52 = vor.u32 %v7367_v34, %v6305_v21 }
 0x117   : > { %v2826_v33 = vpop.f32.mrf.mxu2 }
 0x118   : > { %3504 = vmatmul.bf16.gmra.mxu3 %v6598_v0  ;;  %v2783_v37 = vpop.f32.mrf.mxu0  ;;  %v2062_v0 = vrot.slane %v8761_v27, 6 }
 0x119   : > { %v2882_v36 = vpop.f32.mrf.mxu1 }
 0x11a   : > { %v8764_v30 = vadd.f32 %v2882_v36, %v2783_v37  ;;  %v2063_v63 = vsel %vm8339_vm8, %v2061_v26, %v2062_v0  ;;  %v556_v37 = vsel %vm8352_vm11, %v551_v58, %v555_v14  ;;  %v6614_v36 = vor.u32 %v7287_v35, %v6611_v12 }
 0x11b   : > { %v2925_v29 = vpop.f32.mrf.mxu3  ;;  %2171 = vst [vmem:[#allocation2 + $0x278] sm:$0xf] %v2063_v63  ;;  %v6618_v26 = vor.u32 %v7289_v1, %v6617_v41  ;;  %v6610_v41 = vor.u32 %v7288_v15, %v6609_v10  ;;  %v362_v1 = vld [vmem:[%s7763_s30 + $0x4c] sm:$0xf]  ;;  %v567_v58 = vshrl.u32 %v8757_v47, 16  ;;  %v583_v47 = vshll.u32 %v8811_v16, 16 }
 0x11c   : > { %v8768_v43 = vadd.f32 %v2925_v29, %v2826_v33  ;;  %v836_v33 = vld [vmem:[%s7763_s30 + $0x44] sm:$0xf]  ;;  %v8792_v29 = vld [vmem:[%s7763_s30 + $0x48] sm:$0xf]  ;;  %799 = vst [vmem:[#allocation2 + $0x244] sm:$0xf] %v556_v37 }
 0x11d   : > { %v946_v38 = vrot.slane %v836_v33, 5  ;;  %v10310_v14 = vrot.slane %v8792_v29, 5  ;;  %v573_v39 = vshll.u32 %v362_v1, 16  ;;  %v577_v53 = vshrl.u32 %v362_v1, 16  ;;  %v1951_v63 = vld [vmem:[%s7763_s30 + $0x54] sm:$0xf] }
 0x11e   : > { %10340 = vst [vmem:[#allocation8_spill] sm:$0xff] %v8768_v43  ;;  %v569_v3 = vrot.slane %v567_v58, 4  ;;  %v2065_v37 = vrot.slane %v1951_v63, 6  ;;  %v8815_v15 = vld [vmem:[%s7763_s30 + $0x58] sm:$0xf]  ;;  %v8829_v63 = vrot.slane %v583_v47, 5 }
 0x11f   : > { %v2828_v7 = vpop.f32.mrf.mxu2  ;;  %v948_v31 = vrot.slane %v946_v38, 4  ;;  %v947_v12 = vsel %vm7765_vm2, %v945_v57, %v946_v38  ;;  %v575_v33 = vrot.slane %v573_v39, 5  ;;  %v579_v38 = vrot.slane %v577_v53, 4  ;;  %v7290_v57 = vld [vmem:[#allocation2 + $0x1fc] sm:$0xf] }
 0x120   : > { %v2786_v11 = vpop.f32.mrf.mxu0  ;;  %1057 = vst [vmem:[#allocation2 + $0x248] sm:$0xf] %v947_v12  ;;  %v570_v10 = vor.u32 %v569_v3, %v8779_v59  ;;  %v2067_v59 = vrot.slane %v2065_v37, 4  ;;  %v6629_v12 = vld [vmem:[#allocation2 + $0x200] sm:$0xf] }
 0x121   : > { %v2885_v21 = vpop.f32.mrf.mxu1  ;;  %v950_v25 = vsel %vm7765_vm2, %v948_v31, %v10310_v14  ;;  %v6623_v31 = vld [vmem:[#allocation2 + $0x21c] sm:$0xf0]  ;;  %v580_v58 = vor.u32 %v579_v38, %v575_v33  ;;  %v289_v53 = vld [vmem:[%s7763_s30 + $0x48] sm:$0xf]  ;;  %v290_v3 = vld [vmem:[%s7763_s30 + $0x4c] sm:$0xf] }
 0x122   : > { %v8797_v35 = vadd.f32 %v2885_v21, %v2786_v11  ;;  %1058 = vst [vmem:[#allocation2 + $0x26c] sm:$0xf] %v950_v25  ;;  %v6317_v11 = vld [vmem:[#allocation2 + $0x20c] sm:$0xf]  ;;  %v2064_v21 = vrot.slane %v2062_v0, 4  ;;  %v571_v1 = vrot.slane %v570_v10, 4 }
 0x123   : > { %v2927_v34 = vpop.f32.mrf.mxu3  ;;  %3608 = vmatmul.bf16.gmra.mxu0 %v6614_v36  ;;  %v7292_v25 = vld [vmem:[#allocation2 + $0x220] sm:$0xf0]  ;;  %v581_v0 = vrot.slane %v580_v58, 4  ;;  %325 = vst [vmem:[#allocation2 + $0x288] sm:$0xf] %v289_v53  ;;  %v587_v53 = vshrl.u32 %v8811_v16, 16 }
 0x124   : > { %v8805_v60 = vadd.f32 %v2927_v34, %v2828_v7  ;;  %2978 = vmatmul.bf16.gmra.mxu2 %v6306_v52  ;;  %3707 = vmatmul.bf16.gmra.mxu1 %v6618_v26  ;;  %v7370_v26 = vld [vmem:[#allocation2 + $0x22c] sm:$0xf0]  ;;  %v2066_v39 = vsel %vm8339_vm8, %v2064_v21, %v2065_v37  ;;  %v576_v10 = vsel %vm8352_vm11, %v571_v1, %v575_v33  ;;  %v364_v1 = vld [vmem:[%s7763_s30 + $0x54] sm:$0xf]  ;;  %v8867_v16 = vld [vmem:[%s7763_s30 + $0x58] sm:$0xf] }
 0x125   : > { %2172 = vst [vmem:[#allocation2 + $0x29c] sm:$0xf] %v2066_v39  ;;  %v6318_v38 = vor.u32 %v7370_v26, %v6317_v11  ;;  %v6626_v21 = vor.u32 %v7290_v57, %v6623_v31  ;;  %v586_v47 = vsel %vm8352_vm11, %v581_v0, %v8829_v63  ;;  %v8842_v14 = vld [vmem:[%s7763_s30 + $0x50] sm:$0xf]  ;;  %v6630_v58 = vor.u32 %v7292_v25, %v6629_v12 }
 0x126   : > { %10341 = vst [vmem:[#allocation9_spill] sm:$0xff] %v8805_v60  ;;  %v10343_v39 = vrot.slane %v8792_v29, 5  ;;  %v10312_v33 = vrot.slane %v8842_v14, 5  ;;  %v597_v0 = vshrl.u32 %v364_v1, 16 }
 0x127   : > { %v2831_v61 = vpop.f32.mrf.mxu2  ;;  %326 = vst [vmem:[#allocation2 + $0x2ac] sm:$0xf] %v290_v3  ;;  %v593_v3 = vshll.u32 %v364_v1, 16  ;;  %v6635_v1 = vld [vmem:[#allocation2 + $0x264] sm:$0xf0] }
 0x128   : > { %3509 = vmatmul.bf16.gmra.mxu3 %v6610_v41  ;;  %v2788_v7 = vpop.f32.mrf.mxu0  ;;  %v10311_v41 = vrot.slane %v8815_v15, 6  ;;  %801 = vst [vmem:[#allocation2 + $0x28c] sm:$0xf] %v576_v10  ;;  %v589_v10 = vrot.slane %v587_v53, 4 }
 0x129   : > { %v2887_v52 = vpop.f32.mrf.mxu1  ;;  %802 = vst [vmem:[#allocation2 + $0x2b0] sm:$0xf] %v586_v47 }
 0x12a   : > { %v8818_v28 = vadd.f32 %v2887_v52, %v2788_v7  ;;  %v2069_v27 = vsel %vm8339_vm8, %v2067_v59, %v10311_v41  ;;  %v6621_v52 = vld [vmem:[#allocation2 + $0x1f8] sm:$0xf] }
 0x12b   : > { %v2930_v36 = vpop.f32.mrf.mxu3  ;;  %2173 = vst [vmem:[#allocation2 + $0x2c0] sm:$0xf] %v2069_v27  ;;  %v951_v27 = vrot.slane %v10343_v39, 4 }
 0x12c   : > { %v8822_v34 = vadd.f32 %v2930_v36, %v2831_v61  ;;  %v838_v61 = vld [vmem:[%s7763_s30 + $0x4c] sm:$0xf]  ;;  %v7291_v36 = vld [vmem:[#allocation2 + $0x218] sm:$0xf0] }
 0x12d   : > { %v952_v37 = vrot.slane %v838_v61, 5  ;;  %v6622_v25 = vor.u32 %v7291_v36, %v6621_v52  ;;  %v599_v52 = vrot.slane %v597_v0, 4  ;;  %v1953_v36 = vld [vmem:[%s7763_s30 + $0x5c] sm:$0xf] }
 0x12e   : > { %10342 = vst [vmem:[#allocation10_spill] sm:$0xff] %v8822_v34  ;;  %v7297_v42 = vld [vmem:[#allocation2 + $0x2a8] sm:$0xf0] }
 0x12f   : > { %v2833_v7 = vpop.f32.mrf.mxu2  ;;  %v954_v41 = vrot.slane %v952_v37, 4  ;;  %v953_v31 = vsel %vm7765_vm2, %v951_v27, %v952_v37  ;;  %v595_v37 = vrot.slane %v593_v3, 5  ;;  %v603_v27 = vshll.u32 %v8867_v16, 16 }
 0x130   : > { %v2791_v59 = vpop.f32.mrf.mxu0  ;;  %1059 = vst [vmem:[#allocation2 + $0x290] sm:$0xf] %v953_v31  ;;  %v6329_v31 = vld [vmem:[#allocation2 + $0x254] sm:$0xf] }
 0x131   : > { %v2890_v11 = vpop.f32.mrf.mxu1  ;;  %v956_v12 = vsel %vm7765_vm2, %v954_v41, %v10312_v33  ;;  %v7482_v41 = vld [vmem:[%s10308_s4 + $0x198] sm:$0xff]  ;;  %v600_v39 = vor.u32 %v599_v52, %v595_v37  ;;  %v8884_v33 = vrot.slane %v603_v27, 5 }
 0x132   : > { %v8847_v57 = vadd.f32 %v2890_v11, %v2791_v59  ;;  %1060 = vst [vmem:[#allocation2 + $0x2b4] sm:$0xf] %v956_v12  ;;  %5317 = vmatpush.bf16.msra.mxu2 %v7482_v41  ;;  %v8871_v59 = vld [vmem:[%s7763_s30 + $0x60] sm:$0xf]  ;;  %v7373_v12 = vld [vmem:[#allocation2 + $0x274] sm:$0xf0] }
 0x133   : > { %v2932_v26 = vpop.f32.mrf.mxu3  ;;  %3613 = vmatmul.bf16.gmra.mxu0 %v6626_v21  ;;  %v590_v21 = vor.u32 %v589_v10, %v8829_v63  ;;  %v10345_v63 = vrot.slane %v8815_v15, 6  ;;  %v10313_v3 = vrot.slane %v8871_v59, 6  ;;  %v6641_v10 = vld [vmem:[#allocation2 + $0x248] sm:$0xf]  ;;  %v601_v52 = vrot.slane %v600_v39, 4 }
 0x134   : > { %v8855_v29 = vadd.f32 %v2932_v26, %v2833_v7  ;;  %2983 = vmatmul.bf16.gmra.mxu2 %v6318_v38  ;;  %3712 = vmatmul.bf16.gmra.mxu1 %v6630_v58  ;;  %v7490_v7 = vld [vmem:[%s10308_s4 + $0x1d8] sm:$0xff]  ;;  %v2071_v58 = vrot.slane %v1953_v36, 6  ;;  %v7295_v36 = vld [vmem:[#allocation2 + $0x268] sm:$0xf0] }
 0x135   : > { %5416 = vmatpush.bf16.msra.mxu3 %v7490_v7  ;;  %v2070_v53 = vrot.slane %v10345_v63, 4  ;;  %v591_v7 = vrot.slane %v590_v21, 4  ;;  %v7294_v21 = vld [vmem:[#allocation2 + $0x260] sm:$0xf0]  ;;  %v6642_v34 = vor.u32 %v7295_v36, %v6641_v10  ;;  %v607_v36 = vshrl.u32 %v8867_v16, 16 }
 0x136   : > { %10344 = vst [vmem:[#allocation11_spill] sm:$0xff] %v8855_v29  ;;  %v2073_v41 = vrot.slane %v2071_v58, 4  ;;  %v7498_v29 = vld [vmem:[%s10308_s4 + $0x218] sm:$0xff] }
 0x137   : > { %v2836_v61 = vpop.f32.mrf.mxu2  ;;  %v596_v39 = vsel %vm8352_vm11, %v591_v7, %v595_v37  ;;  %5515 = vmatpush.bf16.msra.mxu0 %v7498_v29  ;;  %v366_v29 = vld [vmem:[%s7763_s30 + $0x5c] sm:$0xf] }
 0x138   : > { %3514 = vmatmul.bf16.gmra.mxu3 %v6622_v25  ;;  %v2793_v38 = vpop.f32.mrf.mxu0  ;;  %v7293_v25 = vld [vmem:[#allocation2 + $0x244] sm:$0xf]  ;;  %v2075_v15 = vsel %vm8339_vm8, %v2073_v41, %v10313_v3  ;;  %v606_v41 = vsel %vm8352_vm11, %v601_v52, %v8884_v33  ;;  %803 = vst [vmem:[#allocation2 + $0x2d4] sm:$0xf] %v596_v39  ;;  %v609_v39 = vrot.slane %v607_v36, 4 }
 0x139   : > { %v2892_v47 = vpop.f32.mrf.mxu1  ;;  %2175 = vst [vmem:[#allocation2 + $0x308] sm:$0xf] %v2075_v15  ;;  %v6638_v27 = vor.u32 %v7293_v25, %v6635_v1  ;;  %v10347_v15 = vrot.slane %v8842_v14, 5 }
 0x13a   : > { %v8874_v26 = vadd.f32 %v2892_v47, %v2793_v38  ;;  %v2072_v38 = vsel %vm8339_vm8, %v2070_v53, %v2071_v58  ;;  %v291_v47 = vld [vmem:[%s7763_s30 + $0x50] sm:$0xf]  ;;  %v6330_v53 = vor.u32 %v7373_v12, %v6329_v31  ;;  %804 = vst [vmem:[#allocation2 + $0x2f8] sm:$0xf] %v606_v41  ;;  %v1955_v41 = vld [vmem:[%s7763_s30 + $0x64] sm:$0xf] }
 0x13b   : > { %v2935_v11 = vpop.f32.mrf.mxu3  ;;  %2174 = vst [vmem:[#allocation2 + $0x2e4] sm:$0xf] %v2072_v38  ;;  %v8901_v38 = vld [vmem:[%s7763_s30 + $0x58] sm:$0xf]  ;;  %v957_v37 = vrot.slane %v10347_v15, 4 }
 0x13c   : > { %v8879_v0 = vadd.f32 %v2935_v11, %v2836_v61  ;;  %v292_v61 = vld [vmem:[%s7763_s30 + $0x54] sm:$0xf]  ;;  %327 = vst [vmem:[#allocation2 + $0x2d0] sm:$0xf] %v291_v47  ;;  %v10314_v12 = vrot.slane %v8901_v38, 5  ;;  %v613_v47 = vshll.u32 %v366_v29, 16 }
 0x13d   : > { %v840_v11 = vld [vmem:[%s7763_s30 + $0x54] sm:$0xf]  ;;  %328 = vst [vmem:[#allocation2 + $0x2f4] sm:$0xf] %v292_v61  ;;  %v617_v61 = vshrl.u32 %v366_v29, 16  ;;  %v10349_v29 = vrot.slane %v8871_v59, 6 }
 0x13e   : > { %10346 = vst [vmem:[#allocation12_spill] sm:$0xff] %v8879_v0  ;;  %v6633_v0 = vld [vmem:[#allocation2 + $0x240] sm:$0xf]  ;;  %v958_v58 = vrot.slane %v840_v11, 5 }
 0x13f   : > { %v2838_v63 = vpop.f32.mrf.mxu2  ;;  %v6634_v14 = vor.u32 %v7294_v21, %v6633_v0  ;;  %v619_v0 = vrot.slane %v617_v61, 4  ;;  %v8922_v15 = vld [vmem:[%s7763_s30 + $0x60] sm:$0xf]  ;;  %v2076_v36 = vrot.slane %v10349_v29, 4  ;;  %v293_v29 = vld [vmem:[%s7763_s30 + $0x58] sm:$0xf] }
 0x140   : > { %v3579_v3 = vpop.f32.mrf.mxu0  ;;  %v960_v31 = vrot.slane %v958_v58, 4  ;;  %v959_v7 = vsel %vm7765_vm2, %v957_v37, %v958_v58  ;;  %v615_v58 = vrot.slane %v613_v47, 5  ;;  %v6341_v37 = vld [vmem:[#allocation2 + $0x29c] sm:$0xf]  ;;  %329 = vst [vmem:[#allocation2 + $0x318] sm:$0xf] %v293_v29 }
 0x141   : > { %v3678_v25 = vpop.f32.mrf.mxu1  ;;  %1061 = vst [vmem:[#allocation2 + $0x2d8] sm:$0xf] %v959_v7 }
 0x142   : > { %v962_v10 = vsel %vm7765_vm2, %v960_v31, %v10314_v12  ;;  %v7376_v31 = vld [vmem:[#allocation2 + $0x2bc] sm:$0xf0]  ;;  %v620_v7 = vor.u32 %v619_v0, %v615_v58  ;;  %v6653_v0 = vld [vmem:[#allocation2 + $0x290] sm:$0xf]  ;;  %v7298_v12 = vld [vmem:[#allocation2 + $0x2b0] sm:$0xf0] }
 0x143   : > { %v2937_v1 = vpop.f32.mrf.mxu3  ;;  %3618 = vmatmul.bf16.gmra.mxu0 %v6638_v27  ;;  %1062 = vst [vmem:[#allocation2 + $0x2fc] sm:$0xf] %v962_v10  ;;  %v2077_v27 = vrot.slane %v1955_v41, 6 }
 0x144   : > { %v8912_v52 = vadd.f32 %v2937_v1, %v2838_v63  ;;  %2988 = vmatmul.bf16.gmra.mxu2 %v6330_v53  ;;  %3717 = vmatmul.bf16.gmra.mxu1 %v6642_v34  ;;  %v7524_v53 = vld [vmem:[%s8421_s16 + $0x18] sm:$0xff]  ;;  %v610_v34 = vor.u32 %v609_v39, %v8884_v33  ;;  %v8928_v1 = vld [vmem:[%s7763_s30 + $0x68] sm:$0xf] }
 0x145   : > { %5858 = vmatpush.bf16.msra.mxu1 %v7524_v53  ;;  %v2079_v47 = vrot.slane %v2077_v27, 4  ;;  %v2080_v33 = vrot.slane %v8928_v1, 6  ;;  %v621_v53 = vrot.slane %v620_v7, 4  ;;  %v6342_v7 = vor.u32 %v7376_v31, %v6341_v37 }
 0x146   : > { %10348 = vst [vmem:[#allocation13_spill] sm:$0xff] %v8912_v52  ;;  %v611_v39 = vrot.slane %v610_v34, 4  ;;  %v2078_v52 = vsel %vm8339_vm8, %v2076_v36, %v2077_v27  ;;  %v6654_v31 = vor.u32 %v7298_v12, %v6653_v0 }
 0x147   : > { %v2949_v11 = vpop.f32.mrf.mxu2  ;;  %v2081_v59 = vsel %vm8339_vm8, %v2079_v47, %v2080_v33  ;;  %2176 = vst [vmem:[#allocation2 + $0x32c] sm:$0xf] %v2078_v52  ;;  %v8954_v52 = vld [vmem:[%s7763_s30 + $0x60] sm:$0xf] }
 0x148   : > { %3519 = vmatmul.bf16.gmra.mxu3 %v6634_v14  ;;  %v2950_v63 = vadd.f32 %v2949_v11, %v8426_v20  ;;  %v8919_v21 = vpop.f32.mrf.mxu0  ;;  %v623_v20 = vshll.u32 %v8922_v15, 16  ;;  %v7296_v14 = vld [vmem:[#allocation2 + $0x28c] sm:$0xf]  ;;  %v6647_v11 = vld [vmem:[#allocation2 + $0x2ac] sm:$0xf0]  ;;  %v616_v43 = vsel %vm8352_vm11, %v611_v39, %v615_v58  ;;  %v10350_v58 = vrot.slane %v8901_v38, 5 }
 0x149   : > { %v8925_v16 = vpop.f32.mrf.mxu1  ;;  %2177 = vst [vmem:[#allocation2 + $0x350] sm:$0xf] %v2081_v59  ;;  %v6650_v47 = vor.u32 %v7296_v14, %v6647_v11 }
 0x14a   : > { %v8934_v41 = vrot.slane %v623_v20, 5  ;;  %v6645_v20 = vld [vmem:[#allocation2 + $0x288] sm:$0xf]  ;;  %805 = vst [vmem:[#allocation2 + $0x31c] sm:$0xf] %v616_v43  ;;  %v627_v43 = vshrl.u32 %v8922_v15, 16 }
 0x14b   : > { %v3480_v10 = vpop.f32.mrf.mxu3  ;;  %v6646_v38 = vor.u32 %v7297_v42, %v6645_v20 }
 0x14c   : > { %v3481_v61 = vadd.f32 %v3480_v10, %v2950_v63  ;;  %v294_v63 = vld [vmem:[%s7763_s30 + $0x5c] sm:$0xf] }
 0x14d   : > { %v842_v10 = vld [vmem:[%s7763_s30 + $0x5c] sm:$0xf]  ;;  %330 = vst [vmem:[#allocation2 + $0x33c] sm:$0xf] %v294_v63  ;;  %v629_v63 = vrot.slane %v627_v43, 4 }
 0x14e   : > { %v3580_v60 = vadd.f32 %v3579_v3, %v3481_v61  ;;  %v964_v54 = vrot.slane %v842_v10, 5  ;;  %v626_v3 = vsel %vm8352_vm11, %v621_v53, %v8934_v41  ;;  %v963_v61 = vrot.slane %v10350_v58, 4  ;;  %v368_v53 = vld [vmem:[%s7763_s30 + $0x64] sm:$0xf]  ;;  %v7379_v58 = vld [vmem:[#allocation2 + $0x304] sm:$0xf0] }
 0x14f   : > { %v2951_v34 = vpop.f32.mrf.mxu2  ;;  %806 = vst [vmem:[#allocation2 + $0x340] sm:$0xf] %v626_v3  ;;  %v633_v0 = vshll.u32 %v368_v53, 16  ;;  %v637_v59 = vshrl.u32 %v368_v53, 16 }
 0x150   : > { %v8947_v27 = vadd.f32 %v3678_v25, %v3580_v60  ;;  %v2952_v36 = vadd.f32 %v2951_v34, %v8446_v32  ;;  %v3584_v37 = vpop.f32.mrf.mxu0  ;;  %v966_v60 = vrot.slane %v964_v54, 4  ;;  %v10315_v25 = vrot.slane %v8954_v52, 5  ;;  %v1957_v34 = vld [vmem:[%s7763_s30 + $0x6c] sm:$0xf] }
 0x151   : > { %v3683_v32 = vpop.f32.mrf.mxu1  ;;  %v965_v11 = vsel %vm7765_vm2, %v963_v61, %v964_v54  ;;  %v635_v20 = vrot.slane %v633_v0, 5  ;;  %v2083_v15 = vrot.slane %v1957_v34, 6  ;;  %v8982_v61 = vld [vmem:[%s7763_s30 + $0x70] sm:$0xf]  ;;  %v844_v34 = vld [vmem:[%s7763_s30 + $0x64] sm:$0xf] }
 0x152   : > { %v968_v12 = vsel %vm7765_vm2, %v966_v60, %v10315_v25  ;;  %1063 = vst [vmem:[#allocation2 + $0x320] sm:$0xf] %v965_v11  ;;  %v7299_v60 = vld [vmem:[#allocation2 + $0x2d4] sm:$0xf] }
 0x153   : > { %v3482_v14 = vpop.f32.mrf.mxu3  ;;  %3623 = vmatmul.bf16.gmra.mxu0 %v6650_v47  ;;  %1064 = vst [vmem:[#allocation2 + $0x344] sm:$0xf] %v968_v12  ;;  %v630_v47 = vor.u32 %v629_v63, %v8934_v41  ;;  %v2085_v11 = vrot.slane %v2083_v15, 4  ;;  %v10316_v41 = vrot.slane %v8982_v61, 6 }
 0x154   : > { %v3483_v39 = vadd.f32 %v3482_v14, %v2952_v36  ;;  %2993 = vmatmul.bf16.gmra.mxu2 %v6342_v7  ;;  %3722 = vmatmul.bf16.gmra.mxu1 %v6654_v31  ;;  %v8974_v7 = vld [vmem:[%s7763_s30 + $0x68] sm:$0xf]  ;;  %v6353_v31 = vld [vmem:[#allocation2 + $0x2e4] sm:$0xf]  ;;  %v2082_v14 = vrot.slane %v2080_v33, 4 }
 0x155   : > { %v631_v53 = vrot.slane %v630_v47, 4  ;;  %v2087_v1 = vsel %vm8339_vm8, %v2085_v11, %v10316_v41  ;;  %v295_v33 = vld [vmem:[%s7763_s30 + $0x60] sm:$0xf] }
 0x156   : > { %v3582_v54 = vadd.f32 %v8919_v21, %v3483_v39  ;;  %v639_v21 = vrot.slane %v637_v59, 4  ;;  %v6659_v39 = vld [vmem:[#allocation2 + $0x2f4] sm:$0xf0]  ;;  %v2084_v59 = vsel %vm8339_vm8, %v2082_v14, %v2083_v15  ;;  %2179 = vst [vmem:[#allocation2 + $0x398] sm:$0xf] %v2087_v1  ;;  %v970_v14 = vrot.slane %v844_v34, 5 }
 0x157   : > { %v2954_v29 = vpop.f32.mrf.mxu2  ;;  %2178 = vst [vmem:[#allocation2 + $0x374] sm:$0xf] %v2084_v59  ;;  %v636_v15 = vsel %vm8352_vm11, %v631_v53, %v635_v20  ;;  %v6662_v41 = vor.u32 %v7299_v60, %v6659_v39 }
 0x158   : > { %v8969_v10 = vadd.f32 %v8925_v16, %v3582_v54  ;;  %3524 = vmatmul.bf16.gmra.mxu3 %v6646_v38  ;;  %v2955_v42 = vadd.f32 %v2954_v29, %v8473_v19  ;;  %v8976_v36 = vpop.f32.mrf.mxu0  ;;  %v643_v16 = vshll.u32 %v8974_v7, 16  ;;  %v6665_v38 = vld [vmem:[#allocation2 + $0x2d8] sm:$0xf]  ;;  %v640_v43 = vor.u32 %v639_v21, %v635_v20  ;;  %v7301_v54 = vld [vmem:[#allocation2 + $0x2f8] sm:$0xf0] }
 0x159   : > { %v8979_v3 = vpop.f32.mrf.mxu1  ;;  %v296_v29 = vld [vmem:[%s7763_s30 + $0x64] sm:$0xf]  ;;  %v6354_v21 = vor.u32 %v7379_v58, %v6353_v31  ;;  %v7489_v31 = vld [vmem:[%s10308_s4 + $0x1d0] sm:$0xff]  ;;  %331 = vst [vmem:[#allocation2 + $0x360] sm:$0xf] %v295_v33  ;;  %v972_v39 = vrot.slane %v970_v14, 4 }
 0x15a   : > { %v8988_v0 = vrot.slane %v643_v16, 5  ;;  %v6657_v16 = vld [vmem:[#allocation2 + $0x2d0] sm:$0xf]  ;;  %v9014_v20 = vld [vmem:[%s7763_s30 + $0x68] sm:$0xf]  ;;  %5417 = vmatpush.bf16.msra.mxu3 %v7489_v31 }
 0x15b   : > { %v3485_v19 = vpop.f32.mrf.mxu3  ;;  %332 = vst [vmem:[#allocation2 + $0x384] sm:$0xf] %v296_v29  ;;  %v973_v53 = vrot.slane %v9014_v20, 5  ;;  %v370_v33 = vld [vmem:[%s7763_s30 + $0x6c] sm:$0xf]  ;;  %v647_v29 = vshrl.u32 %v8974_v7, 16 }
 0x15c   : > { %v3486_v12 = vadd.f32 %v3485_v19, %v2955_v42  ;;  %v641_v42 = vrot.slane %v640_v43, 4  ;;  %v7300_v19 = vld [vmem:[#allocation2 + $0x2f0] sm:$0xf0]  ;;  %807 = vst [vmem:[#allocation2 + $0x364] sm:$0xf] %v636_v15  ;;  %v657_v34 = vshrl.u32 %v370_v33, 16 }
 0x15d   : > { %v649_v15 = vrot.slane %v647_v29, 4  ;;  %v7497_v7 = vld [vmem:[%s10308_s4 + $0x210] sm:$0xff]  ;;  %v6671_v29 = vld [vmem:[#allocation2 + $0x33c] sm:$0xf0] }
 0x15e   : > { %v3585_v63 = vadd.f32 %v3584_v37, %v3486_v12  ;;  %v7481_v37 = vld [vmem:[%s10308_s4 + $0x190] sm:$0xff]  ;;  %v646_v58 = vsel %vm8352_vm11, %v641_v42, %v8988_v0  ;;  %v6666_v12 = vor.u32 %v7301_v54, %v6665_v38  ;;  %v6658_v54 = vor.u32 %v7300_v19, %v6657_v16  ;;  %5516 = vmatpush.bf16.msra.mxu0 %v7497_v7 }
 0x15f   : > { %v2956_v47 = vpop.f32.mrf.mxu2  ;;  %5318 = vmatpush.bf16.msra.mxu2 %v7481_v37  ;;  %808 = vst [vmem:[#allocation2 + $0x388] sm:$0xf] %v646_v58  ;;  %v7523_v16 = vld [vmem:[%s8421_s16 + $0x10] sm:$0xff]  ;;  %v659_v19 = vrot.slane %v657_v34, 4  ;;  %v650_v31 = vor.u32 %v649_v15, %v8988_v0  ;;  %v7304_v15 = vld [vmem:[#allocation2 + $0x340] sm:$0xf0] }
 0x160   : > { %v9001_v25 = vadd.f32 %v3683_v32, %v3585_v63  ;;  %v2957_v11 = vadd.f32 %v2956_v47, %v8492_v22  ;;  %v3589_v32 = vpop.f32.mrf.mxu0  ;;  %v10351_v22 = vrot.slane %v8954_v52, 5  ;;  %v974_v52 = vsel %vm7765_vm2, %v972_v39, %v973_v53  ;;  %v9042_v37 = vld [vmem:[%s7763_s30 + $0x70] sm:$0xf]  ;;  %5859 = vmatpush.bf16.msra.mxu1 %v7523_v16  ;;  %v297_v16 = vld [vmem:[%s7763_s30 + $0x68] sm:$0xf] }
 0x161   : > { %v9019_v43 = vpop.f32.mrf.mxu1  ;;  %1066 = vst [vmem:[#allocation2 + $0x38c] sm:$0xf] %v974_v52  ;;  %v653_v63 = vshll.u32 %v370_v33, 16  ;;  %v663_v39 = vshll.u32 %v9042_v37, 16  ;;  %v10352_v52 = vrot.slane %v8982_v61, 6 }
 0x162   : > { %v969_v60 = vrot.slane %v10351_v22, 4  ;;  %333 = vst [vmem:[#allocation2 + $0x3a8] sm:$0xf] %v297_v16 }
 0x163   : > { %v3487_v59 = vpop.f32.mrf.mxu3  ;;  %3628 = vmatmul.bf16.gmra.mxu0 %v6662_v41  ;;  %v9054_v34 = vrot.slane %v663_v39, 5  ;;  %v6669_v39 = vld [vmem:[#allocation2 + $0x318] sm:$0xf] }
 0x164   : > { %v971_v1 = vsel %vm7765_vm2, %v969_v60, %v970_v14  ;;  %v3488_v38 = vadd.f32 %v3487_v59, %v2957_v11  ;;  %2998 = vmatmul.bf16.gmra.mxu2 %v6354_v21  ;;  %3727 = vmatmul.bf16.gmra.mxu1 %v6666_v12  ;;  %v655_v14 = vrot.slane %v653_v63, 5  ;;  %v7382_v12 = vld [vmem:[#allocation2 + $0x34c] sm:$0xf0] }
 0x165   : > { %1065 = vst [vmem:[#allocation2 + $0x368] sm:$0xf] %v971_v1  ;;  %v7302_v1 = vld [vmem:[#allocation2 + $0x31c] sm:$0xf] }
 0x166   : > { %v3587_v42 = vadd.f32 %v8976_v36, %v3488_v38  ;;  %v1959_v36 = vld [vmem:[%s7763_s30 + $0x74] sm:$0xf]  ;;  %v660_v60 = vor.u32 %v659_v19, %v655_v14  ;;  %v2088_v38 = vrot.slane %v10352_v52, 4 }
 0x167   : > { %v2959_v47 = vpop.f32.mrf.mxu2  ;;  %v2089_v22 = vrot.slane %v1959_v36, 6  ;;  %v846_v36 = vld [vmem:[%s7763_s30 + $0x6c] sm:$0xf] }
 0x168   : > { %v9031_v21 = vadd.f32 %v8979_v3, %v3587_v42  ;;  %3529 = vmatmul.bf16.gmra.mxu3 %v6658_v54  ;;  %v2960_v41 = vadd.f32 %v2959_v47, %v8523_v9  ;;  %v9038_v11 = vpop.f32.mrf.mxu0  ;;  %v6365_v3 = vld [vmem:[#allocation2 + $0x32c] sm:$0xf]  ;;  %v9048_v9 = vld [vmem:[%s7763_s30 + $0x78] sm:$0xf]  ;;  %v651_v54 = vrot.slane %v650_v31, 4  ;;  %v661_v42 = vrot.slane %v660_v60, 4 }
 0x169   : > { %v9045_v58 = vpop.f32.mrf.mxu1  ;;  %v2092_v0 = vrot.slane %v9048_v9, 6  ;;  %v2091_v63 = vrot.slane %v2089_v22, 4  ;;  %v6677_v47 = vld [vmem:[#allocation2 + $0x320] sm:$0xf]  ;;  %v2090_v7 = vsel %vm8339_vm8, %v2088_v38, %v2089_v22  ;;  %v6366_v60 = vor.u32 %v7382_v12, %v6365_v3  ;;  %v7303_v38 = vld [vmem:[#allocation2 + $0x338] sm:$0xf0] }
 0x16a   : > { %2180 = vst [vmem:[#allocation2 + $0x3bc] sm:$0xf] %v2090_v7  ;;  %v976_v52 = vrot.slane %v846_v36, 5  ;;  %v9075_v7 = vld [vmem:[%s7763_s30 + $0x70] sm:$0xf]  ;;  %v6678_v12 = vor.u32 %v7304_v15, %v6677_v47  ;;  %v6670_v20 = vor.u32 %v7303_v38, %v6669_v39  ;;  %v667_v15 = vshrl.u32 %v9042_v37, 16 }
 0x16b   : > { %v3490_v59 = vpop.f32.mrf.mxu3  ;;  %v2093_v61 = vsel %vm8339_vm8, %v2091_v63, %v2092_v0  ;;  %v666_v63 = vsel %vm8352_vm11, %v661_v42, %v9054_v34  ;;  %v1961_v39 = vld [vmem:[%s7763_s30 + $0x7c] sm:$0xf] }
 0x16c   : > { %v3491_v33 = vadd.f32 %v3490_v59, %v2960_v41  ;;  %v298_v41 = vld [vmem:[%s7763_s30 + $0x6c] sm:$0xf]  ;;  %2181 = vst [vmem:[#allocation2 + $0x3e0] sm:$0xf] %v2093_v61  ;;  %v656_v59 = vsel %vm8352_vm11, %v651_v54, %v655_v14  ;;  %v975_v14 = vrot.slane %v973_v53, 4  ;;  %v10317_v54 = vrot.slane %v9075_v7, 5 }
 0x16d   : > { %334 = vst [vmem:[#allocation2 + $0x3cc] sm:$0xf] %v298_v41  ;;  %v372_v53 = vld [vmem:[%s7763_s30 + $0x74] sm:$0xf]  ;;  %v669_v36 = vrot.slane %v667_v15, 4  ;;  %v2095_v37 = vrot.slane %v1961_v39, 6 }
 0x16e   : > { %v3590_v19 = vadd.f32 %v3589_v32, %v3491_v33  ;;  %v6674_v33 = vor.u32 %v7302_v1, %v6671_v29  ;;  %809 = vst [vmem:[#allocation2 + $0x3ac] sm:$0xf] %v656_v59  ;;  %v977_v29 = vsel %vm7765_vm2, %v975_v14, %v976_v52  ;;  %v673_v16 = vshll.u32 %v372_v53, 16  ;;  %v9095_v59 = vld [vmem:[%s7763_s30 + $0x78] sm:$0xf] }
 0x16f   : > { %v2961_v31 = vpop.f32.mrf.mxu2  ;;  %810 = vst [vmem:[#allocation2 + $0x3d0] sm:$0xf] %v666_v63  ;;  %v677_v61 = vshrl.u32 %v372_v53, 16  ;;  %v670_v38 = vor.u32 %v669_v36, %v9054_v34  ;;  %v6377_v63 = vld [vmem:[#allocation2 + $0x374] sm:$0xf] }
 0x170   : > { %v9068_v22 = vadd.f32 %v9019_v43, %v3590_v19  ;;  %v2962_v32 = vadd.f32 %v2961_v31, %v8548_v45  ;;  %v3594_v3 = vpop.f32.mrf.mxu0  ;;  %v978_v43 = vrot.slane %v976_v52, 4  ;;  %1067 = vst [vmem:[#allocation2 + $0x3b0] sm:$0xf] %v977_v29  ;;  %v675_v52 = vrot.slane %v673_v16, 5  ;;  %v9103_v14 = vld [vmem:[%s7763_s30 + $0x80] sm:$0xf] }
 0x171   : > { %v3693_v45 = vpop.f32.mrf.mxu1  ;;  %v2097_v29 = vrot.slane %v2095_v37, 4  ;;  %v10318_v34 = vrot.slane %v9103_v14, 6  ;;  %v671_v53 = vrot.slane %v670_v38, 4  ;;  %v848_v39 = vld [vmem:[%s7763_s30 + $0x74] sm:$0xf] }
 0x172   : > { %v980_v42 = vsel %vm7765_vm2, %v978_v43, %v10317_v54  ;;  %v7305_v43 = vld [vmem:[#allocation2 + $0x364] sm:$0xf] }
 0x173   : > { %v3492_v1 = vpop.f32.mrf.mxu3  ;;  %3633 = vmatmul.bf16.gmra.mxu0 %v6674_v33  ;;  %1068 = vst [vmem:[#allocation2 + $0x3d4] sm:$0xf] %v980_v42  ;;  %v2099_v9 = vsel %vm8339_vm8, %v2097_v29, %v10318_v34 }
 0x174   : > { %v3493_v47 = vadd.f32 %v3492_v1, %v2962_v32  ;;  %3003 = vmatmul.bf16.gmra.mxu2 %v6366_v60  ;;  %3732 = vmatmul.bf16.gmra.mxu1 %v6678_v12  ;;  %v7385_v12 = vld [vmem:[#allocation2 + $0x394] sm:$0xf0]  ;;  %v2094_v1 = vrot.slane %v2092_v0, 4  ;;  %v299_v0 = vld [vmem:[%s7763_s30 + $0x70] sm:$0xf] }
 0x175   : > { %2183 = vst [vmem:[#allocation2 + $0x428] sm:$0xf] %v2099_v9 }
 0x176   : > { %v3592_v19 = vadd.f32 %v9038_v11, %v3493_v47  ;;  %v679_v11 = vrot.slane %v677_v61, 4  ;;  %v6683_v47 = vld [vmem:[#allocation2 + $0x384] sm:$0xf0]  ;;  %v2096_v61 = vsel %vm8339_vm8, %v2094_v1, %v2095_v37  ;;  %v676_v37 = vsel %vm8352_vm11, %v671_v53, %v675_v52  ;;  %335 = vst [vmem:[#allocation2 + $0x3f0] sm:$0xf] %v299_v0 }
 0x177   : > { %v2964_v41 = vpop.f32.mrf.mxu2  ;;  %2182 = vst [vmem:[#allocation2 + $0x404] sm:$0xf] %v2096_v61  ;;  %v982_v1 = vrot.slane %v848_v39, 5  ;;  %v6686_v34 = vor.u32 %v7305_v43, %v6683_v47  ;;  %v374_v0 = vld [vmem:[%s7763_s30 + $0x7c] sm:$0xf] }
 0x178   : > { %v9090_v31 = vadd.f32 %v9045_v58, %v3592_v19  ;;  %3534 = vmatmul.bf16.gmra.mxu3 %v6670_v20  ;;  %v2965_v60 = vadd.f32 %v2964_v41, %v8577_v24  ;;  %v9097_v32 = vpop.f32.mrf.mxu0  ;;  %v683_v58 = vshll.u32 %v9095_v59, 16  ;;  %v6689_v20 = vld [vmem:[#allocation2 + $0x368] sm:$0xf]  ;;  %v680_v15 = vor.u32 %v679_v11, %v675_v52  ;;  %v7307_v19 = vld [vmem:[#allocation2 + $0x388] sm:$0xf0] }
 0x179   : > { %v9100_v33 = vpop.f32.mrf.mxu1  ;;  %v300_v41 = vld [vmem:[%s7763_s30 + $0x74] sm:$0xf]  ;;  %v6378_v11 = vor.u32 %v7385_v12, %v6377_v63  ;;  %v7488_v63 = vld [vmem:[%s10308_s4 + $0x1c8] sm:$0xff]  ;;  %v9135_v52 = vld [vmem:[%s7763_s30 + $0x78] sm:$0xf]  ;;  %v984_v47 = vrot.slane %v982_v1, 4 }
 0x17a   : > { %v9109_v16 = vrot.slane %v683_v58, 5  ;;  %v6681_v58 = vld [vmem:[#allocation2 + $0x360] sm:$0xf]  ;;  %336 = vst [vmem:[#allocation2 + $0x414] sm:$0xf] %v300_v41  ;;  %v985_v53 = vrot.slane %v9135_v52, 5  ;;  %5418 = vmatpush.bf16.msra.mxu3 %v7488_v63 }
 0x17b   : > { %v3495_v24 = vpop.f32.mrf.mxu3  ;;  %811 = vst [vmem:[#allocation2 + $0x3f4] sm:$0xf] %v676_v37  ;;  %v687_v41 = vshrl.u32 %v9095_v59, 16  ;;  %v697_v39 = vshrl.u32 %v374_v0, 16  ;;  %v7496_v59 = vld [vmem:[%s10308_s4 + $0x208] sm:$0xff] }
 0x17c   : > { %v3496_v42 = vadd.f32 %v3495_v24, %v2965_v60  ;;  %v681_v60 = vrot.slane %v680_v15, 4  ;;  %v7306_v24 = vld [vmem:[#allocation2 + $0x380] sm:$0xf0]  ;;  %5517 = vmatpush.bf16.msra.mxu0 %v7496_v59  ;;  %v301_v59 = vld [vmem:[%s7763_s30 + $0x78] sm:$0xf] }
 0x17d   : > { %v689_v37 = vrot.slane %v687_v41, 4  ;;  %337 = vst [vmem:[#allocation2 + $0x438] sm:$0xf] %v301_v59 }
 0x17e   : > { %v3595_v36 = vadd.f32 %v3594_v3, %v3496_v42  ;;  %v7480_v3 = vld [vmem:[%s10308_s4 + $0x188] sm:$0xff]  ;;  %v686_v12 = vsel %vm8352_vm11, %v681_v60, %v9109_v16  ;;  %v6690_v42 = vor.u32 %v7307_v19, %v6689_v20  ;;  %v6682_v19 = vor.u32 %v7306_v24, %v6681_v58  ;;  %v1963_v58 = vld [vmem:[%s7763_s30 + $0x84] sm:$0xf] }
 0x17f   : > { %v2966_v38 = vpop.f32.mrf.mxu2  ;;  %5319 = vmatpush.bf16.msra.mxu2 %v7480_v3  ;;  %812 = vst [vmem:[#allocation2 + $0x418] sm:$0xf] %v686_v12  ;;  %v699_v24 = vrot.slane %v697_v39, 4  ;;  %v9162_v3 = vld [vmem:[%s7763_s30 + $0x80] sm:$0xf]  ;;  %v690_v63 = vor.u32 %v689_v37, %v9109_v16 }
 0x180   : > { %v9122_v54 = vadd.f32 %v3693_v45, %v3595_v36  ;;  %v2967_v29 = vadd.f32 %v2966_v38, %v8598_v62  ;;  %v3599_v45 = vpop.f32.mrf.mxu0  ;;  %v10353_v62 = vrot.slane %v9075_v7, 5  ;;  %v986_v7 = vsel %vm7765_vm2, %v984_v47, %v985_v53  ;;  %v6701_v39 = vld [vmem:[#allocation2 + $0x3b0] sm:$0xf] }
 0x181   : > { %v9140_v15 = vpop.f32.mrf.mxu1  ;;  %1070 = vst [vmem:[#allocation2 + $0x41c] sm:$0xf] %v986_v7  ;;  %v693_v36 = vshll.u32 %v374_v0, 16  ;;  %v6695_v0 = vld [vmem:[#allocation2 + $0x3cc] sm:$0xf0]  ;;  %v691_v41 = vrot.slane %v690_v63, 4 }
 0x182   : > { %v981_v43 = vrot.slane %v10353_v62, 4  ;;  %v9168_v62 = vld [vmem:[%s7763_s30 + $0x88] sm:$0xf] }
 0x183   : > { %v3497_v61 = vpop.f32.mrf.mxu3  ;;  %3638 = vmatmul.bf16.gmra.mxu0 %v6686_v34  ;;  %v10319_v16 = vrot.slane %v9168_v62, 6 }
 0x184   : > { %v983_v9 = vsel %vm7765_vm2, %v981_v43, %v982_v1  ;;  %v3498_v20 = vadd.f32 %v3497_v61, %v2967_v29  ;;  %3008 = vmatmul.bf16.gmra.mxu2 %v6378_v11  ;;  %3737 = vmatmul.bf16.gmra.mxu1 %v6690_v42  ;;  %v695_v1 = vrot.slane %v693_v36, 5  ;;  %v7388_v42 = vld [vmem:[#allocation2 + $0x3dc] sm:$0xf0]  ;;  %v703_v43 = vshll.u32 %v9162_v3, 16  ;;  %v7308_v61 = vld [vmem:[#allocation2 + $0x3ac] sm:$0xf] }
 0x185   : > { %1069 = vst [vmem:[#allocation2 + $0x3f8] sm:$0xf] %v983_v9  ;;  %v10354_v9 = vrot.slane %v9103_v14, 6 }
 0x186   : > { %v3597_v60 = vadd.f32 %v9097_v32, %v3498_v20  ;;  %v2101_v32 = vrot.slane %v1963_v58, 6 }
 0x187   : > { %v2969_v38 = vpop.f32.mrf.mxu2  ;;  %v2100_v7 = vrot.slane %v10354_v9, 4 }
 0x188   : > { %v9152_v11 = vadd.f32 %v9100_v33, %v3597_v60  ;;  %3539 = vmatmul.bf16.gmra.mxu3 %v6682_v19  ;;  %v2970_v34 = vadd.f32 %v2969_v38, %v8633_v50  ;;  %v9159_v29 = vpop.f32.mrf.mxu0  ;;  %v6389_v33 = vld [vmem:[#allocation2 + $0x3bc] sm:$0xf]  ;;  %v700_v50 = vor.u32 %v699_v24, %v695_v1  ;;  %v2103_v20 = vrot.slane %v2101_v32, 4  ;;  %v7310_v38 = vld [vmem:[#allocation2 + $0x3d0] sm:$0xf0] }
 0x189   : > { %v9165_v12 = vpop.f32.mrf.mxu1  ;;  %v9174_v60 = vrot.slane %v703_v43, 5  ;;  %v2102_v37 = vsel %vm8339_vm8, %v2100_v7, %v2101_v32  ;;  %v850_v24 = vld [vmem:[%s7763_s30 + $0x7c] sm:$0xf]  ;;  %v6693_v43 = vld [vmem:[#allocation2 + $0x3a8] sm:$0xf]  ;;  %v696_v32 = vsel %vm8352_vm11, %v691_v41, %v695_v1  ;;  %v987_v1 = vrot.slane %v985_v53, 4 }
 0x18a   : > { %v701_v36 = vrot.slane %v700_v50, 4  ;;  %v2105_v14 = vsel %vm8339_vm8, %v2103_v20, %v10319_v16  ;;  %2184 = vst [vmem:[#allocation2 + $0x44c] sm:$0xf] %v2102_v37  ;;  %v6390_v50 = vor.u32 %v7388_v42, %v6389_v33  ;;  %v988_v9 = vrot.slane %v850_v24, 5  ;;  %v9196_v33 = vld [vmem:[%s7763_s30 + $0x80] sm:$0xf] }
 0x18b   : > { %v3500_v47 = vpop.f32.mrf.mxu3  ;;  %2185 = vst [vmem:[#allocation2 + $0x470] sm:$0xf] %v2105_v14  ;;  %v6698_v16 = vor.u32 %v7308_v61, %v6695_v0  ;;  %v6702_v37 = vor.u32 %v7310_v38, %v6701_v39  ;;  %v10320_v41 = vrot.slane %v9196_v33, 5  ;;  %v376_v53 = vld [vmem:[%s7763_s30 + $0x84] sm:$0xf]  ;;  %v707_v38 = vshrl.u32 %v9162_v3, 16 }
 0x18c   : > { %v3501_v19 = vadd.f32 %v3500_v47, %v2970_v34  ;;  %v302_v34 = vld [vmem:[%s7763_s30 + $0x7c] sm:$0xf]  ;;  %v7309_v47 = vld [vmem:[#allocation2 + $0x3c8] sm:$0xf0]  ;;  %813 = vst [vmem:[#allocation2 + $0x43c] sm:$0xf] %v696_v32  ;;  %v989_v0 = vsel %vm7765_vm2, %v987_v1, %v988_v9 }
 0x18d   : > { %338 = vst [vmem:[#allocation2 + $0x45c] sm:$0xf] %v302_v34  ;;  %v6694_v52 = vor.u32 %v7309_v47, %v6693_v43  ;;  %v713_v14 = vshll.u32 %v376_v53, 16  ;;  %v709_v24 = vrot.slane %v707_v38, 4  ;;  %v9216_v43 = vld [vmem:[%s7763_s30 + $0x88] sm:$0xf] }
 0x18e   : > { %v3600_v58 = vadd.f32 %v3599_v45, %v3501_v19  ;;  %v7522_v45 = vld [vmem:[%s8421_s16 + $0x8] sm:$0xff]  ;;  %v706_v19 = vsel %vm8352_vm11, %v701_v36, %v9174_v60  ;;  %1071 = vst [vmem:[#allocation2 + $0x440] sm:$0xf] %v989_v0  ;;  %v7311_v1 = vld [vmem:[#allocation2 + $0x3f4] sm:$0xf] }
 0x18f   : > { %v2971_v63 = vpop.f32.mrf.mxu2  ;;  %5860 = vmatpush.bf16.msra.mxu1 %v7522_v45  ;;  %814 = vst [vmem:[#allocation2 + $0x460] sm:$0xf] %v706_v19  ;;  %v715_v47 = vrot.slane %v713_v14, 5  ;;  %v6401_v45 = vld [vmem:[#allocation2 + $0x404] sm:$0xf] }
 0x190   : > { %v9188_v7 = vadd.f32 %v9140_v15, %v3600_v58  ;;  %v2972_v20 = vadd.f32 %v2971_v63, %v8657_v13  ;;  %v3604_v42 = vpop.f32.mrf.mxu0  ;;  %v990_v15 = vrot.slane %v988_v9, 4  ;;  %v717_v58 = vshrl.u32 %v376_v53, 16  ;;  %v7391_v19 = vld [vmem:[#allocation2 + $0x424] sm:$0xf0] }
 0x191   : > { %v3703_v13 = vpop.f32.mrf.mxu1  ;;  %v710_v9 = vor.u32 %v709_v24, %v9174_v60  ;;  %v304_v24 = vld [vmem:[%s7763_s30 + $0x84] sm:$0xf] }
 0x192   : > { %v992_v36 = vsel %vm7765_vm2, %v990_v15, %v10320_v41  ;;  %v10355_v15 = vrot.slane %v9168_v62, 6  ;;  %340 = vst [vmem:[#allocation2 + $0x4a4] sm:$0xf] %v304_v24 }
 0x193   : > { %v3502_v61 = vpop.f32.mrf.mxu3  ;;  %3643 = vmatmul.bf16.gmra.mxu0 %v6698_v16  ;;  %1072 = vst [vmem:[#allocation2 + $0x464] sm:$0xf] %v992_v36  ;;  %v1965_v16 = vld [vmem:[%s7763_s30 + $0x8c] sm:$0xf]  ;;  %v711_v53 = vrot.slane %v710_v9, 4 }
 0x194   : > { %v3503_v39 = vadd.f32 %v3502_v61, %v2972_v20  ;;  %3013 = vmatmul.bf16.gmra.mxu2 %v6390_v50  ;;  %3742 = vmatmul.bf16.gmra.mxu1 %v6702_v37  ;;  %v2107_v3 = vrot.slane %v1965_v16, 6  ;;  %v9224_v37 = vld [vmem:[%s7763_s30 + $0x90] sm:$0xf]  ;;  %v2106_v61 = vrot.slane %v10355_v15, 4 }
 0x195   : > { %v10321_v60 = vrot.slane %v9224_v37, 6  ;;  %v716_v15 = vsel %vm8352_vm11, %v711_v53, %v715_v47 }
 0x196   : > { %v3602_v59 = vadd.f32 %v9159_v29, %v3503_v39  ;;  %v719_v29 = vrot.slane %v717_v58, 4  ;;  %v2109_v0 = vrot.slane %v2107_v3, 4  ;;  %v6707_v39 = vld [vmem:[#allocation2 + $0x414] sm:$0xf0]  ;;  %v2108_v58 = vsel %vm8339_vm8, %v2106_v61, %v2107_v3  ;;  %815 = vst [vmem:[#allocation2 + $0x484] sm:$0xf] %v716_v15 }
 0x197   : > { %v2974_v34 = vpop.f32.mrf.mxu2  ;;  %2186 = vst [vmem:[#allocation2 + $0x494] sm:$0xf] %v2108_v58  ;;  %v378_v58 = vld [vmem:[%s7763_s30 + $0x8c] sm:$0xf]  ;;  %v1967_v15 = vld [vmem:[%s7763_s30 + $0x94] sm:$0xf] }
 0x198   : > { %v9211_v63 = vadd.f32 %v9165_v12, %v3602_v59  ;;  %3544 = vmatmul.bf16.gmra.mxu3 %v6694_v52  ;;  %v2975_v50 = vadd.f32 %v2974_v34, %v8687_v2  ;;  %v9218_v32 = vpop.f32.mrf.mxu0  ;;  %v723_v12 = vshll.u32 %v9216_v43, 16  ;;  %v6713_v52 = vld [vmem:[#allocation2 + $0x3f8] sm:$0xf]  ;;  %v720_v38 = vor.u32 %v719_v29, %v715_v47  ;;  %v7313_v59 = vld [vmem:[#allocation2 + $0x418] sm:$0xf0] }
 0x199   : > { %v9221_v20 = vpop.f32.mrf.mxu1  ;;  %v2111_v62 = vsel %vm8339_vm8, %v2109_v0, %v10321_v60  ;;  %v303_v34 = vld [vmem:[%s7763_s30 + $0x80] sm:$0xf]  ;;  %v6402_v29 = vor.u32 %v7391_v19, %v6401_v45  ;;  %v7312_v0 = vld [vmem:[#allocation2 + $0x410] sm:$0xf0]  ;;  %v6710_v60 = vor.u32 %v7311_v1, %v6707_v39  ;;  %v6714_v19 = vor.u32 %v7313_v59, %v6713_v52 }
 0x19a   : > { %v9230_v14 = vrot.slane %v723_v12, 5  ;;  %v6705_v12 = vld [vmem:[#allocation2 + $0x3f0] sm:$0xf]  ;;  %2187 = vst [vmem:[#allocation2 + $0x4b8] sm:$0xf] %v2111_v62  ;;  %v10356_v47 = vrot.slane %v9196_v33, 5 }
 0x19b   : > { %v3505_v2 = vpop.f32.mrf.mxu3  ;;  %339 = vst [vmem:[#allocation2 + $0x480] sm:$0xf] %v303_v34  ;;  %v6706_v33 = vor.u32 %v7312_v0, %v6705_v12  ;;  %v727_v62 = vshrl.u32 %v9216_v43, 16  ;;  %v733_v34 = vshll.u32 %v378_v58, 16  ;;  %v7479_v43 = vld [vmem:[%s10308_s4 + $0x180] sm:$0xff] }
 0x19c   : > { %v3506_v36 = vadd.f32 %v3505_v2, %v2975_v50  ;;  %v721_v50 = vrot.slane %v720_v38, 4  ;;  %v852_v2 = vld [vmem:[%s7763_s30 + $0x84] sm:$0xf]  ;;  %v993_v53 = vrot.slane %v10356_v47, 4  ;;  %5320 = vmatpush.bf16.msra.mxu2 %v7479_v43  ;;  %v2113_v47 = vrot.slane %v1967_v15, 6 }
 0x19d   : > { %v994_v3 = vrot.slane %v852_v2, 5  ;;  %v729_v2 = vrot.slane %v727_v62, 4  ;;  %v6719_v62 = vld [vmem:[#allocation2 + $0x45c] sm:$0xf0]  ;;  %v306_v15 = vld [vmem:[%s7763_s30 + $0x8c] sm:$0xf] }
 0x19e   : > { %v3605_v16 = vadd.f32 %v3604_v42, %v3506_v36  ;;  %v726_v42 = vsel %vm8352_vm11, %v721_v50, %v9230_v14  ;;  %v9250_v36 = vld [vmem:[%s7763_s30 + $0x88] sm:$0xf]  ;;  %342 = vst [vmem:[#allocation2 + $0x4ec] sm:$0xf] %v306_v15  ;;  %v9324_v6 = vld [vmem:[#allocation2 + $0x494] sm:$0xf] }
 0x19f   : > { %v2976_v9 = vpop.f32.mrf.mxu2  ;;  %v997_v38 = vrot.slane %v9250_v36, 5  ;;  %816 = vst [vmem:[#allocation2 + $0x4a8] sm:$0xf] %v726_v42  ;;  %v995_v39 = vsel %vm7765_vm2, %v993_v53, %v994_v3  ;;  %v730_v0 = vor.u32 %v729_v2, %v9230_v14  ;;  %v6413_v42 = vld [vmem:[#allocation2 + $0x44c] sm:$0xf] }
 0x1a0   : > { %v9243_v61 = vadd.f32 %v3703_v13, %v3605_v16  ;;  %v2977_v41 = vadd.f32 %v2976_v9, %v8708_v46  ;;  %v3609_v45 = vpop.f32.mrf.mxu0  ;;  %v996_v13 = vrot.slane %v994_v3, 4  ;;  %1073 = vst [vmem:[#allocation2 + $0x488] sm:$0xf] %v995_v39  ;;  %v737_v16 = vshrl.u32 %v378_v58, 16  ;;  %v379_v3 = vld [vmem:[%s7763_s30 + $0x90] sm:$0x1] }
 0x1a1   : > { %v9255_v46 = vpop.f32.mrf.mxu1  ;;  %v9266_v9 = vrot.slane %v733_v34, 5  ;;  %v7314_v39 = vld [vmem:[#allocation2 + $0x43c] sm:$0xf]  ;;  %v2115_v34 = vrot.slane %v2113_v47, 4  ;;  %v7316_v2 = vld [vmem:[#allocation2 + $0x460] sm:$0xf0] }
 0x1a2   : > { %v998_v52 = vsel %vm7765_vm2, %v996_v13, %v997_v38  ;;  %v743_v13 = vshll.u32 %v379_v3, 16  ;;  %v854_v3 = vld [vmem:[%s7763_s30 + $0x8c] sm:$0xf] }
 0x1a3   : > { %v3507_v1 = vpop.f32.mrf.mxu3  ;;  %3648 = vmatmul.bf16.gmra.mxu0 %v6710_v60  ;;  %1074 = vst [vmem:[#allocation2 + $0x4ac] sm:$0xf] %v998_v52  ;;  %v10357_v52 = vrot.slane %v9224_v37, 6 }
 0x1a4   : > { %v3508_v59 = vadd.f32 %v3507_v1, %v2977_v41  ;;  %3018 = vmatmul.bf16.gmra.mxu2 %v6402_v29  ;;  %3747 = vmatmul.bf16.gmra.mxu1 %v6714_v19  ;;  %v739_v29 = vrot.slane %v737_v16, 4  ;;  %v7394_v19 = vld [vmem:[#allocation2 + $0x46c] sm:$0xf0]  ;;  %v745_v16 = vrot.slane %v743_v13, 5 }
 0x1a6   : > { %v3607_v24 = vadd.f32 %v9218_v32, %v3508_v59  ;;  %v7487_v32 = vld [vmem:[%s10308_s4 + $0x1c0] sm:$0xff]  ;;  %v740_v53 = vor.u32 %v739_v29, %v9266_v9  ;;  %v2112_v59 = vrot.slane %v10357_v52, 4  ;;  %v6722_v52 = vor.u32 %v7314_v39, %v6719_v62 }
 0x1a7   : > { %v2979_v50 = vpop.f32.mrf.mxu2  ;;  %5419 = vmatpush.bf16.msra.mxu3 %v7487_v32  ;;  %v305_v32 = vld [vmem:[%s7763_s30 + $0x88] sm:$0xf] }
 0x1a8   : > { %v9269_v41 = vadd.f32 %v9221_v20, %v3607_v24  ;;  %3549 = vmatmul.bf16.gmra.mxu3 %v6706_v33  ;;  %v2980_v60 = vadd.f32 %v2979_v50, %v8737_v56  ;;  %v9278_v12 = vpop.f32.mrf.mxu0  ;;  %v1968_v56 = vld [vmem:[%s7763_s30 + $0x98] sm:$0x3]  ;;  %v731_v33 = vrot.slane %v730_v0, 4  ;;  %v741_v24 = vrot.slane %v740_v53, 4  ;;  %v6725_v50 = vld [vmem:[#allocation2 + $0x440] sm:$0xf] }
 0x1a9   : > { %v9283_v20 = vpop.f32.mrf.mxu1  ;;  %v2116_v14 = vrot.slane %v1968_v56, 6  ;;  %v2114_v43 = vsel %vm8339_vm8, %v2112_v59, %v2113_v47  ;;  %v6414_v0 = vor.u32 %v7394_v19, %v6413_v42  ;;  %v6717_v56 = vld [vmem:[#allocation2 + $0x438] sm:$0xf]  ;;  %v7315_v53 = vld [vmem:[#allocation2 + $0x458] sm:$0xf0]  ;;  %v1000_v47 = vrot.slane %v854_v3, 5 }
 0x1aa   : > { %2188 = vst [vmem:[#allocation2 + $0x4dc] sm:$0xf] %v2114_v43  ;;  %v736_v13 = vsel %vm8352_vm11, %v731_v33, %v9266_v9  ;;  %v7495_v59 = vld [vmem:[%s10308_s4 + $0x200] sm:$0xff]  ;;  %v746_v42 = vsel %vm8352_vm11, %v741_v24, %v745_v16  ;;  %v855_v19 = vld [vmem:[%s7763_s30 + $0x90] sm:$0x1]  ;;  %v6726_v9 = vor.u32 %v7316_v2, %v6725_v50 }
 0x1ab   : > { %v3510_v1 = vpop.f32.mrf.mxu3  ;;  %v2117_v37 = vsel %vm8339_vm8, %v2115_v34, %v2116_v14  ;;  %v7521_v14 = vld [vmem:[%s8421_s16] sm:$0xff]  ;;  %341 = vst [vmem:[#allocation2 + $0x4c8] sm:$0xf] %v305_v32  ;;  %v1003_v39 = vrot.slane %v855_v19, 5  ;;  %5518 = vmatpush.bf16.msra.mxu0 %v7495_v59  ;;  %v4023_v24 = vld [vmem:[%s7763_s30 + $0x10] sm:$0xc] }
 0x1ac   : > { %v3511_v58 = vadd.f32 %v3510_v1, %v2980_v60  ;;  %2189 = vst [vmem:[#allocation2 + $0x500] sm:$0xf] %v2117_v37  ;;  %5861 = vmatpush.bf16.msra.mxu1 %v7521_v14  ;;  %v4024_v16 = vld [vmem:[%s7763_s30 + $0x14] sm:$0xf]  ;;  %v4064_v50 = vshrl.u32 %v4023_v24, 16  ;;  %v4067_v2 = vshll.u32 %v4023_v24, 16 }
 0x1ad   : > { %817 = vst [vmem:[#allocation2 + $0x4cc] sm:$0xf] %v736_v13  ;;  %v4025_v32 = vld [vmem:[%s7763_s30 + $0x18] sm:$0xf]  ;;  %v4076_v37 = vshll.u32 %v4024_v16, 16 }
 0x1ae   : > { %v3610_v29 = vadd.f32 %v3609_v45, %v3511_v58  ;;  %818 = vst [vmem:[#allocation2 + $0x4f0] sm:$0xf] %v746_v42  ;;  %v4066_v3 = vrot.slane %v4064_v50, 6  ;;  %v3769_v13 = vld [vmem:[%s7763_s30 + $0x14] sm:$0xf]  ;;  %v4083_v19 = vshrl.u32 %v4025_v32, 16 }
 0x1af   : > { %v2981_v60 = vpop.f32.mrf.mxu2  ;;  %v6731_v59 = vld [vmem:[#allocation2 + $0x4a4] sm:$0xf0]  ;;  %v3844_v14 = vrot.slane %v3769_v13, 6  ;;  %v4504_v50 = vld [vmem:[%s7763_s30 + $0x14] sm:$0xf] }
 0x1b0   : > { %v9300_v45 = vadd.f32 %v9255_v46, %v3610_v29  ;;  %v2982_v1 = vadd.f32 %v2981_v60, %v8764_v30  ;;  %v9310_v58 = vpop.f32.mrf.mxu0  ;;  %v999_v46 = vrot.slane %v997_v38, 4  ;;  %v1002_v30 = vrot.slane %v1000_v47, 4  ;;  %v6737_v24 = vld [vmem:[#allocation2 + $0x488] sm:$0xf] }
 0x1b1   : > { %v9314_v33 = vpop.f32.mrf.mxu1  ;;  %v6718_v38 = vor.u32 %v7315_v53, %v6717_v56  ;;  %v4073_v29 = vshrl.u32 %v4024_v16, 16  ;;  %v4069_v60 = vrot.slane %v4067_v2, 7  ;;  %v7397_v53 = vld [vmem:[#allocation2 + $0x4b4] sm:$0xf0]  ;;  %v7319_v16 = vld [vmem:[#allocation2 + $0x4a8] sm:$0xf0] }
 0x1b2   : > { %v1001_v8 = vsel %vm7765_vm2, %v999_v46, %v1000_v47  ;;  %v1004_v34 = vsel %vm7765_vm2, %v1002_v30, %v1003_v39  ;;  %v3768_v46 = vld [vmem:[%s7763_s30 + $0x10] sm:$0xc] }
 0x1b3   : > { %v3512_v62 = vpop.f32.mrf.mxu3  ;;  %3653 = vmatmul.bf16.gmra.mxu0 %v6722_v52  ;;  %1075 = vst [vmem:[#allocation2 + $0x4d0] sm:$0xf] %v1001_v8  ;;  %v4075_v47 = vrot.slane %v4073_v29, 6  ;;  %v7317_v52 = vld [vmem:[#allocation2 + $0x484] sm:$0xf]  ;;  %v4070_v42 = vor.u32 %v4069_v60, %v4066_v3  ;;  %v3846_v8 = vrot.slane %v3844_v14, 4 }
 0x1b4   : > { %v3513_v36 = vadd.f32 %v3512_v62, %v2982_v1  ;;  %3023 = vmatmul.bf16.gmra.mxu2 %v6414_v0  ;;  %3752 = vmatmul.bf16.gmra.mxu1 %v6726_v9  ;;  %1076 = vst [vmem:[#allocation2 + $0x4f4] sm:$0xf] %v1004_v34  ;;  %v6847_v62 = vrot.slane %v3768_v46, 10  ;;  %v9354_v3 = vld [vmem:[%s7763_s30 + $0x18] sm:$0xf] }
 0x1b5   : > { %v6729_v46 = vld [vmem:[#allocation2 + $0x480] sm:$0xf] }
 0x1b6   : > { %v3612_v43 = vadd.f32 %v9278_v12, %v3513_v36  ;;  %v4078_v12 = vrot.slane %v4076_v37, 7  ;;  %v3845_v2 = vsel %vm8339_vm8, %v6847_v62, %v3844_v14  ;;  %v4071_v37 = vrot.slane %v4070_v42, 4 }
 0x1b7   : > { %v2984_v15 = vpop.f32.mrf.mxu2  ;;  %3987 = vst [vmem:[#allocation2 + $0x18] sm:$0xf] %v3845_v2 }
 0x1b8   : > { %v9327_v0 = vadd.f32 %v9283_v20, %v3612_v43  ;;  %3554 = vmatmul.bf16.gmra.mxu3 %v6718_v38  ;;  %v2985_v56 = vadd.f32 %v2984_v15, %v8797_v35  ;;  %v9331_v1 = vpop.f32.mrf.mxu0  ;;  %v9337_v20 = vld [vmem:[%s7763_s30 + $0x18] sm:$0xf]  ;;  %v4079_v30 = vor.u32 %v4078_v12, %v4075_v47  ;;  %v6426_v35 = vor.u32 %v7397_v53, %v9324_v6  ;;  %v4503_v6 = vld [vmem:[%s7763_s30 + $0x10] sm:$0x8] }
 0x1b9   : > { %v9333_v9 = vpop.f32.mrf.mxu1  ;;  %v3847_v34 = vrot.slane %v9337_v20, 6  ;;  %v6734_v38 = vor.u32 %v7317_v52, %v6731_v59  ;;  %v4085_v15 = vrot.slane %v4083_v19, 6  ;;  %v4086_v53 = vshll.u32 %v4025_v32, 16 }
 0x1ba   : > { %v4080_v47 = vsel %vm9348_vm14, %v4071_v37, %v4079_v30  ;;  %v6848_v12 = vrot.slane %v4503_v6, 11  ;;  %v4582_v52 = vrot.slane %v4504_v50, 7  ;;  %v10322_v32 = vrot.slane %v9354_v3, 7 }
 0x1bb   : > { %v3515_v39 = vpop.f32.mrf.mxu3  ;;  %v3848_v43 = vsel %vm8339_vm8, %v3846_v8, %v3847_v34  ;;  %v4088_v42 = vrot.slane %v4086_v53, 7  ;;  %4467 = vst [vmem:[#allocation2 + $0x1c] sm:$0xf] %v4080_v47 }
 0x1bc   : > { %v3516_v36 = vadd.f32 %v3515_v39, %v2985_v56  ;;  %v4081_v56 = vrot.slane %v4079_v30, 4  ;;  %3988 = vst [vmem:[#allocation2 + $0x3c] sm:$0xf] %v3848_v43  ;;  %v7318_v30 = vld [vmem:[#allocation2 + $0x4a0] sm:$0xf0]  ;;  %v6738_v39 = vor.u32 %v7319_v16, %v6737_v24  ;;  %v4583_v62 = vsel %vm9363_vm1, %v6848_v12, %v4582_v52 }
 0x1bd   : > { %4725 = vst [vmem:[#allocation2 + $0x20] sm:$0xf] %v4583_v62  ;;  %v6730_v43 = vor.u32 %v7318_v30, %v6729_v46  ;;  %v4026_v16 = vld [vmem:[%s7763_s30 + $0x1c] sm:$0xf]  ;;  %v7400_v30 = vld [vmem:[#allocation2 + $0x4fc] sm:$0xf0] }
 0x1be   : > { %v3615_v60 = vadd.f32 %v9310_v58, %v3516_v36  ;;  %v4089_v36 = vor.u32 %v4088_v42, %v4085_v15  ;;  %v4093_v37 = vshrl.u32 %v4026_v16, 16  ;;  %v4096_v15 = vshll.u32 %v4026_v16, 16  ;;  %v4506_v42 = vld [vmem:[%s7763_s30 + $0x1c] sm:$0xf] }
 0x1bf   : > { %v2986_v13 = vpop.f32.mrf.mxu2  ;;  %v4588_v16 = vrot.slane %v4506_v42, 7 }
 0x1c0   : > { %v9360_v59 = vadd.f32 %v9314_v33, %v3615_v60  ;;  %v2987_v14 = vadd.f32 %v2986_v13, %v8818_v28  ;;  %v3619_v19 = vpop.f32.mrf.mxu0  ;;  %v4584_v33 = vrot.slane %v4582_v52, 4  ;;  %v4090_v24 = vsel %vm9348_vm14, %v4081_v56, %v4089_v36  ;;  %v4027_v60 = vld [vmem:[%s7763_s30 + $0x20] sm:$0xf]  ;;  %v6437_v13 = vld [vmem:[#allocation2 + $0x4dc] sm:$0xf] }
 0x1c1   : > { %v3718_v8 = vpop.f32.mrf.mxu1  ;;  %4468 = vst [vmem:[#allocation2 + $0x40] sm:$0xf] %v4090_v24  ;;  %v4098_v47 = vrot.slane %v4096_v15, 7  ;;  %v3771_v52 = vld [vmem:[%s7763_s30 + $0x1c] sm:$0xf] }
 0x1c2   : > { %10360 = vst [vmem:[#allocation14_spill] sm:$0xff] %v9360_v59  ;;  %v4586_v50 = vsel %vm9363_vm1, %v4584_v33, %v10322_v32  ;;  %v6743_v33 = vld [vmem:[#allocation2 + $0x4ec] sm:$0xf0]  ;;  %v7322_v59 = vld [vmem:[#allocation2 + $0x4f0] sm:$0xf0] }
 0x1c3   : > { %v3517_v28 = vpop.f32.mrf.mxu3  ;;  %3658 = vmatmul.bf16.gmra.mxu0 %v6734_v38  ;;  %4726 = vst [vmem:[#allocation2 + $0x44] sm:$0xf] %v4586_v50  ;;  %v4103_v38 = vshrl.u32 %v4027_v60, 16 }
 0x1c4   : > { %v3518_v2 = vadd.f32 %v3517_v28, %v2987_v14  ;;  %3028 = vmatmul.bf16.gmra.mxu2 %v6426_v35  ;;  %3757 = vmatmul.bf16.gmra.mxu1 %v6738_v39  ;;  %v4095_v35 = vrot.slane %v4093_v37, 6  ;;  %v4106_v14 = vshll.u32 %v4027_v60, 16  ;;  %v7320_v39 = vld [vmem:[#allocation2 + $0x4cc] sm:$0xf]  ;;  %v9386_v28 = vld [vmem:[%s7763_s30 + $0x20] sm:$0xf]  ;;  %v6438_v37 = vor.u32 %v7400_v30, %v6437_v13 }
 0x1c5   : > { %v6746_v15 = vor.u32 %v7320_v39, %v6743_v33  ;;  %v3853_v60 = vrot.slane %v9386_v28, 6  ;;  %v6741_v33 = vld [vmem:[#allocation2 + $0x4c8] sm:$0xf] }
 0x1c6   : > { %v3617_v6 = vadd.f32 %v9331_v1, %v3518_v2  ;;  %v3850_v1 = vrot.slane %v3771_v52, 6  ;;  %v4099_v50 = vor.u32 %v4098_v47, %v4095_v35  ;;  %v4105_v2 = vrot.slane %v4103_v38, 6  ;;  %v9392_v52 = vld [vmem:[%s7763_s30 + $0x20] sm:$0xf] }
 0x1c7   : > { %v2989_v53 = vpop.f32.mrf.mxu2  ;;  %v4108_v24 = vrot.slane %v4106_v14, 7  ;;  %v4591_v39 = vrot.slane %v9392_v52, 7 }
 0x1c8   : > { %v9380_v12 = vadd.f32 %v9333_v9, %v3617_v6  ;;  %3559 = vmatmul.bf16.gmra.mxu3 %v6730_v43  ;;  %v2990_v56 = vadd.f32 %v2989_v53, %v8847_v57  ;;  %v3621_v46 = vpop.f32.mrf.mxu0  ;;  %v3849_v57 = vrot.slane %v3847_v34, 4  ;;  %v3852_v6 = vrot.slane %v3850_v1, 4 }
 0x1c9   : > { %v3720_v62 = vpop.f32.mrf.mxu1  ;;  %v4091_v53 = vrot.slane %v4089_v36, 4  ;;  %v4101_v47 = vrot.slane %v4099_v50, 4  ;;  %v9396_v38 = vor.u32 %v4108_v24, %v4105_v2  ;;  %v7321_v2 = vld [vmem:[#allocation2 + $0x4e8] sm:$0xf0] }
 0x1ca   : > { %10363 = vst [vmem:[#allocation15_spill] sm:$0xff] %v9380_v12  ;;  %v6749_v12 = vld [vmem:[#allocation2 + $0x4d0] sm:$0xf]  ;;  %v3851_v35 = vsel %vm8339_vm8, %v3849_v57, %v3850_v1  ;;  %v3854_v20 = vsel %vm8339_vm8, %v3852_v6, %v3853_v60 }
 0x1cb   : > { %v3520_v9 = vpop.f32.mrf.mxu3  ;;  %3989 = vst [vmem:[#allocation2 + $0x60] sm:$0xf] %v3851_v35  ;;  %v4100_v34 = vsel %vm9348_vm14, %v4091_v53, %v4099_v50  ;;  %v4110_v30 = vsel %vm9348_vm14, %v4101_v47, %v9396_v38  ;;  %v6750_v50 = vor.u32 %v7322_v59, %v6749_v12  ;;  %v6851_v53 = vld [vmem:[#allocation2 + $0x18] sm:$0xf] }
 0x1cc   : > { %v3521_v43 = vadd.f32 %v3520_v9, %v2990_v56  ;;  %v4590_v56 = vrot.slane %v4588_v16, 4  ;;  %3990 = vst [vmem:[#allocation2 + $0x84] sm:$0xf] %v3854_v20  ;;  %v6742_v9 = vor.u32 %v7321_v2, %v6741_v33 }
 0x1cd   : > { %4469 = vst [vmem:[#allocation2 + $0x64] sm:$0xf] %v4100_v34  ;;  %v6859_v34 = vld [vmem:[#allocation2 + $0x20] sm:$0xf] }
 0x1ce   : > { %v3620_v32 = vadd.f32 %v3619_v19, %v3521_v43  ;;  %v10364_v19 = vrot.slane %v9354_v3, 7  ;;  %4470 = vst [vmem:[#allocation2 + $0x88] sm:$0xf] %v4110_v30  ;;  %v4028_v43 = vld [vmem:[%s7763_s30 + $0x24] sm:$0xf] }
 0x1cf   : > { %v2991_v13 = vpop.f32.mrf.mxu2  ;;  %v4113_v59 = vshrl.u32 %v4028_v43, 16  ;;  %v4116_v12 = vshll.u32 %v4028_v43, 16  ;;  %v9432_v43 = vld [vmem:[%s7763_s30 + $0x28] sm:$0xf] }
 0x1d0   : > { %v4587_v36 = vrot.slane %v10364_v19, 4  ;;  %v9406_v14 = vadd.f32 %v3718_v8, %v3620_v32  ;;  %v2992_v42 = vadd.f32 %v2991_v13, %v8874_v26  ;;  %v3624_v1 = vpop.f32.mrf.mxu0  ;;  %v4592_v26 = vsel %vm9363_vm1, %v4590_v56, %v4591_v39  ;;  %v3773_v19 = vld [vmem:[%s7763_s30 + $0x24] sm:$0xf] }
 0x1d1   : > { %v3723_v32 = vpop.f32.mrf.mxu1  ;;  %4728 = vst [vmem:[#allocation2 + $0x8c] sm:$0xf] %v4592_v26  ;;  %v4115_v52 = vrot.slane %v4113_v59, 6  ;;  %v4118_v35 = vrot.slane %v4116_v12, 7  ;;  %v3856_v56 = vrot.slane %v3773_v19, 6 }
 0x1d2   : > { %v4589_v3 = vsel %vm9363_vm1, %v4587_v36, %v4588_v16  ;;  %v4029_v16 = vld [vmem:[%s7763_s30 + $0x28] sm:$0xf]  ;;  %v4508_v26 = vld [vmem:[%s7763_s30 + $0x24] sm:$0xf] }
 0x1d3   : > { %v3522_v8 = vpop.f32.mrf.mxu3  ;;  %4727 = vst [vmem:[#allocation2 + $0x68] sm:$0xf] %v4589_v3  ;;  %3663 = vmatmul.bf16.gmra.mxu0 %v6746_v15  ;;  %v4123_v47 = vshrl.u32 %v4029_v16, 16  ;;  %v4126_v13 = vshll.u32 %v4029_v16, 16  ;;  %v7426_v15 = vld [vmem:[#allocation2 + $0x38] sm:$0xf0] }
 0x1d4   : > { %v3523_v24 = vadd.f32 %v3522_v8, %v2992_v42  ;;  %3033 = vmatmul.bf16.gmra.mxu2 %v6438_v37  ;;  %3762 = vmatmul.bf16.gmra.mxu1 %v6750_v50  ;;  %v4119_v42 = vor.u32 %v4118_v35, %v4115_v52  ;;  %v9424_v50 = vld [vmem:[%s7763_s30 + $0x28] sm:$0xf]  ;;  %v3858_v59 = vrot.slane %v3856_v56, 4  ;;  %v7163_v52 = vld [vmem:[#allocation2 + $0x10] sm:$0xf] }
 0x1d5   : > { %v4125_v30 = vrot.slane %v4123_v47, 6  ;;  %v4128_v33 = vrot.slane %v4126_v13, 7  ;;  %v3859_v12 = vrot.slane %v9424_v50, 6  ;;  %v7503_v35 = vld [vmem:[#allocation2 + $0x30] sm:$0xf0]  ;;  %v4593_v13 = vrot.slane %v4591_v39, 4 }
 0x1d6   : > { %v3622_v57 = vadd.f32 %v3621_v46, %v3523_v24  ;;  %v7427_v46 = vld [vmem:[#allocation2 + $0x40] sm:$0xf0]  ;;  %v6852_v24 = vor.u32 %v7426_v15, %v6851_v53  ;;  %v4121_v16 = vrot.slane %v4119_v42, 4  ;;  %v4594_v53 = vrot.slane %v4508_v26, 7 }
 0x1d7   : > { %v2994_v6 = vpop.f32.mrf.mxu2  ;;  %v3860_v28 = vsel %vm8339_vm8, %v3858_v59, %v3859_v12 }
 0x1d8   : > { %v9419_v20 = vadd.f32 %v3720_v62, %v3622_v57  ;;  %3564 = vmatmul.bf16.gmra.mxu3 %v6742_v9  ;;  %v2995_v37 = vadd.f32 %v2994_v6, %v8450_v40  ;;  %v3626_v36 = vpop.f32.mrf.mxu0  ;;  %v9426_v62 = vor.u32 %v4128_v33, %v4125_v30  ;;  %v6860_v40 = vor.u32 %v7427_v46, %v6859_v34  ;;  %v6853_v30 = vld [vmem:[#allocation2 + $0x3c] sm:$0xf0] }
 0x1d9   : > { %v3725_v2 = vpop.f32.mrf.mxu1  ;;  %v3855_v9 = vrot.slane %v3853_v60, 4  ;;  %v4111_v57 = vrot.slane %v9396_v38, 4  ;;  %3992 = vst [vmem:[#allocation2 + $0xcc] sm:$0xf] %v3860_v28  ;;  %v4595_v34 = vsel %vm9363_vm1, %v4593_v13, %v4594_v53  ;;  %v4596_v19 = vrot.slane %v4594_v53, 4 }
 0x1da   : > { %v4130_v38 = vsel %vm9348_vm14, %v4121_v16, %v9426_v62  ;;  %4729 = vst [vmem:[#allocation2 + $0xb0] sm:$0xf] %v4595_v34  ;;  %v4031_v16 = vld [vmem:[%s7763_s30 + $0x30] sm:$0xf]  ;;  %v6871_v28 = vld [vmem:[#allocation2 + $0x68] sm:$0xf] }
 0x1db   : > { %v3525_v3 = vpop.f32.mrf.mxu3  ;;  %v3857_v47 = vsel %vm8339_vm8, %v3855_v9, %v3856_v56  ;;  %v4120_v60 = vsel %vm9348_vm14, %v4111_v57, %v4119_v42  ;;  %v7425_v56 = vld [vmem:[#allocation2 + $0x1c] sm:$0xf]  ;;  %v7164_v42 = vor.u32 %v7503_v35, %v7163_v52  ;;  %4472 = vst [vmem:[#allocation2 + $0xd0] sm:$0xf] %v4130_v38  ;;  %v6863_v52 = vld [vmem:[#allocation2 + $0x60] sm:$0xf] }
 0x1dc   : > { %v3526_v8 = vadd.f32 %v3525_v3, %v2995_v37  ;;  %3991 = vst [vmem:[#allocation2 + $0xa8] sm:$0xf] %v3857_v47  ;;  %v6856_v26 = vor.u32 %v7425_v56, %v6853_v30  ;;  %v4143_v13 = vshrl.u32 %v4031_v16, 16  ;;  %v4146_v53 = vshll.u32 %v4031_v16, 16 }
 0x1dd   : > { %4471 = vst [vmem:[#allocation2 + $0xac] sm:$0xf] %v4120_v60  ;;  %v3775_v60 = vld [vmem:[%s7763_s30 + $0x2c] sm:$0xf]  ;;  %v4131_v16 = vrot.slane %v9426_v62, 4 }
 0x1de   : > { %v3625_v6 = vadd.f32 %v3624_v1, %v3526_v8  ;;  %v4597_v1 = vrot.slane %v9432_v43, 7  ;;  %v4030_v8 = vld [vmem:[%s7763_s30 + $0x2c] sm:$0xf]  ;;  %v4148_v56 = vrot.slane %v4146_v53, 7 }
 0x1df   : > { %v2996_v37 = vpop.f32.mrf.mxu2  ;;  %v4133_v9 = vshrl.u32 %v4030_v8, 16  ;;  %v4136_v59 = vshll.u32 %v4030_v8, 16  ;;  %v3861_v8 = vrot.slane %v3859_v12, 4 }
 0x1e0   : > { %v9448_v15 = vadd.f32 %v3723_v32, %v3625_v6  ;;  %v2997_v39 = vadd.f32 %v2996_v37, %v8479_v51  ;;  %v3629_v46 = vpop.f32.mrf.mxu0  ;;  %v4598_v32 = vsel %vm9363_vm1, %v4596_v19, %v4597_v1  ;;  %v4145_v19 = vrot.slane %v4143_v13, 6  ;;  %v7504_v13 = vld [vmem:[#allocation2 + $0x78] sm:$0xf0] }
 0x1e1   : > { %v3728_v33 = vpop.f32.mrf.mxu1  ;;  %4730 = vst [vmem:[#allocation2 + $0xd4] sm:$0xf] %v4598_v32  ;;  %v4135_v35 = vrot.slane %v4133_v9, 6  ;;  %v4138_v47 = vrot.slane %v4136_v59, 7  ;;  %v9472_v9 = vld [vmem:[%s7763_s30 + $0x30] sm:$0xf] }
 0x1e3   : > { %v3527_v51 = vpop.f32.mrf.mxu3  ;;  %5519 = vmatmul.bf16.vlgmr.msra.gmra.mxu0 %v6860_v40  ;;  %v7429_v40 = vld [vmem:[#allocation2 + $0x80] sm:$0xf0]  ;;  %v4139_v34 = vor.u32 %v4138_v47, %v4135_v35  ;;  %v7167_v47 = vld [vmem:[#allocation2 + $0x58] sm:$0xf] }
 0x1e4   : > { %v3528_v3 = vadd.f32 %v3527_v51, %v2997_v39  ;;  %5321 = vmatmul.bf16.vlgmr.msra.gmra.mxu2 %v6852_v24  ;;  %5862 = vmatmul.bf16.vlgmr.msra.gmra.mxu1 %v7164_v42  ;;  %v3862_v39 = vrot.slane %v3775_v60, 6  ;;  %v9464_v42 = vld [vmem:[%s7763_s30 + $0x30] sm:$0xf]  ;;  %v4510_v51 = vld [vmem:[%s7763_s30 + $0x2c] sm:$0xf] }
 0x1e5   : > { %v4600_v50 = vrot.slane %v4510_v51, 7 }
 0x1e6   : > { %v3627_v57 = vadd.f32 %v3626_v36, %v3528_v3  ;;  %v7430_v36 = vld [vmem:[#allocation2 + $0x88] sm:$0xf0]  ;;  %v3864_v59 = vrot.slane %v3862_v39, 4  ;;  %v3863_v53 = vsel %vm8339_vm8, %v3861_v8, %v3862_v39  ;;  %v7428_v39 = vld [vmem:[#allocation2 + $0x64] sm:$0xf] }
 0x1e7   : > { %v2999_v6 = vpop.f32.mrf.mxu2  ;;  %3993 = vst [vmem:[#allocation2 + $0xf0] sm:$0xf] %v3863_v53  ;;  %v4602_v60 = vrot.slane %v4600_v50, 4 }
 0x1e8   : > { %v9459_v37 = vadd.f32 %v3725_v2, %v3627_v57  ;;  %5420 = vmatmul.bf16.vlgmr.msra.gmra.mxu3 %v6856_v26  ;;  %v3000_v24 = vadd.f32 %v2999_v6, %v8495_v49  ;;  %v3631_v38 = vpop.f32.mrf.mxu0  ;;  %v9466_v2 = vor.u32 %v4148_v56, %v4145_v19  ;;  %v6864_v49 = vor.u32 %v7429_v40, %v6863_v52 }
 0x1e9   : > { %v3730_v30 = vpop.f32.mrf.mxu1  ;;  %v6872_v26 = vor.u32 %v7430_v36, %v6871_v28  ;;  %v3865_v57 = vrot.slane %v9464_v42, 6  ;;  %v4141_v6 = vrot.slane %v4139_v34, 4  ;;  %v4599_v52 = vrot.slane %v4597_v1, 4 }
 0x1ea   : > { %v4603_v1 = vrot.slane %v9472_v9, 7  ;;  %v7168_v19 = vor.u32 %v7504_v13, %v7167_v47  ;;  %v6875_v47 = vld [vmem:[#allocation2 + $0xa8] sm:$0xf] }
 0x1eb   : > { %v3530_v32 = vpop.f32.mrf.mxu3  ;;  %v3866_v62 = vsel %vm8339_vm8, %v3864_v59, %v3865_v57  ;;  %v4150_v43 = vsel %vm9348_vm14, %v4141_v6, %v9466_v2  ;;  %v4601_v28 = vsel %vm9363_vm1, %v4599_v52, %v4600_v50  ;;  %v4033_v6 = vld [vmem:[%s7763_s30 + $0x38] sm:$0xf] }
 0x1ec   : > { %v3531_v3 = vadd.f32 %v3530_v32, %v3000_v24  ;;  %3994 = vst [vmem:[#allocation2 + $0x114] sm:$0xf] %v3866_v62  ;;  %v4163_v52 = vshrl.u32 %v4033_v6, 16  ;;  %v4166_v50 = vshll.u32 %v4033_v6, 16  ;;  %v6883_v62 = vld [vmem:[#allocation2 + $0xb0] sm:$0xf] }
 0x1ed   : > { %4474 = vst [vmem:[#allocation2 + $0x118] sm:$0xf] %v4150_v43  ;;  %v4151_v6 = vrot.slane %v9466_v2, 4 }
 0x1ee   : > { %v3630_v35 = vadd.f32 %v3629_v46, %v3531_v3  ;;  %v4140_v46 = vsel %vm9348_vm14, %v4131_v16, %v4139_v34  ;;  %v6865_v34 = vld [vmem:[#allocation2 + $0x84] sm:$0xf0]  ;;  %4731 = vst [vmem:[#allocation2 + $0xf8] sm:$0xf] %v4601_v28  ;;  %v4032_v3 = vld [vmem:[%s7763_s30 + $0x34] sm:$0xf] }
 0x1ef   : > { %v3001_v12 = vpop.f32.mrf.mxu2  ;;  %4473 = vst [vmem:[#allocation2 + $0xf4] sm:$0xf] %v4140_v46  ;;  %v6868_v51 = vor.u32 %v7428_v39, %v6865_v34  ;;  %v4153_v8 = vshrl.u32 %v4032_v3, 16  ;;  %v4156_v59 = vshll.u32 %v4032_v3, 16  ;;  %v3777_v46 = vld [vmem:[%s7763_s30 + $0x34] sm:$0xf] }
 0x1f0   : > { %v9502_v24 = vadd.f32 %v3728_v33, %v3630_v35  ;;  %v3002_v40 = vadd.f32 %v3001_v12, %v8531_v17  ;;  %v3634_v36 = vpop.f32.mrf.mxu0  ;;  %v4604_v33 = vsel %vm9363_vm1, %v4602_v60, %v4603_v1  ;;  %v4165_v60 = vrot.slane %v4163_v52, 6  ;;  %v7505_v52 = vld [vmem:[#allocation2 + $0xc0] sm:$0xf0] }
 0x1f1   : > { %v3733_v56 = vpop.f32.mrf.mxu1  ;;  %4732 = vst [vmem:[#allocation2 + $0x11c] sm:$0xf] %v4604_v33  ;;  %v4155_v13 = vrot.slane %v4153_v8, 6  ;;  %v4158_v53 = vrot.slane %v4156_v59, 7  ;;  %v4168_v39 = vrot.slane %v4166_v50, 7  ;;  %v3867_v3 = vrot.slane %v3865_v57, 4 }
 0x1f2   : > { %v9526_v8 = vld [vmem:[%s7763_s30 + $0x38] sm:$0xf] }
 0x1f3   : > { %v3532_v17 = vpop.f32.mrf.mxu3  ;;  %5524 = vmatmul.bf16.gmra.mxu0 %v6872_v26  ;;  %v7432_v26 = vld [vmem:[#allocation2 + $0xc8] sm:$0xf0]  ;;  %v4159_v28 = vor.u32 %v4158_v53, %v4155_v13  ;;  %v7171_v53 = vld [vmem:[#allocation2 + $0xa0] sm:$0xf] }
 0x1f4   : > { %v3533_v32 = vadd.f32 %v3532_v17, %v3002_v40  ;;  %5326 = vmatmul.bf16.gmra.mxu2 %v6864_v49  ;;  %5867 = vmatmul.bf16.gmra.mxu1 %v7168_v19  ;;  %v3868_v40 = vrot.slane %v3777_v46, 6  ;;  %v9518_v19 = vld [vmem:[%s7763_s30 + $0x38] sm:$0xf]  ;;  %v4512_v17 = vld [vmem:[%s7763_s30 + $0x34] sm:$0xf] }
 0x1f5   : > { %v4160_v2 = vsel %vm9348_vm14, %v4151_v6, %v4159_v28 }
 0x1f6   : > { %v3632_v16 = vadd.f32 %v3631_v38, %v3533_v32  ;;  %v7433_v38 = vld [vmem:[#allocation2 + $0xd0] sm:$0xf0]  ;;  %v3870_v59 = vrot.slane %v3868_v40, 4  ;;  %v3869_v50 = vsel %vm8339_vm8, %v3867_v3, %v3868_v40  ;;  %v7431_v40 = vld [vmem:[#allocation2 + $0xac] sm:$0xf] }
 0x1f7   : > { %v3004_v35 = vpop.f32.mrf.mxu2  ;;  %3995 = vst [vmem:[#allocation2 + $0x138] sm:$0xf] %v3869_v50 }
 0x1f8   : > { %v9513_v12 = vadd.f32 %v3730_v30, %v3632_v16  ;;  %5425 = vmatmul.bf16.gmra.mxu3 %v6868_v51  ;;  %v3005_v49 = vadd.f32 %v3004_v35, %v8552_v55  ;;  %v3636_v43 = vpop.f32.mrf.mxu0  ;;  %v9520_v30 = vor.u32 %v4168_v39, %v4165_v60  ;;  %v6876_v51 = vor.u32 %v7432_v26, %v6875_v47  ;;  %v6877_v60 = vld [vmem:[#allocation2 + $0xcc] sm:$0xf0] }
 0x1f9   : > { %v3735_v34 = vpop.f32.mrf.mxu1  ;;  %v6884_v55 = vor.u32 %v7433_v38, %v6883_v62  ;;  %v3871_v16 = vrot.slane %v9518_v19, 6  ;;  %v4161_v35 = vrot.slane %v4159_v28, 4  ;;  %v4605_v47 = vrot.slane %v4603_v1, 4  ;;  %4475 = vst [vmem:[#allocation2 + $0x13c] sm:$0xf] %v4160_v2 }
 0x1fa   : > { %v4609_v26 = vrot.slane %v9526_v8, 7  ;;  %v7172_v28 = vor.u32 %v7505_v52, %v7171_v53  ;;  %v6887_v53 = vld [vmem:[#allocation2 + $0xf0] sm:$0xf]  ;;  %v3779_v2 = vld [vmem:[%s7763_s30 + $0x3c] sm:$0xf] }
 0x1fb   : > { %v3535_v33 = vpop.f32.mrf.mxu3  ;;  %v3872_v57 = vsel %vm8339_vm8, %v3870_v59, %v3871_v16 }
 0x1fc   : > { %v3536_v32 = vadd.f32 %v3535_v33, %v3005_v49  ;;  %v4606_v49 = vrot.slane %v4512_v17, 7  ;;  %3996 = vst [vmem:[#allocation2 + $0x15c] sm:$0xf] %v3872_v57  ;;  %v6880_v17 = vor.u32 %v7431_v40, %v6877_v60  ;;  %v6895_v57 = vld [vmem:[#allocation2 + $0xf8] sm:$0xf] }
 0x1fe   : > { %v3635_v13 = vadd.f32 %v3634_v36, %v3536_v32  ;;  %v4170_v36 = vsel %vm9348_vm14, %v4161_v35, %v9520_v30  ;;  %v4607_v1 = vsel %vm9363_vm1, %v4605_v47, %v4606_v49  ;;  %v4608_v46 = vrot.slane %v4606_v49, 4  ;;  %v4034_v32 = vld [vmem:[%s7763_s30 + $0x3c] sm:$0xf]  ;;  %v4035_v35 = vld [vmem:[%s7763_s30 + $0x40] sm:$0xf] }
 0x1ff   : > { %v3006_v42 = vpop.f32.mrf.mxu2  ;;  %4476 = vst [vmem:[#allocation2 + $0x160] sm:$0xf] %v4170_v36  ;;  %v4173_v3 = vshrl.u32 %v4034_v32, 16  ;;  %v4176_v59 = vshll.u32 %v4034_v32, 16  ;;  %v4183_v47 = vshrl.u32 %v4035_v35, 16  ;;  %v4186_v49 = vshll.u32 %v4035_v35, 16 }
 0x200   : > { %v9544_v62 = vadd.f32 %v3733_v56, %v3635_v13  ;;  %v3007_v9 = vadd.f32 %v3006_v42, %v8585_v18  ;;  %v3639_v38 = vpop.f32.mrf.mxu0  ;;  %v4610_v56 = vsel %vm9363_vm1, %v4608_v46, %v4609_v26  ;;  %4733 = vst [vmem:[#allocation2 + $0x140] sm:$0xf] %v4607_v1  ;;  %v3873_v32 = vrot.slane %v3871_v16, 4 }
 0x201   : > { %v3738_v39 = vpop.f32.mrf.mxu1  ;;  %4734 = vst [vmem:[#allocation2 + $0x164] sm:$0xf] %v4610_v56  ;;  %v4175_v52 = vrot.slane %v4173_v3, 6  ;;  %v4178_v50 = vrot.slane %v4176_v59, 7  ;;  %v4185_v46 = vrot.slane %v4183_v47, 6  ;;  %v4188_v40 = vrot.slane %v4186_v49, 7 }
 0x202   : > { %v9568_v3 = vld [vmem:[%s7763_s30 + $0x40] sm:$0xf]  ;;  %v4171_v35 = vrot.slane %v9520_v30, 4  ;;  %v7506_v47 = vld [vmem:[#allocation2 + $0x108] sm:$0xf0] }
 0x203   : > { %v3537_v18 = vpop.f32.mrf.mxu3  ;;  %5529 = vmatmul.bf16.gmra.mxu0 %v6884_v55  ;;  %v7435_v55 = vld [vmem:[#allocation2 + $0x110] sm:$0xf0]  ;;  %v4179_v1 = vor.u32 %v4178_v50, %v4175_v52  ;;  %v7175_v50 = vld [vmem:[#allocation2 + $0xe8] sm:$0xf] }
 0x204   : > { %v3538_v33 = vadd.f32 %v3537_v18, %v3007_v9  ;;  %5331 = vmatmul.bf16.gmra.mxu2 %v6876_v51  ;;  %5872 = vmatmul.bf16.gmra.mxu1 %v7172_v28  ;;  %v3874_v9 = vrot.slane %v3779_v2, 6  ;;  %v9560_v28 = vld [vmem:[%s7763_s30 + $0x40] sm:$0xf]  ;;  %v4514_v18 = vld [vmem:[%s7763_s30 + $0x3c] sm:$0xf] }
 0x205   : > { %v4180_v30 = vsel %vm9348_vm14, %v4171_v35, %v4179_v1 }
 0x206   : > { %v3637_v6 = vadd.f32 %v3636_v43, %v3538_v33  ;;  %v7436_v43 = vld [vmem:[#allocation2 + $0x118] sm:$0xf0]  ;;  %v3876_v59 = vrot.slane %v3874_v9, 4  ;;  %v3875_v49 = vsel %vm8339_vm8, %v3873_v32, %v3874_v9  ;;  %v7434_v9 = vld [vmem:[#allocation2 + $0xf4] sm:$0xf] }
 0x207   : > { %v3009_v13 = vpop.f32.mrf.mxu2  ;;  %3997 = vst [vmem:[#allocation2 + $0x180] sm:$0xf] %v3875_v49 }
 0x208   : > { %v9555_v42 = vadd.f32 %v3735_v34, %v3637_v6  ;;  %5430 = vmatmul.bf16.gmra.mxu3 %v6880_v17  ;;  %v3010_v51 = vadd.f32 %v3009_v13, %v8602_v4  ;;  %v3641_v36 = vpop.f32.mrf.mxu0  ;;  %v9562_v34 = vor.u32 %v4188_v40, %v4185_v46  ;;  %v6888_v17 = vor.u32 %v7435_v55, %v6887_v53  ;;  %v6889_v46 = vld [vmem:[#allocation2 + $0x114] sm:$0xf0] }
 0x209   : > { %v3740_v60 = vpop.f32.mrf.mxu1  ;;  %v6896_v4 = vor.u32 %v7436_v43, %v6895_v57  ;;  %v3877_v6 = vrot.slane %v9560_v28, 6  ;;  %v4181_v13 = vrot.slane %v4179_v1, 4  ;;  %v4611_v53 = vrot.slane %v4609_v26, 4  ;;  %4477 = vst [vmem:[#allocation2 + $0x184] sm:$0xf] %v4180_v30 }
 0x20a   : > { %v4615_v55 = vrot.slane %v9568_v3, 7  ;;  %v7176_v1 = vor.u32 %v7506_v47, %v7175_v50  ;;  %v6899_v50 = vld [vmem:[#allocation2 + $0x138] sm:$0xf]  ;;  %v3781_v30 = vld [vmem:[%s7763_s30 + $0x44] sm:$0xf] }
 0x20b   : > { %v3540_v56 = vpop.f32.mrf.mxu3  ;;  %v3878_v16 = vsel %vm8339_vm8, %v3876_v59, %v3877_v6 }
 0x20c   : > { %v3541_v33 = vadd.f32 %v3540_v56, %v3010_v51  ;;  %v4612_v51 = vrot.slane %v4514_v18, 7  ;;  %3998 = vst [vmem:[#allocation2 + $0x1a4] sm:$0xf] %v3878_v16  ;;  %v6892_v18 = vor.u32 %v7434_v9, %v6889_v46  ;;  %v6907_v16 = vld [vmem:[#allocation2 + $0x140] sm:$0xf] }
 0x20e   : > { %v3640_v52 = vadd.f32 %v3639_v38, %v3541_v33  ;;  %v4190_v38 = vsel %vm9348_vm14, %v4181_v13, %v9562_v34  ;;  %v4613_v26 = vsel %vm9363_vm1, %v4611_v53, %v4612_v51  ;;  %v4614_v2 = vrot.slane %v4612_v51, 4  ;;  %v4036_v33 = vld [vmem:[%s7763_s30 + $0x44] sm:$0xf]  ;;  %v4037_v13 = vld [vmem:[%s7763_s30 + $0x48] sm:$0xf] }
 0x20f   : > { %v3011_v19 = vpop.f32.mrf.mxu2  ;;  %4478 = vst [vmem:[#allocation2 + $0x1a8] sm:$0xf] %v4190_v38  ;;  %v4193_v32 = vshrl.u32 %v4036_v33, 16  ;;  %v4196_v59 = vshll.u32 %v4036_v33, 16  ;;  %v4203_v53 = vshrl.u32 %v4037_v13, 16  ;;  %v4206_v51 = vshll.u32 %v4037_v13, 16 }
 0x210   : > { %v9586_v57 = vadd.f32 %v3738_v39, %v3640_v52  ;;  %v3012_v8 = vadd.f32 %v3011_v19, %v8641_v23  ;;  %v3644_v43 = vpop.f32.mrf.mxu0  ;;  %v4616_v39 = vsel %vm9363_vm1, %v4614_v2, %v4615_v55  ;;  %4735 = vst [vmem:[#allocation2 + $0x188] sm:$0xf] %v4613_v26  ;;  %v3879_v33 = vrot.slane %v3877_v6, 4 }
 0x211   : > { %v3743_v40 = vpop.f32.mrf.mxu1  ;;  %4736 = vst [vmem:[#allocation2 + $0x1ac] sm:$0xf] %v4616_v39  ;;  %v4195_v47 = vrot.slane %v4193_v32, 6  ;;  %v4198_v49 = vrot.slane %v4196_v59, 7  ;;  %v4205_v2 = vrot.slane %v4203_v53, 6  ;;  %v4208_v9 = vrot.slane %v4206_v51, 7 }
 0x212   : > { %v9610_v32 = vld [vmem:[%s7763_s30 + $0x48] sm:$0xf]  ;;  %v4191_v13 = vrot.slane %v9562_v34, 4  ;;  %v7507_v53 = vld [vmem:[#allocation2 + $0x150] sm:$0xf0] }
 0x213   : > { %v3542_v23 = vpop.f32.mrf.mxu3  ;;  %5534 = vmatmul.bf16.gmra.mxu0 %v6896_v4  ;;  %v7438_v4 = vld [vmem:[#allocation2 + $0x158] sm:$0xf0]  ;;  %v4199_v26 = vor.u32 %v4198_v49, %v4195_v47  ;;  %v7179_v49 = vld [vmem:[#allocation2 + $0x130] sm:$0xf] }
 0x214   : > { %v3543_v56 = vadd.f32 %v3542_v23, %v3012_v8  ;;  %5336 = vmatmul.bf16.gmra.mxu2 %v6888_v17  ;;  %5877 = vmatmul.bf16.gmra.mxu1 %v7176_v1  ;;  %v3880_v8 = vrot.slane %v3781_v30, 6  ;;  %v9602_v1 = vld [vmem:[%s7763_s30 + $0x48] sm:$0xf]  ;;  %v4516_v23 = vld [vmem:[%s7763_s30 + $0x44] sm:$0xf] }
 0x215   : > { %v4200_v34 = vsel %vm9348_vm14, %v4191_v13, %v4199_v26 }
 0x216   : > { %v3642_v35 = vadd.f32 %v3641_v36, %v3543_v56  ;;  %v7439_v36 = vld [vmem:[#allocation2 + $0x160] sm:$0xf0]  ;;  %v3882_v59 = vrot.slane %v3880_v8, 4  ;;  %v3881_v51 = vsel %vm8339_vm8, %v3879_v33, %v3880_v8  ;;  %v7437_v8 = vld [vmem:[#allocation2 + $0x13c] sm:$0xf] }
 0x217   : > { %v3014_v52 = vpop.f32.mrf.mxu2  ;;  %3999 = vst [vmem:[#allocation2 + $0x1c8] sm:$0xf] %v3881_v51 }
 0x218   : > { %v9597_v19 = vadd.f32 %v3740_v60, %v3642_v35  ;;  %5435 = vmatmul.bf16.gmra.mxu3 %v6892_v18  ;;  %v3015_v17 = vadd.f32 %v3014_v52, %v8661_v5  ;;  %v3646_v38 = vpop.f32.mrf.mxu0  ;;  %v9604_v60 = vor.u32 %v4208_v9, %v4205_v2  ;;  %v6900_v18 = vor.u32 %v7438_v4, %v6899_v50  ;;  %v6901_v2 = vld [vmem:[#allocation2 + $0x15c] sm:$0xf0] }
 0x219   : > { %v3745_v46 = vpop.f32.mrf.mxu1  ;;  %v6908_v5 = vor.u32 %v7439_v36, %v6907_v16  ;;  %v3883_v35 = vrot.slane %v9602_v1, 6  ;;  %v4201_v52 = vrot.slane %v4199_v26, 4  ;;  %v4617_v50 = vrot.slane %v4615_v55, 4  ;;  %4479 = vst [vmem:[#allocation2 + $0x1cc] sm:$0xf] %v4200_v34 }
 0x21a   : > { %v4621_v4 = vrot.slane %v9610_v32, 7  ;;  %v7180_v26 = vor.u32 %v7507_v53, %v7179_v49  ;;  %v6911_v49 = vld [vmem:[#allocation2 + $0x180] sm:$0xf]  ;;  %v6919_v34 = vld [vmem:[#allocation2 + $0x188] sm:$0xf]  ;;  %v10366_v32 = vld [vmem:[#allocation7_spill] sm:$0xff] }
 0x21b   : > { %v3545_v39 = vpop.f32.mrf.mxu3  ;;  %v3884_v6 = vsel %vm8339_vm8, %v3882_v59, %v3883_v35 }
 0x21c   : > { %v3546_v56 = vadd.f32 %v3545_v39, %v3015_v17  ;;  %v4618_v17 = vrot.slane %v4516_v23, 7  ;;  %4000 = vst [vmem:[#allocation2 + $0x1ec] sm:$0xf] %v3884_v6  ;;  %v6904_v23 = vor.u32 %v7437_v8, %v6901_v2  ;;  %v7441_v6 = vld [vmem:[#allocation2 + $0x1a0] sm:$0xf0] }
 0x21e   : > { %v3645_v47 = vadd.f32 %v3644_v43, %v3546_v56  ;;  %v4210_v43 = vsel %vm9348_vm14, %v4201_v52, %v9604_v60  ;;  %v4619_v55 = vsel %vm9363_vm1, %v4617_v50, %v4618_v17  ;;  %v4620_v30 = vrot.slane %v4618_v17, 4  ;;  %v4038_v56 = vld [vmem:[%s7763_s30 + $0x4c] sm:$0xf]  ;;  %v4039_v52 = vld [vmem:[%s7763_s30 + $0x50] sm:$0xf] }
 0x21f   : > { %v3016_v28 = vpop.f32.mrf.mxu2  ;;  %4480 = vst [vmem:[#allocation2 + $0x1f0] sm:$0xf] %v4210_v43  ;;  %v4213_v33 = vshrl.u32 %v4038_v56, 16  ;;  %v4216_v59 = vshll.u32 %v4038_v56, 16  ;;  %v4223_v50 = vshrl.u32 %v4039_v52, 16  ;;  %v4226_v17 = vshll.u32 %v4039_v52, 16 }
 0x220   : > { %v9628_v16 = vadd.f32 %v3743_v40, %v3645_v47  ;;  %v3017_v3 = vadd.f32 %v3016_v28, %v8695_v44  ;;  %v3649_v36 = vpop.f32.mrf.mxu0  ;;  %v4622_v40 = vsel %vm9363_vm1, %v4620_v30, %v4621_v4  ;;  %4737 = vst [vmem:[#allocation2 + $0x1d0] sm:$0xf] %v4619_v55  ;;  %v3783_v43 = vld [vmem:[%s7763_s30 + $0x4c] sm:$0xf]  ;;  %v6912_v56 = vor.u32 %v7441_v6, %v6911_v49 }
 0x221   : > { %v3748_v9 = vpop.f32.mrf.mxu1  ;;  %4738 = vst [vmem:[#allocation2 + $0x1f4] sm:$0xf] %v4622_v40  ;;  %v4215_v53 = vrot.slane %v4213_v33, 6  ;;  %v4218_v51 = vrot.slane %v4216_v59, 7  ;;  %v3886_v55 = vrot.slane %v3783_v43, 6  ;;  %v4225_v8 = vrot.slane %v4223_v50, 6 }
 0x222   : > { %v4228_v2 = vrot.slane %v4226_v17, 7  ;;  %v9644_v40 = vld [vmem:[%s7763_s30 + $0x50] sm:$0xf]  ;;  %v3885_v59 = vrot.slane %v3883_v35, 4  ;;  %v7183_v17 = vld [vmem:[#allocation2 + $0x178] sm:$0xf] }
 0x223   : > { %v3547_v44 = vpop.f32.mrf.mxu3  ;;  %5539 = vmatmul.bf16.gmra.mxu0 %v6908_v5  ;;  %v4219_v30 = vor.u32 %v4218_v51, %v4215_v53  ;;  %v3888_v52 = vrot.slane %v3886_v55, 4  ;;  %v4211_v53 = vrot.slane %v9604_v60, 4  ;;  %v4623_v49 = vrot.slane %v4621_v4, 4 }
 0x224   : > { %v3548_v39 = vadd.f32 %v3547_v44, %v3017_v3  ;;  %5341 = vmatmul.bf16.gmra.mxu2 %v6900_v18  ;;  %5882 = vmatmul.bf16.gmra.mxu1 %v7180_v26  ;;  %v10365_v18 = vld [vmem:[#allocation6_spill] sm:$0xff]  ;;  %v3887_v43 = vsel %vm8339_vm8, %v3885_v59, %v3886_v55 }
 0x225   : > { %v4221_v51 = vrot.slane %v4219_v30, 4  ;;  %4001 = vst [vmem:[#allocation2 + $0x210] sm:$0xf] %v3887_v43  ;;  %v4220_v60 = vsel %vm9348_vm14, %v4211_v53, %v4219_v30  ;;  %v4040_v53 = vld [vmem:[%s7763_s30 + $0x54] sm:$0xf] }
 0x226   : > { %v3647_v13 = vadd.f32 %v3646_v38, %v3548_v39  ;;  %v7442_v38 = vld [vmem:[#allocation2 + $0x1a8] sm:$0xf0]  ;;  %4481 = vst [vmem:[#allocation2 + $0x214] sm:$0xf] %v4220_v60 }
 0x227   : > { %v3019_v47 = vpop.f32.mrf.mxu2  ;;  %v4518_v39 = vld [vmem:[%s7763_s30 + $0x4c] sm:$0xf]  ;;  %v6920_v33 = vor.u32 %v7442_v38, %v6919_v34 }
 0x228   : > { %v9639_v28 = vadd.f32 %v3745_v46, %v3647_v13  ;;  %5440 = vmatmul.bf16.gmra.mxu3 %v6904_v23  ;;  %v3020_v5 = vadd.f32 %v3019_v47, %v10365_v18  ;;  %v3651_v3 = vpop.f32.mrf.mxu0  ;;  %v9646_v46 = vor.u32 %v4228_v2, %v4225_v8  ;;  %v9652_v13 = vld [vmem:[%s7763_s30 + $0x50] sm:$0xf]  ;;  %v3889_v47 = vrot.slane %v9644_v40, 6  ;;  %v7508_v18 = vld [vmem:[#allocation2 + $0x198] sm:$0xf0] }
 0x229   : > { %v3750_v26 = vpop.f32.mrf.mxu1  ;;  %v10323_v6 = vrot.slane %v9652_v13, 7  ;;  %v7440_v2 = vld [vmem:[#allocation2 + $0x184] sm:$0xf]  ;;  %v7184_v30 = vor.u32 %v7508_v18, %v7183_v17  ;;  %v4041_v18 = vld [vmem:[%s7763_s30 + $0x58] sm:$0xf] }
 0x22a   : > { %v3890_v35 = vsel %vm8339_vm8, %v3888_v52, %v3889_v47  ;;  %v4246_v60 = vshll.u32 %v4041_v18, 16 }
 0x22b   : > { %v3550_v44 = vpop.f32.mrf.mxu3  ;;  %4002 = vst [vmem:[#allocation2 + $0x234] sm:$0xf] %v3890_v35  ;;  %v4243_v35 = vshrl.u32 %v4041_v18, 16  ;;  %v3891_v18 = vrot.slane %v3889_v47, 4 }
 0x22c   : > { %v3551_v23 = vadd.f32 %v3550_v44, %v3020_v5  ;;  %v4624_v5 = vrot.slane %v4518_v39, 7  ;;  %v6913_v44 = vld [vmem:[#allocation2 + $0x1a4] sm:$0xf0] }
 0x22d   : > { %v6916_v52 = vor.u32 %v7440_v2, %v6913_v44 }
 0x22e   : > { %v3650_v50 = vadd.f32 %v3649_v36, %v3551_v23  ;;  %v4230_v36 = vsel %vm9348_vm14, %v4221_v51, %v9646_v46  ;;  %v4625_v38 = vsel %vm9363_vm1, %v4623_v49, %v4624_v5  ;;  %v4626_v55 = vrot.slane %v4624_v5, 4  ;;  %v6923_v49 = vld [vmem:[#allocation2 + $0x1c8] sm:$0xf] }
 0x22f   : > { %v3021_v1 = vpop.f32.mrf.mxu2  ;;  %4482 = vst [vmem:[#allocation2 + $0x238] sm:$0xf] %v4230_v36  ;;  %v4233_v51 = vshrl.u32 %v4040_v53, 16 }
 0x230   : > { %v9670_v34 = vadd.f32 %v3748_v9, %v3650_v50  ;;  %v3022_v4 = vadd.f32 %v3021_v1, %v10366_v32  ;;  %v3654_v8 = vpop.f32.mrf.mxu0  ;;  %v4628_v9 = vsel %vm9363_vm1, %v4626_v55, %v10323_v6  ;;  %4739 = vst [vmem:[#allocation2 + $0x218] sm:$0xf] %v4625_v38  ;;  %v4236_v50 = vshll.u32 %v4040_v53, 16  ;;  %v7444_v32 = vld [vmem:[#allocation2 + $0x1e8] sm:$0xf0] }
 0x231   : > { %v3753_v39 = vpop.f32.mrf.mxu1  ;;  %4740 = vst [vmem:[#allocation2 + $0x23c] sm:$0xf] %v4628_v9  ;;  %v4235_v5 = vrot.slane %v4233_v51, 6  ;;  %v3785_v38 = vld [vmem:[%s7763_s30 + $0x54] sm:$0xf]  ;;  %v4248_v9 = vrot.slane %v4246_v60, 7 }
 0x232   : > { %v4238_v1 = vrot.slane %v4236_v50, 7  ;;  %v3892_v2 = vrot.slane %v3785_v38, 6  ;;  %v4520_v51 = vld [vmem:[%s7763_s30 + $0x54] sm:$0xf]  ;;  %v6924_v50 = vor.u32 %v7444_v32, %v6923_v49  ;;  %v7187_v38 = vld [vmem:[#allocation2 + $0x1c0] sm:$0xf] }
 0x233   : > { %v3552_v23 = vpop.f32.mrf.mxu3  ;;  %5544 = vmatmul.bf16.gmra.mxu0 %v6920_v33  ;;  %v7509_v6 = vld [vmem:[#allocation2 + $0x1e0] sm:$0xf0]  ;;  %v10369_v49 = vrot.slane %v9652_v13, 7  ;;  %v4630_v32 = vrot.slane %v4520_v51, 7  ;;  %v10371_v13 = vld [vmem:[#allocation9_spill] sm:$0xff] }
 0x234   : > { %v3553_v59 = vadd.f32 %v3552_v23, %v3022_v4  ;;  %5346 = vmatmul.bf16.gmra.mxu2 %v6912_v56  ;;  %5887 = vmatmul.bf16.gmra.mxu1 %v7184_v30  ;;  %v10368_v56 = vld [vmem:[#allocation8_spill] sm:$0xff]  ;;  %v6931_v4 = vld [vmem:[#allocation2 + $0x1d0] sm:$0xf]  ;;  %v4239_v44 = vor.u32 %v4238_v1, %v4235_v5  ;;  %v4245_v30 = vrot.slane %v4243_v35, 6  ;;  %v4231_v1 = vrot.slane %v9646_v46, 4 }
 0x236   : > { %v3652_v17 = vadd.f32 %v3651_v3, %v3553_v59  ;;  %v7445_v3 = vld [vmem:[#allocation2 + $0x1f0] sm:$0xf0]  ;;  %v9686_v59 = vld [vmem:[%s7763_s30 + $0x58] sm:$0xf]  ;;  %v4241_v35 = vrot.slane %v4239_v44, 4  ;;  %v4240_v46 = vsel %vm9348_vm14, %v4231_v1, %v4239_v44  ;;  %v7188_v44 = vor.u32 %v7509_v6, %v7187_v38 }
 0x237   : > { %v3024_v43 = vpop.f32.mrf.mxu2  ;;  %v3895_v5 = vrot.slane %v9686_v59, 6  ;;  %4483 = vst [vmem:[#allocation2 + $0x25c] sm:$0xf] %v4240_v46 }
 0x238   : > { %v9681_v36 = vadd.f32 %v3750_v26, %v3652_v17  ;;  %5445 = vmatmul.bf16.gmra.mxu3 %v6916_v52  ;;  %v3025_v33 = vadd.f32 %v3024_v43, %v10368_v56  ;;  %v3656_v55 = vpop.f32.mrf.mxu0  ;;  %v9688_v26 = vor.u32 %v4248_v9, %v4245_v30  ;;  %v6932_v17 = vor.u32 %v7445_v3, %v6931_v4  ;;  %v9694_v43 = vld [vmem:[%s7763_s30 + $0x58] sm:$0xf] }
 0x239   : > { %v3755_v23 = vpop.f32.mrf.mxu1  ;;  %v3894_v56 = vrot.slane %v3892_v2, 4  ;;  %v3893_v30 = vsel %vm8339_vm8, %v3891_v18, %v3892_v2  ;;  %v10324_v4 = vrot.slane %v9694_v43, 7  ;;  %v6925_v18 = vld [vmem:[#allocation2 + $0x1ec] sm:$0xf0] }
 0x23a   : > { %10367 = vst [vmem:[#allocation6_spill] sm:$0xff] %v9681_v36 }
 0x23b   : > { %v3555_v53 = vpop.f32.mrf.mxu3  ;;  %v3896_v47 = vsel %vm8339_vm8, %v3894_v56, %v3895_v5  ;;  %4003 = vst [vmem:[#allocation2 + $0x258] sm:$0xf] %v3893_v30  ;;  %v4042_v30 = vld [vmem:[%s7763_s30 + $0x5c] sm:$0xf] }
 0x23c   : > { %v3556_v52 = vadd.f32 %v3555_v53, %v3025_v33  ;;  %v4629_v33 = vrot.slane %v10369_v49, 4  ;;  %4004 = vst [vmem:[#allocation2 + $0x27c] sm:$0xf] %v3896_v47  ;;  %v4632_v53 = vrot.slane %v4630_v32, 4  ;;  %v4253_v6 = vshrl.u32 %v4042_v30, 16 }
 0x23d   : > { %v4256_v38 = vshll.u32 %v4042_v30, 16 }
 0x23e   : > { %v3655_v60 = vadd.f32 %v3654_v8, %v3556_v52  ;;  %v4250_v8 = vsel %vm9348_vm14, %v4241_v35, %v9688_v26  ;;  %v4631_v9 = vsel %vm9363_vm1, %v4629_v33, %v4630_v32  ;;  %v7443_v52 = vld [vmem:[#allocation2 + $0x1cc] sm:$0xf]  ;;  %v4043_v33 = vld [vmem:[%s7763_s30 + $0x60] sm:$0xf]  ;;  %v4255_v47 = vrot.slane %v4253_v6, 6 }
 0x23f   : > { %v3026_v40 = vpop.f32.mrf.mxu2  ;;  %4484 = vst [vmem:[#allocation2 + $0x280] sm:$0xf] %v4250_v8  ;;  %v4258_v46 = vrot.slane %v4256_v38, 7  ;;  %v4263_v8 = vshrl.u32 %v4043_v33, 16  ;;  %v9728_v6 = vld [vmem:[%s7763_s30 + $0x60] sm:$0xf] }
 0x240   : > { %v9712_v3 = vadd.f32 %v3753_v39, %v3655_v60  ;;  %v3027_v2 = vadd.f32 %v3026_v40, %v10371_v13  ;;  %v3659_v51 = vpop.f32.mrf.mxu0  ;;  %v4634_v39 = vsel %vm9363_vm1, %v4632_v53, %v10324_v4  ;;  %4741 = vst [vmem:[#allocation2 + $0x260] sm:$0xf] %v4631_v9  ;;  %v6928_v60 = vor.u32 %v7443_v52, %v6925_v18  ;;  %v6935_v40 = vld [vmem:[#allocation2 + $0x210] sm:$0xf]  ;;  %v6943_v53 = vld [vmem:[#allocation2 + $0x218] sm:$0xf] }
 0x241   : > { %v3758_v56 = vpop.f32.mrf.mxu1  ;;  %4742 = vst [vmem:[#allocation2 + $0x284] sm:$0xf] %v4634_v39  ;;  %v4266_v13 = vshll.u32 %v4043_v33, 16  ;;  %v3787_v52 = vld [vmem:[%s7763_s30 + $0x5c] sm:$0xf]  ;;  %v4259_v39 = vor.u32 %v4258_v46, %v4255_v47  ;;  %v3901_v47 = vrot.slane %v9728_v6, 6 }
 0x242   : > { %10370 = vst [vmem:[#allocation7_spill] sm:$0xff] %v9712_v3  ;;  %v9736_v4 = vld [vmem:[%s7763_s30 + $0x60] sm:$0xf]  ;;  %v4251_v46 = vrot.slane %v9688_v26, 4  ;;  %v7510_v3 = vld [vmem:[#allocation2 + $0x228] sm:$0xf0] }
 0x243   : > { %v3557_v1 = vpop.f32.mrf.mxu3  ;;  %5549 = vmatmul.bf16.gmra.mxu0 %v6932_v17 }
 0x244   : > { %v3558_v35 = vadd.f32 %v3557_v1, %v3027_v2  ;;  %5351 = vmatmul.bf16.gmra.mxu2 %v6924_v50  ;;  %5892 = vmatmul.bf16.gmra.mxu1 %v7188_v44  ;;  %v10373_v50 = vld [vmem:[#allocation10_spill] sm:$0xff]  ;;  %v3898_v44 = vrot.slane %v3787_v52, 6  ;;  %v4265_v1 = vrot.slane %v4263_v8, 6  ;;  %v4261_v8 = vrot.slane %v4259_v39, 4  ;;  %v7191_v52 = vld [vmem:[#allocation2 + $0x208] sm:$0xf] }
 0x245   : > { %v7447_v2 = vld [vmem:[#allocation2 + $0x230] sm:$0xf0]  ;;  %v4260_v26 = vsel %vm9348_vm14, %v4251_v46, %v4259_v39  ;;  %v7192_v39 = vor.u32 %v7510_v3, %v7191_v52 }
 0x246   : > { %v3657_v49 = vadd.f32 %v3656_v55, %v3558_v35  ;;  %v7448_v55 = vld [vmem:[#allocation2 + $0x238] sm:$0xf0]  ;;  %v4268_v35 = vrot.slane %v4266_v13, 7  ;;  %v6936_v33 = vor.u32 %v7447_v2, %v6935_v40  ;;  %v10374_v40 = vrot.slane %v9694_v43, 7  ;;  %4485 = vst [vmem:[#allocation2 + $0x2a4] sm:$0xf] %v4260_v26 }
 0x247   : > { %v3029_v32 = vpop.f32.mrf.mxu2  ;;  %v10376_v43 = vld [vmem:[#allocation11_spill] sm:$0xff] }
 0x248   : > { %v9723_v9 = vadd.f32 %v3755_v23, %v3657_v49  ;;  %5450 = vmatmul.bf16.gmra.mxu3 %v6928_v60  ;;  %v3030_v17 = vadd.f32 %v3029_v32, %v10373_v50  ;;  %v3661_v18 = vpop.f32.mrf.mxu0  ;;  %v9730_v23 = vor.u32 %v4268_v35, %v4265_v1  ;;  %v4522_v49 = vld [vmem:[%s7763_s30 + $0x5c] sm:$0xf]  ;;  %v6944_v32 = vor.u32 %v7448_v55, %v6943_v53 }
 0x249   : > { %v3760_v30 = vpop.f32.mrf.mxu1  ;;  %v3897_v50 = vrot.slane %v3895_v5, 4  ;;  %v4636_v2 = vrot.slane %v4522_v49, 7  ;;  %v10325_v53 = vrot.slane %v9736_v4, 7  ;;  %v7446_v49 = vld [vmem:[#allocation2 + $0x214] sm:$0xf] }
 0x24a   : > { %10372 = vst [vmem:[#allocation8_spill] sm:$0xff] %v9723_v9  ;;  %v3900_v9 = vrot.slane %v3898_v44, 4 }
 0x24b   : > { %v3560_v38 = vpop.f32.mrf.mxu3  ;;  %v3899_v1 = vsel %vm8339_vm8, %v3897_v50, %v3898_v44 }
 0x24c   : > { %v3561_v60 = vadd.f32 %v3560_v38, %v3030_v17  ;;  %v4635_v17 = vrot.slane %v10374_v40, 4  ;;  %v3902_v5 = vsel %vm8339_vm8, %v3900_v9, %v3901_v47  ;;  %4005 = vst [vmem:[#allocation2 + $0x2a0] sm:$0xf] %v3899_v1  ;;  %v4638_v38 = vrot.slane %v4636_v2, 4  ;;  %v4044_v1 = vld [vmem:[%s7763_s30 + $0x64] sm:$0xf] }
 0x24d   : > { %4006 = vst [vmem:[#allocation2 + $0x2c4] sm:$0xf] %v3902_v5  ;;  %v4273_v3 = vshrl.u32 %v4044_v1, 16  ;;  %v4276_v52 = vshll.u32 %v4044_v1, 16 }
 0x24e   : > { %v3660_v13 = vadd.f32 %v3659_v51, %v3561_v60  ;;  %v4270_v51 = vsel %vm9348_vm14, %v4261_v8, %v9730_v23  ;;  %v4637_v35 = vsel %vm9363_vm1, %v4635_v17, %v4636_v2  ;;  %v6937_v60 = vld [vmem:[#allocation2 + $0x234] sm:$0xf0]  ;;  %v4045_v17 = vld [vmem:[%s7763_s30 + $0x68] sm:$0xf] }
 0x24f   : > { %v3031_v59 = vpop.f32.mrf.mxu2  ;;  %4486 = vst [vmem:[#allocation2 + $0x2c8] sm:$0xf] %v4270_v51  ;;  %v4275_v5 = vrot.slane %v4273_v3, 6  ;;  %v4278_v26 = vrot.slane %v4276_v52, 7  ;;  %v4283_v51 = vshrl.u32 %v4045_v17, 16 }
 0x250   : > { %v9754_v55 = vadd.f32 %v3758_v56, %v3660_v13  ;;  %v3032_v44 = vadd.f32 %v3031_v59, %v10376_v43  ;;  %v3664_v9 = vpop.f32.mrf.mxu0  ;;  %v4640_v56 = vsel %vm9363_vm1, %v4638_v38, %v10325_v53  ;;  %4743 = vst [vmem:[#allocation2 + $0x2a8] sm:$0xf] %v4637_v35  ;;  %v6940_v13 = vor.u32 %v7446_v49, %v6937_v60  ;;  %v6947_v59 = vld [vmem:[#allocation2 + $0x258] sm:$0xf]  ;;  %v6955_v38 = vld [vmem:[#allocation2 + $0x260] sm:$0xf] }
 0x251   : > { %v3763_v50 = vpop.f32.mrf.mxu1  ;;  %4744 = vst [vmem:[#allocation2 + $0x2cc] sm:$0xf] %v4640_v56  ;;  %v4286_v43 = vshll.u32 %v4045_v17, 16  ;;  %v3789_v49 = vld [vmem:[%s7763_s30 + $0x64] sm:$0xf]  ;;  %v4279_v56 = vor.u32 %v4278_v26, %v4275_v5  ;;  %v4271_v26 = vrot.slane %v9730_v23, 4 }
 0x252   : > { %10375 = vst [vmem:[#allocation9_spill] sm:$0xff] %v9754_v55  ;;  %v9770_v3 = vld [vmem:[%s7763_s30 + $0x68] sm:$0xf]  ;;  %v7511_v55 = vld [vmem:[#allocation2 + $0x270] sm:$0xf0] }
 0x253   : > { %v3562_v46 = vpop.f32.mrf.mxu3  ;;  %5554 = vmatmul.bf16.gmra.mxu0 %v6944_v32  ;;  %v9778_v53 = vld [vmem:[%s7763_s30 + $0x68] sm:$0xf]  ;;  %v3907_v5 = vrot.slane %v9770_v3, 6  ;;  %v4280_v23 = vsel %vm9348_vm14, %v4271_v26, %v4279_v56 }
 0x254   : > { %v3563_v8 = vadd.f32 %v3562_v46, %v3032_v44  ;;  %5356 = vmatmul.bf16.gmra.mxu2 %v6936_v33  ;;  %5897 = vmatmul.bf16.gmra.mxu1 %v7192_v39  ;;  %v10378_v33 = vld [vmem:[#allocation12_spill] sm:$0xff]  ;;  %v7450_v44 = vld [vmem:[#allocation2 + $0x278] sm:$0xf0]  ;;  %v3904_v39 = vrot.slane %v3789_v49, 6  ;;  %v4285_v46 = vrot.slane %v4283_v51, 6  ;;  %v4281_v51 = vrot.slane %v4279_v56, 4 }
 0x255   : > { %v6948_v17 = vor.u32 %v7450_v44, %v6947_v59  ;;  %v7195_v49 = vld [vmem:[#allocation2 + $0x250] sm:$0xf]  ;;  %v10379_v59 = vrot.slane %v9736_v4, 7  ;;  %v10381_v4 = vld [vmem:[#allocation13_spill] sm:$0xff]  ;;  %4487 = vst [vmem:[#allocation2 + $0x2ec] sm:$0xf] %v4280_v23 }
 0x256   : > { %v3662_v40 = vadd.f32 %v3661_v18, %v3563_v8  ;;  %v7451_v18 = vld [vmem:[#allocation2 + $0x280] sm:$0xf0]  ;;  %v4288_v8 = vrot.slane %v4286_v43, 7  ;;  %v7196_v56 = vor.u32 %v7511_v55, %v7195_v49 }
 0x257   : > { %v3034_v2 = vpop.f32.mrf.mxu2 }
 0x258   : > { %v9765_v35 = vadd.f32 %v3760_v30, %v3662_v40  ;;  %5455 = vmatmul.bf16.gmra.mxu3 %v6940_v13  ;;  %v3035_v32 = vadd.f32 %v3034_v2, %v10378_v33  ;;  %v3666_v60 = vpop.f32.mrf.mxu0  ;;  %v9772_v30 = vor.u32 %v4288_v8, %v4285_v46  ;;  %v4524_v40 = vld [vmem:[%s7763_s30 + $0x64] sm:$0xf]  ;;  %v6956_v2 = vor.u32 %v7451_v18, %v6955_v38 }
 0x259   : > { %v3765_v1 = vpop.f32.mrf.mxu1  ;;  %v3903_v33 = vrot.slane %v3901_v47, 4  ;;  %v4642_v44 = vrot.slane %v4524_v40, 7  ;;  %v4645_v38 = vrot.slane %v9778_v53, 7  ;;  %v7449_v40 = vld [vmem:[#allocation2 + $0x25c] sm:$0xf] }
 0x25a   : > { %10377 = vst [vmem:[#allocation10_spill] sm:$0xff] %v9765_v35  ;;  %v3906_v35 = vrot.slane %v3904_v39, 4 }
 0x25b   : > { %v3565_v52 = vpop.f32.mrf.mxu3  ;;  %v3905_v46 = vsel %vm8339_vm8, %v3903_v33, %v3904_v39  ;;  %v4647_v3 = vrot.slane %v4645_v38, 4 }
 0x25c   : > { %v3566_v13 = vadd.f32 %v3565_v52, %v3035_v32  ;;  %v4641_v32 = vrot.slane %v10379_v59, 4  ;;  %v3908_v47 = vsel %vm8339_vm8, %v3906_v35, %v3907_v5  ;;  %4007 = vst [vmem:[#allocation2 + $0x2e8] sm:$0xf] %v3905_v46  ;;  %v4644_v52 = vrot.slane %v4642_v44, 4  ;;  %v4046_v46 = vld [vmem:[%s7763_s30 + $0x6c] sm:$0xf] }
 0x25d   : > { %4008 = vst [vmem:[#allocation2 + $0x30c] sm:$0xf] %v3908_v47  ;;  %v4293_v55 = vshrl.u32 %v4046_v46, 16  ;;  %v4296_v49 = vshll.u32 %v4046_v46, 16  ;;  %v9824_v46 = vld [vmem:[%s9484_s6] ss:$0 sm:$0xff] }
 0x25e   : > { %v3665_v43 = vadd.f32 %v3664_v9, %v3566_v13  ;;  %v4290_v9 = vsel %vm9348_vm14, %v4281_v51, %v9772_v30  ;;  %v4643_v8 = vsel %vm9363_vm1, %v4641_v32, %v4642_v44  ;;  %v6949_v13 = vld [vmem:[#allocation2 + $0x27c] sm:$0xf0]  ;;  %v4047_v32 = vld [vmem:[%s7763_s30 + $0x70] sm:$0xf] }
 0x25f   : > { %v3036_v6 = vpop.f32.mrf.mxu2  ;;  %4488 = vst [vmem:[#allocation2 + $0x310] sm:$0xf] %v4290_v9  ;;  %v4298_v47 = vrot.slane %v4296_v49, 7  ;;  %v4303_v23 = vshrl.u32 %v4047_v32, 16  ;;  %v4306_v9 = vshll.u32 %v4047_v32, 16 }
 0x260   : > { %v9796_v18 = vadd.f32 %v3763_v50, %v3665_v43  ;;  %v3037_v39 = vadd.f32 %v3036_v6, %v10381_v4  ;;  %v5520_v35 = vpop.f32.mrf.mxu0  ;;  %v4646_v50 = vsel %vm9363_vm1, %v4644_v52, %v4645_v38  ;;  %4745 = vst [vmem:[#allocation2 + $0x2f0] sm:$0xf] %v4643_v8  ;;  %v6952_v43 = vor.u32 %v7449_v40, %v6949_v13  ;;  %v7453_v8 = vld [vmem:[#allocation2 + $0x2c0] sm:$0xf0]  ;;  %v6967_v49 = vld [vmem:[#allocation2 + $0x2a8] sm:$0xf] }
 0x261   : > { %v9801_v33 = vpop.f32.mrf.mxu1  ;;  %4746 = vst [vmem:[#allocation2 + $0x314] sm:$0xf] %v4646_v50  ;;  %v4295_v6 = vrot.slane %v4293_v55, 6  ;;  %v4305_v40 = vrot.slane %v4303_v23, 6  ;;  %v4308_v13 = vrot.slane %v4306_v9, 7  ;;  %v4291_v9 = vrot.slane %v9772_v30, 4 }
 0x262   : > { %10380 = vst [vmem:[#allocation11_spill] sm:$0xff] %v9796_v18  ;;  %v9817_v50 = vld [vmem:[%s7763_s30 + $0x70] sm:$0xf] }
 0x263   : > { %v3567_v26 = vpop.f32.mrf.mxu3  ;;  %5559 = vmatmul.bf16.gmra.mxu0 %v6956_v2  ;;  %v3791_v2 = vld [vmem:[%s7763_s30 + $0x6c] sm:$0xf]  ;;  %v4299_v52 = vor.u32 %v4298_v47, %v4295_v6  ;;  %v9829_v32 = vld [vmem:[%s7763_s30 + $0x70] sm:$0xf]  ;;  %v10326_v23 = vrot.slane %v9817_v50, 6 }
 0x264   : > { %v3568_v51 = vadd.f32 %v3567_v26, %v3037_v39  ;;  %5361 = vmatmul.bf16.gmra.mxu2 %v6948_v17  ;;  %5902 = vmatmul.bf16.gmra.mxu1 %v7196_v56  ;;  %v6959_v17 = vld [vmem:[#allocation2 + $0x2a0] sm:$0xf]  ;;  %v7454_v6 = vld [vmem:[#allocation2 + $0x2c8] sm:$0xf0] }
 0x265   : > { %v6960_v55 = vor.u32 %v7453_v8, %v6959_v17  ;;  %v4300_v30 = vsel %vm9348_vm14, %v4291_v9, %v4299_v52  ;;  %v6968_v38 = vor.u32 %v7454_v6, %v6967_v49 }
 0x266   : > { %v3667_v59 = vadd.f32 %v3666_v60, %v3568_v51  ;;  %v3910_v60 = vrot.slane %v3791_v2, 6  ;;  %v4526_v51 = vld [vmem:[%s7763_s30 + $0x6c] sm:$0xf]  ;;  %v4301_v2 = vrot.slane %v4299_v52, 4  ;;  %v6961_v52 = vld [vmem:[#allocation2 + $0x2c4] sm:$0xf0] }
 0x267   : > { %v5322_v44 = vpop.f32.mrf.mxu2  ;;  %4489 = vst [vmem:[#allocation2 + $0x334] sm:$0xf] %v4300_v30 }
 0x268   : > { %v9809_v4 = vadd.f32 %v3765_v1, %v3667_v59  ;;  %5460 = vmatmul.bf16.gmra.mxu3 %v6952_v43  ;;  %v9812_v39 = vpop.f32.mrf.mxu0  ;;  %v9819_v1 = vor.u32 %v4308_v13, %v4305_v40  ;;  %v3909_v59 = vrot.slane %v3907_v5, 4  ;;  %v3912_v47 = vrot.slane %v3910_v60, 4  ;;  %v7512_v13 = vld [vmem:[#allocation2 + $0x2b8] sm:$0xf0] }
 0x269   : > { %v9814_v56 = vpop.f32.mrf.mxu1  ;;  %v4648_v5 = vrot.slane %v4526_v51, 7 }
 0x26a   : > { %10382 = vst [vmem:[#allocation12_spill] sm:$0xff] %v9809_v4  ;;  %v3911_v17 = vsel %vm8339_vm8, %v3909_v59, %v3910_v60  ;;  %v10327_v60 = vrot.slane %v9829_v32, 7 }
 0x26b   : > { %v5421_v26 = vpop.f32.mrf.mxu3  ;;  %4009 = vst [vmem:[#allocation2 + $0x330] sm:$0xf] %v3911_v17  ;;  %v4649_v51 = vsel %vm9363_vm1, %v4647_v3, %v4648_v5  ;;  %v9856_v17 = vld [vmem:[%s9500_s9] ss:$0 sm:$0xff] }
 0x26c   : > { %v5422_v43 = vadd.f32 %v5421_v26, %v5322_v44  ;;  %v7199_v44 = vld [vmem:[#allocation2 + $0x298] sm:$0xf]  ;;  %v3914_v26 = vsel %vm8339_vm8, %v3912_v47, %v10326_v23  ;;  %v7452_v47 = vld [vmem:[#allocation2 + $0x2a4] sm:$0xf]  ;;  %4747 = vst [vmem:[#allocation2 + $0x338] sm:$0xf] %v4649_v51 }
 0x26d   : > { %4010 = vst [vmem:[#allocation2 + $0x354] sm:$0xf] %v3914_v26  ;;  %v7200_v9 = vor.u32 %v7512_v13, %v7199_v44  ;;  %v6964_v44 = vor.u32 %v7452_v47, %v6961_v52  ;;  %v4048_v13 = vld [vmem:[%s7763_s30 + $0x74] sm:$0xf] }
 0x26e   : > { %v5521_v40 = vadd.f32 %v5520_v35, %v5422_v43  ;;  %v4310_v35 = vsel %vm9348_vm14, %v4301_v2, %v9819_v1  ;;  %v4650_v43 = vrot.slane %v4648_v5, 4  ;;  %v4313_v3 = vshrl.u32 %v4048_v13, 16 }
 0x26f   : > { %v5324_v8 = vpop.f32.mrf.mxu2  ;;  %4490 = vst [vmem:[#allocation2 + $0x358] sm:$0xf] %v4310_v35  ;;  %v4316_v5 = vshll.u32 %v4048_v13, 16  ;;  %v4049_v35 = vld [vmem:[%s7763_s30 + $0x78] sm:$0xf] }
 0x270   : > { %v5610_v53 = vadd.f32 %v5521_v40, %v8947_v27  ;;  %v5525_v59 = vpop.f32.mrf.mxu0  ;;  %v4652_v27 = vsel %vm9363_vm1, %v4650_v43, %v10327_v60  ;;  %v4315_v51 = vrot.slane %v4313_v3, 6  ;;  %v3793_v43 = vld [vmem:[%s7763_s30 + $0x74] sm:$0xf]  ;;  %v6971_v13 = vld [vmem:[#allocation2 + $0x2e8] sm:$0xf] }
 0x271   : > { %v9858_v23 = vpop.f32.mrf.mxu1  ;;  %4748 = vst [vmem:[#allocation2 + $0x35c] sm:$0xf] %v4652_v27  ;;  %v3916_v52 = vrot.slane %v3793_v43, 6  ;;  %v7456_v3 = vld [vmem:[#allocation2 + $0x308] sm:$0xf0] }
 0x272   : > { %v5957_v2 = vmul.f32 %v9824_v46, %v5610_v53 }
 0x273   : > { %v5423_v49 = vpop.f32.mrf.mxu3  ;;  %5564 = vmatmul.bf16.gmra.mxu0 %v6968_v38 }
 0x274   : > { %v5993_v6 = vadd.f32 %v5957_v2, %v9801_v33  ;;  %v5424_v40 = vadd.f32 %v5423_v49, %v5324_v8  ;;  %5366 = vmatmul.bf16.gmra.mxu2 %v6960_v55  ;;  %5907 = vmatmul.bf16.gmra.mxu1 %v7200_v9  ;;  %v4318_v33 = vrot.slane %v4316_v5, 7  ;;  %v4323_v8 = vshrl.u32 %v4049_v35, 16  ;;  %v9881_v49 = vld [vmem:[%s7763_s30 + $0x78] sm:$0xf]  ;;  %v6979_v5 = vld [vmem:[#allocation2 + $0x2f0] sm:$0xf] }
 0x275   : > { %v4326_v55 = vshll.u32 %v4049_v35, 16  ;;  %v4528_v35 = vld [vmem:[%s7763_s30 + $0x74] sm:$0xf]  ;;  %v3919_v43 = vrot.slane %v9881_v49, 6 }
 0x276   : > { %v6033_v26 = vadd.f32 %v9856_v17, %v5993_v6  ;;  %v5523_v30 = vadd.f32 %v9812_v39, %v5424_v40  ;;  %v4325_v39 = vrot.slane %v4323_v8, 6  ;;  %v4319_v6 = vor.u32 %v4318_v33, %v4315_v51  ;;  %v9892_v33 = vld [vmem:[%s7763_s30 + $0x78] sm:$0xf] }
 0x277   : > { %v5327_v53 = vpop.f32.mrf.mxu2  ;;  %v4328_v9 = vrot.slane %v4326_v55, 7  ;;  %v10383_v8 = vrot.slane %v9817_v50, 6  ;;  %v4311_v51 = vrot.slane %v9819_v1, 4  ;;  %v6972_v50 = vor.u32 %v7456_v3, %v6971_v13  ;;  %v6973_v3 = vld [vmem:[#allocation2 + $0x30c] sm:$0xf0] }
 0x278   : > { %6069 = vst [vmem:[%s9870_s12] sm:$0xff] %v6033_v26  ;;  %v5611_v38 = vadd.f32 %v5523_v30, %v8969_v10  ;;  %5465 = vmatmul.bf16.gmra.mxu3 %v6964_v44  ;;  %v9875_v47 = vpop.f32.mrf.mxu0  ;;  %v7457_v26 = vld [vmem:[#allocation2 + $0x310] sm:$0xf0]  ;;  %v4654_v18 = vrot.slane %v4528_v35, 7 }
 0x279   : > { %v9878_v27 = vpop.f32.mrf.mxu1  ;;  %v9884_v30 = vor.u32 %v4328_v9, %v4325_v39  ;;  %v3915_v55 = vrot.slane %v10383_v8, 4  ;;  %v10384_v39 = vrot.slane %v9829_v32, 7  ;;  %v4320_v32 = vsel %vm9348_vm14, %v4311_v51, %v4319_v6 }
 0x27a   : > { %v5958_v2 = vmul.f32 %v9824_v46, %v5611_v38  ;;  %v3918_v38 = vrot.slane %v3916_v52, 4  ;;  %v4656_v35 = vrot.slane %v4654_v18, 4  ;;  %4491 = vst [vmem:[#allocation2 + $0x37c] sm:$0xf] %v4320_v32 }
 0x27b   : > { %v5426_v40 = vpop.f32.mrf.mxu3  ;;  %v4653_v9 = vrot.slane %v10384_v39, 4  ;;  %v3917_v8 = vsel %vm8339_vm8, %v3915_v55, %v3916_v52  ;;  %v4657_v39 = vrot.slane %v9892_v33, 7 }
 0x27c   : > { %v5994_v10 = vadd.f32 %v5958_v2, %v9814_v56  ;;  %v5427_v44 = vadd.f32 %v5426_v40, %v5327_v53  ;;  %v7203_v53 = vld [vmem:[#allocation2 + $0x2e0] sm:$0xf]  ;;  %v7513_v2 = vld [vmem:[#allocation2 + $0x300] sm:$0xf0]  ;;  %v4321_v40 = vrot.slane %v4319_v6, 4  ;;  %v3920_v1 = vsel %vm8339_vm8, %v3918_v38, %v3919_v43 }
 0x27d   : > { %v7204_v36 = vor.u32 %v7513_v2, %v7203_v53  ;;  %4011 = vst [vmem:[#allocation2 + $0x378] sm:$0xf] %v3917_v8  ;;  %v4655_v6 = vsel %vm9363_vm1, %v4653_v9, %v4654_v18  ;;  %v4051_v9 = vld [vmem:[%s7763_s30 + $0x80] sm:$0xf] }
 0x27e   : > { %v6034_v60 = vadd.f32 %v9856_v17, %v5994_v10  ;;  %v5526_v56 = vadd.f32 %v5525_v59, %v5427_v44  ;;  %v7455_v10 = vld [vmem:[#allocation2 + $0x2ec] sm:$0xf]  ;;  %v6980_v44 = vor.u32 %v7457_v26, %v6979_v5  ;;  %v4330_v52 = vsel %vm9348_vm14, %v4321_v40, %v9884_v30  ;;  %4012 = vst [vmem:[#allocation2 + $0x39c] sm:$0xf] %v3920_v1 }
 0x27f   : > { %v5329_v4 = vpop.f32.mrf.mxu2  ;;  %v4658_v26 = vsel %vm9363_vm1, %v4656_v35, %v4657_v39  ;;  %v6976_v51 = vor.u32 %v7455_v10, %v6973_v3  ;;  %4492 = vst [vmem:[#allocation2 + $0x3a0] sm:$0xf] %v4330_v52  ;;  %v4343_v8 = vshrl.u32 %v4051_v9, 16  ;;  %v4346_v1 = vshll.u32 %v4051_v9, 16  ;;  %v9934_v35 = vld [vmem:[%s7763_s30 + $0x80] sm:$0xf] }
 0x280   : > { %6070 = vst [vmem:[%s9870_s12 + $0x8] sm:$0xff] %v6034_v60  ;;  %v5612_v59 = vadd.f32 %v5526_v56, %v9001_v25  ;;  %v5530_v13 = vpop.f32.mrf.mxu0  ;;  %v4050_v56 = vld [vmem:[%s7763_s30 + $0x7c] sm:$0xf]  ;;  %v4331_v9 = vrot.slane %v9884_v30, 4 }
 0x281   : > { %v9912_v25 = vpop.f32.mrf.mxu1  ;;  %4749 = vst [vmem:[#allocation2 + $0x380] sm:$0xf] %v4655_v6  ;;  %v4333_v18 = vshrl.u32 %v4050_v56, 16  ;;  %v4336_v53 = vshll.u32 %v4050_v56, 16  ;;  %v4345_v32 = vrot.slane %v4343_v8, 6  ;;  %v4348_v3 = vrot.slane %v4346_v1, 7 }
 0x282   : > { %v5959_v60 = vmul.f32 %v9824_v46, %v5612_v59  ;;  %4750 = vst [vmem:[#allocation2 + $0x3a4] sm:$0xf] %v4658_v26  ;;  %v7459_v26 = vld [vmem:[#allocation2 + $0x350] sm:$0xf0]  ;;  %v7207_v8 = vld [vmem:[#allocation2 + $0x328] sm:$0xf] }
 0x283   : > { %v5428_v5 = vpop.f32.mrf.mxu3  ;;  %5569 = vmatmul.bf16.gmra.mxu0 %v6980_v44  ;;  %v9937_v56 = vor.u32 %v4348_v3, %v4345_v32  ;;  %v7514_v1 = vld [vmem:[#allocation2 + $0x348] sm:$0xf0]  ;;  %v7458_v32 = vld [vmem:[#allocation2 + $0x334] sm:$0xf] }
 0x284   : > { %v5995_v55 = vadd.f32 %v5959_v60, %v9858_v23  ;;  %v5429_v38 = vadd.f32 %v5428_v5, %v5329_v4  ;;  %5371 = vmatmul.bf16.gmra.mxu2 %v6972_v50  ;;  %5912 = vmatmul.bf16.gmra.mxu1 %v7204_v36  ;;  %v4335_v4 = vrot.slane %v4333_v18, 6  ;;  %v4338_v50 = vrot.slane %v4336_v53, 7  ;;  %v3795_v36 = vld [vmem:[%s7763_s30 + $0x7c] sm:$0xf]  ;;  %v6983_v5 = vld [vmem:[#allocation2 + $0x330] sm:$0xf] }
 0x285   : > { %v3922_v44 = vrot.slane %v3795_v36, 6  ;;  %v4530_v18 = vld [vmem:[%s7763_s30 + $0x7c] sm:$0xf]  ;;  %v3921_v53 = vrot.slane %v3919_v43, 4  ;;  %v4659_v43 = vrot.slane %v4657_v39, 4 }
 0x286   : > { %v6035_v2 = vadd.f32 %v9856_v17, %v5995_v55  ;;  %v5528_v40 = vadd.f32 %v9875_v47, %v5429_v38  ;;  %v4339_v60 = vor.u32 %v4338_v50, %v4335_v4  ;;  %v6991_v38 = vld [vmem:[#allocation2 + $0x338] sm:$0xf]  ;;  %v9945_v4 = vld [vmem:[%s7763_s30 + $0x80] sm:$0xf] }
 0x287   : > { %v5332_v23 = vpop.f32.mrf.mxu2  ;;  %v3923_v49 = vsel %vm8339_vm8, %v3921_v53, %v3922_v44 }
 0x288   : > { %6071 = vst [vmem:[%s9870_s12 + $0x10] sm:$0xff] %v6035_v2  ;;  %v5613_v59 = vadd.f32 %v5528_v40, %v9031_v21  ;;  %5470 = vmatmul.bf16.gmra.mxu3 %v6976_v51  ;;  %v9928_v10 = vpop.f32.mrf.mxu0  ;;  %v7460_v51 = vld [vmem:[#allocation2 + $0x358] sm:$0xf0]  ;;  %v3924_v2 = vrot.slane %v3922_v44, 4  ;;  %v3925_v40 = vrot.slane %v9934_v35, 6  ;;  %v7208_v44 = vor.u32 %v7514_v1, %v7207_v8 }
 0x289   : > { %v9931_v52 = vpop.f32.mrf.mxu1  ;;  %v6992_v3 = vor.u32 %v7460_v51, %v6991_v38  ;;  %4013 = vst [vmem:[#allocation2 + $0x3c0] sm:$0xf] %v3923_v49 }
 0x28a   : > { %v5960_v47 = vmul.f32 %v9824_v46, %v5613_v59  ;;  %v4341_v59 = vrot.slane %v4339_v60, 4  ;;  %v3926_v30 = vsel %vm8339_vm8, %v3924_v2, %v3925_v40 }
 0x28b   : > { %v5431_v6 = vpop.f32.mrf.mxu3  ;;  %4014 = vst [vmem:[#allocation2 + $0x3e4] sm:$0xf] %v3926_v30  ;;  %v3797_v30 = vld [vmem:[%s7763_s30 + $0x84] sm:$0xf] }
 0x28c   : > { %v5996_v21 = vadd.f32 %v5960_v47, %v9878_v27  ;;  %v5432_v55 = vadd.f32 %v5431_v6, %v5332_v23  ;;  %v6984_v23 = vor.u32 %v7459_v26, %v6983_v5  ;;  %v6985_v47 = vld [vmem:[#allocation2 + $0x354] sm:$0xf0]  ;;  %v4340_v6 = vsel %vm9348_vm14, %v4331_v9, %v4339_v60  ;;  %v4052_v9 = vld [vmem:[%s7763_s30 + $0x84] sm:$0xf] }
 0x28d   : > { %v4660_v5 = vrot.slane %v4530_v18, 7  ;;  %v4663_v26 = vrot.slane %v9945_v4, 7  ;;  %v6988_v51 = vor.u32 %v7458_v32, %v6985_v47  ;;  %4493 = vst [vmem:[#allocation2 + $0x3c4] sm:$0xf] %v4340_v6 }
 0x28e   : > { %v6036_v50 = vadd.f32 %v9856_v17, %v5996_v21  ;;  %v5531_v27 = vadd.f32 %v5530_v13, %v5432_v55  ;;  %v4350_v55 = vsel %vm9348_vm14, %v4341_v59, %v9937_v56 }
 0x28f   : > { %v5334_v36 = vpop.f32.mrf.mxu2  ;;  %v4662_v60 = vrot.slane %v4660_v5, 4  ;;  %4494 = vst [vmem:[#allocation2 + $0x3e8] sm:$0xf] %v4350_v55 }
 0x290   : > { %6072 = vst [vmem:[%s9870_s12 + $0x18] sm:$0xff] %v6036_v50  ;;  %v5614_v13 = vadd.f32 %v5531_v27, %v9068_v22  ;;  %v5535_v21 = vpop.f32.mrf.mxu0  ;;  %v4661_v22 = vsel %vm9363_vm1, %v4659_v43, %v4660_v5  ;;  %v4353_v50 = vshrl.u32 %v4052_v9, 16  ;;  %v4356_v27 = vshll.u32 %v4052_v9, 16 }
 0x291   : > { %v9965_v39 = vpop.f32.mrf.mxu1  ;;  %v4664_v2 = vsel %vm9363_vm1, %v4662_v60, %v4663_v26  ;;  %4751 = vst [vmem:[#allocation2 + $0x3c8] sm:$0xf] %v4661_v22  ;;  %v6995_v22 = vld [vmem:[#allocation2 + $0x378] sm:$0xf]  ;;  %v7462_v60 = vld [vmem:[#allocation2 + $0x398] sm:$0xf0] }
 0x292   : > { %v5961_v33 = vmul.f32 %v9824_v46, %v5614_v13  ;;  %4752 = vst [vmem:[#allocation2 + $0x3ec] sm:$0xf] %v4664_v2  ;;  %v4355_v59 = vrot.slane %v4353_v50, 6  ;;  %v3928_v13 = vrot.slane %v3797_v30, 6  ;;  %v4532_v2 = vld [vmem:[%s7763_s30 + $0x84] sm:$0xf] }
 0x293   : > { %v5433_v38 = vpop.f32.mrf.mxu3  ;;  %5574 = vmatmul.bf16.gmra.mxu0 %v6992_v3  ;;  %v3927_v9 = vrot.slane %v3925_v40, 4  ;;  %v4665_v40 = vrot.slane %v4663_v26, 4 }
 0x294   : > { %v5997_v18 = vadd.f32 %v5961_v33, %v9912_v25  ;;  %v5434_v53 = vadd.f32 %v5433_v38, %v5334_v36  ;;  %5376 = vmatmul.bf16.gmra.mxu2 %v6984_v23  ;;  %5917 = vmatmul.bf16.gmra.mxu1 %v7208_v44  ;;  %v4053_v23 = vld [vmem:[%s7763_s30 + $0x88] sm:$0xf]  ;;  %v4358_v36 = vrot.slane %v4356_v27, 7  ;;  %v3930_v50 = vrot.slane %v3928_v13, 4 }
 0x295   : > { %v4363_v32 = vshrl.u32 %v4053_v23, 16  ;;  %v4366_v3 = vshll.u32 %v4053_v23, 16  ;;  %v9987_v44 = vld [vmem:[%s7763_s30 + $0x88] sm:$0xf]  ;;  %v3929_v35 = vsel %vm8339_vm8, %v3927_v9, %v3928_v13  ;;  %v4054_v9 = vld [vmem:[%s7763_s30 + $0x8c] sm:$0xf] }
 0x296   : > { %v6037_v8 = vadd.f32 %v9856_v17, %v5997_v18  ;;  %v5533_v25 = vadd.f32 %v9928_v10, %v5434_v53  ;;  %v4359_v55 = vor.u32 %v4358_v36, %v4355_v59  ;;  %v7463_v18 = vld [vmem:[#allocation2 + $0x3a0] sm:$0xf0]  ;;  %v3931_v27 = vrot.slane %v9987_v44, 6  ;;  %v7211_v59 = vld [vmem:[#allocation2 + $0x370] sm:$0xf] }
 0x297   : > { %v5337_v1 = vpop.f32.mrf.mxu2  ;;  %v4365_v47 = vrot.slane %v4363_v32, 6  ;;  %v4368_v6 = vrot.slane %v4366_v3, 7  ;;  %v7515_v36 = vld [vmem:[#allocation2 + $0x390] sm:$0xf0]  ;;  %4015 = vst [vmem:[#allocation2 + $0x408] sm:$0xf] %v3929_v35 }
 0x298   : > { %6073 = vst [vmem:[%s9870_s12 + $0x20] sm:$0xff] %v6037_v8  ;;  %v5615_v49 = vadd.f32 %v5533_v25, %v9090_v31  ;;  %5475 = vmatmul.bf16.gmra.mxu3 %v6988_v51  ;;  %v9981_v43 = vpop.f32.mrf.mxu0  ;;  %v7003_v51 = vld [vmem:[#allocation2 + $0x380] sm:$0xf]  ;;  %v4351_v8 = vrot.slane %v9937_v56, 4  ;;  %v9998_v25 = vld [vmem:[%s7763_s30 + $0x88] sm:$0xf]  ;;  %v3932_v56 = vsel %vm8339_vm8, %v3930_v50, %v3931_v27  ;;  %v7212_v13 = vor.u32 %v7515_v36, %v7211_v59 }
 0x299   : > { %v9984_v5 = vpop.f32.mrf.mxu1  ;;  %v9990_v53 = vor.u32 %v4368_v6, %v4365_v47  ;;  %v4361_v32 = vrot.slane %v4359_v55, 4  ;;  %v7004_v30 = vor.u32 %v7463_v18, %v7003_v51  ;;  %v6997_v47 = vld [vmem:[#allocation2 + $0x39c] sm:$0xf0]  ;;  %4016 = vst [vmem:[#allocation2 + $0x42c] sm:$0xf] %v3932_v56  ;;  %v4373_v50 = vshrl.u32 %v4054_v9, 16 }
 0x29a   : > { %v5962_v10 = vmul.f32 %v9824_v46, %v5615_v49  ;;  %v7461_v49 = vld [vmem:[#allocation2 + $0x37c] sm:$0xf]  ;;  %v4360_v6 = vsel %vm9348_vm14, %v4351_v8, %v4359_v55  ;;  %v4376_v8 = vshll.u32 %v4054_v9, 16 }
 0x29b   : > { %v5436_v33 = vpop.f32.mrf.mxu3  ;;  %4495 = vst [vmem:[#allocation2 + $0x40c] sm:$0xf] %v4360_v6  ;;  %v4375_v59 = vrot.slane %v4373_v50, 6  ;;  %v10040_v6 = vld [vmem:[%s7763_s30 + $0x90] sm:$0xf]  ;;  %v4371_v50 = vrot.slane %v9990_v53, 4 }
 0x29c   : > { %v5998_v31 = vadd.f32 %v5962_v10, %v9931_v52  ;;  %v5437_v38 = vadd.f32 %v5436_v33, %v5337_v1  ;;  %v6996_v1 = vor.u32 %v7462_v60, %v6995_v22  ;;  %v4666_v10 = vrot.slane %v4532_v2, 7 }
 0x29d   : > { %v4669_v33 = vrot.slane %v9998_v25, 7  ;;  %v4370_v60 = vsel %vm9348_vm14, %v4361_v32, %v9990_v53  ;;  %v4378_v36 = vrot.slane %v4376_v8, 7  ;;  %v3937_v9 = vrot.slane %v10040_v6, 6  ;;  %v10051_v8 = vld [vmem:[%s7763_s30 + $0x90] sm:$0xf] }
 0x29e   : > { %v6038_v23 = vadd.f32 %v9856_v17, %v5998_v31  ;;  %v5536_v52 = vadd.f32 %v5535_v21, %v5437_v38  ;;  %v4668_v55 = vrot.slane %v4666_v10, 4  ;;  %v7000_v38 = vor.u32 %v7461_v49, %v6997_v47  ;;  %4496 = vst [vmem:[#allocation2 + $0x430] sm:$0xf] %v4370_v60  ;;  %v7007_v60 = vld [vmem:[#allocation2 + $0x3c0] sm:$0xf] }
 0x29f   : > { %v5339_v3 = vpop.f32.mrf.mxu2 }
 0x2a0   : > { %6074 = vst [vmem:[%s9870_s12 + $0x28] sm:$0xff] %v6038_v23  ;;  %v5616_v21 = vadd.f32 %v5536_v52, %v9122_v54  ;;  %v5540_v22 = vpop.f32.mrf.mxu0  ;;  %v4667_v54 = vsel %vm9363_vm1, %v4665_v40, %v4666_v10  ;;  %v4670_v2 = vsel %vm9363_vm1, %v4668_v55, %v4669_v33  ;;  %v4055_v52 = vld [vmem:[%s7763_s30 + $0x90] sm:$0xf]  ;;  %v4379_v10 = vor.u32 %v4378_v36, %v4375_v59  ;;  %v7015_v55 = vld [vmem:[#allocation2 + $0x3c8] sm:$0xf] }
 0x2a1   : > { %v10018_v26 = vpop.f32.mrf.mxu1  ;;  %4753 = vst [vmem:[#allocation2 + $0x410] sm:$0xf] %v4667_v54  ;;  %v4383_v32 = vshrl.u32 %v4055_v52, 16 }
 0x2a2   : > { %v5963_v4 = vmul.f32 %v9824_v46, %v5616_v21  ;;  %4754 = vst [vmem:[#allocation2 + $0x434] sm:$0xf] %v4670_v2  ;;  %v4381_v59 = vrot.slane %v4379_v10, 4 }
 0x2a3   : > { %v5438_v31 = vpop.f32.mrf.mxu3  ;;  %5579 = vmatmul.bf16.gmra.mxu0 %v7004_v30  ;;  %v3799_v30 = vld [vmem:[%s7763_s30 + $0x8c] sm:$0xf]  ;;  %v4385_v40 = vrot.slane %v4383_v32, 6  ;;  %v7464_v32 = vld [vmem:[#allocation2 + $0x3c4] sm:$0xf] }
 0x2a4   : > { %v5999_v51 = vadd.f32 %v5963_v4, %v9965_v39  ;;  %v5439_v18 = vadd.f32 %v5438_v31, %v5339_v3  ;;  %5381 = vmatmul.bf16.gmra.mxu2 %v6996_v1  ;;  %5922 = vmatmul.bf16.gmra.mxu1 %v7212_v13  ;;  %v4386_v3 = vshll.u32 %v4055_v52, 16  ;;  %v3934_v56 = vrot.slane %v3799_v30, 6  ;;  %v7465_v4 = vld [vmem:[#allocation2 + $0x3e0] sm:$0xf0]  ;;  %v7466_v31 = vld [vmem:[#allocation2 + $0x3e8] sm:$0xf0] }
 0x2a5   : > { %v7215_v52 = vld [vmem:[#allocation2 + $0x3b8] sm:$0xf]  ;;  %v4380_v30 = vsel %vm9348_vm14, %v4371_v50, %v4379_v10 }
 0x2a6   : > { %v6039_v23 = vadd.f32 %v9856_v17, %v5999_v51  ;;  %v5538_v39 = vadd.f32 %v9981_v43, %v5439_v18  ;;  %v4388_v21 = vrot.slane %v4386_v3, 7  ;;  %v4534_v51 = vld [vmem:[%s7763_s30 + $0x8c] sm:$0xf]  ;;  %v3933_v18 = vrot.slane %v3931_v27, 4  ;;  %4497 = vst [vmem:[#allocation2 + $0x454] sm:$0xf] %v4380_v30 }
 0x2a7   : > { %v5342_v1 = vpop.f32.mrf.mxu2  ;;  %v3936_v2 = vrot.slane %v3934_v56, 4  ;;  %v7016_v3 = vor.u32 %v7466_v31, %v7015_v55  ;;  %v4671_v27 = vrot.slane %v4669_v33, 4  ;;  %v4056_v31 = vld [vmem:[%s7763_s30 + $0x94] sm:$0xf]  ;;  %v4057_v50 = vld [vmem:[%s7763_s30 + $0x98] sm:$0xf] }
 0x2a8   : > { %6075 = vst [vmem:[%s9870_s12 + $0x30] sm:$0xff] %v6039_v23  ;;  %v5617_v49 = vadd.f32 %v5538_v39, %v9152_v11  ;;  %5480 = vmatmul.bf16.gmra.mxu3 %v7000_v38  ;;  %v10034_v35 = vpop.f32.mrf.mxu0  ;;  %v10043_v38 = vor.u32 %v4388_v21, %v4385_v40  ;;  %v7008_v39 = vor.u32 %v7465_v4, %v7007_v60  ;;  %v4672_v40 = vrot.slane %v4534_v51, 7 }
 0x2a9   : > { %v10037_v47 = vpop.f32.mrf.mxu1  ;;  %v3935_v44 = vsel %vm8339_vm8, %v3933_v18, %v3934_v56  ;;  %v3938_v53 = vsel %vm8339_vm8, %v3936_v2, %v3937_v9  ;;  %v4675_v21 = vrot.slane %v10051_v8, 7  ;;  %v4393_v51 = vshrl.u32 %v4056_v31, 16 }
 0x2aa   : > { %v5964_v43 = vmul.f32 %v9824_v46, %v5617_v49  ;;  %v7009_v49 = vld [vmem:[#allocation2 + $0x3e4] sm:$0xf0]  ;;  %4017 = vst [vmem:[#allocation2 + $0x450] sm:$0xf] %v3935_v44  ;;  %v4674_v10 = vrot.slane %v4672_v40, 4  ;;  %v4396_v18 = vshll.u32 %v4056_v31, 16 }
 0x2ab   : > { %v5441_v13 = vpop.f32.mrf.mxu3  ;;  %4018 = vst [vmem:[#allocation2 + $0x474] sm:$0xf] %v3938_v53  ;;  %v7012_v4 = vor.u32 %v7464_v32, %v7009_v49  ;;  %v10104_v31 = vld [vmem:[%s7763_s30 + $0x98] sm:$0xf] }
 0x2ac   : > { %v6000_v11 = vadd.f32 %v5964_v43, %v9984_v5  ;;  %v5442_v54 = vadd.f32 %v5441_v13, %v5342_v1  ;;  %v7516_v1 = vld [vmem:[#allocation2 + $0x3d8] sm:$0xf0]  ;;  %v4390_v13 = vsel %vm9348_vm14, %v4381_v59, %v10043_v38  ;;  %v4676_v55 = vsel %vm9363_vm1, %v4674_v10, %v4675_v21 }
 0x2ad   : > { %v7216_v56 = vor.u32 %v7516_v1, %v7215_v52  ;;  %4498 = vst [vmem:[#allocation2 + $0x478] sm:$0xf] %v4390_v13  ;;  %v4403_v52 = vshrl.u32 %v4057_v50, 16  ;;  %v4406_v1 = vshll.u32 %v4057_v50, 16 }
 0x2ae   : > { %v6040_v23 = vadd.f32 %v9856_v17, %v6000_v11  ;;  %v5541_v5 = vadd.f32 %v5540_v22, %v5442_v54  ;;  %4756 = vst [vmem:[#allocation2 + $0x47c] sm:$0xf] %v4676_v55  ;;  %v4391_v55 = vrot.slane %v10043_v38, 4 }
 0x2af   : > { %v5344_v36 = vpop.f32.mrf.mxu2  ;;  %v4405_v44 = vrot.slane %v4403_v52, 6  ;;  %v4408_v53 = vrot.slane %v4406_v1, 7  ;;  %v7021_v52 = vld [vmem:[#allocation2 + $0x42c] sm:$0xf0] }
 0x2b0   : > { %6076 = vst [vmem:[%s9870_s12 + $0x38] sm:$0xff] %v6040_v23  ;;  %v5618_v22 = vadd.f32 %v5541_v5, %v9188_v7  ;;  %v5545_v43 = vpop.f32.mrf.mxu0  ;;  %v4673_v7 = vsel %vm9363_vm1, %v4671_v27, %v4672_v40  ;;  %v4395_v5 = vrot.slane %v4393_v51, 6  ;;  %v7019_v40 = vld [vmem:[#allocation2 + $0x408] sm:$0xf] }
 0x2b1   : > { %v10071_v33 = vpop.f32.mrf.mxu1  ;;  %4755 = vst [vmem:[#allocation2 + $0x458] sm:$0xf] %v4673_v7  ;;  %v7469_v7 = vld [vmem:[#allocation2 + $0x430] sm:$0xf0]  ;;  %v10096_v10 = vor.u32 %v4408_v53, %v4405_v44 }
 0x2b2   : > { %v5965_v25 = vmul.f32 %v9824_v46, %v5618_v22  ;;  %v10093_v22 = vld [vmem:[%s7763_s30 + $0x98] sm:$0xf] }
 0x2b3   : > { %v5443_v60 = vpop.f32.mrf.mxu3  ;;  %5584 = vmatmul.bf16.gmra.mxu0 %v7016_v3 }
 0x2b4   : > { %v6001_v11 = vadd.f32 %v5965_v25, %v10018_v26  ;;  %v5444_v54 = vadd.f32 %v5443_v60, %v5344_v36  ;;  %5386 = vmatmul.bf16.gmra.mxu2 %v7008_v39  ;;  %5927 = vmatmul.bf16.gmra.mxu1 %v7216_v56  ;;  %v4398_v39 = vrot.slane %v4396_v18, 7  ;;  %v3801_v36 = vld [vmem:[%s7763_s30 + $0x94] sm:$0xf]  ;;  %v7468_v56 = vld [vmem:[#allocation2 + $0x428] sm:$0xf0] }
 0x2b5   : > { %v3940_v3 = vrot.slane %v3801_v36, 6  ;;  %v7027_v25 = vld [vmem:[#allocation2 + $0x410] sm:$0xf]  ;;  %v4536_v60 = vld [vmem:[%s7763_s30 + $0x94] sm:$0xf]  ;;  %v7020_v18 = vor.u32 %v7468_v56, %v7019_v40  ;;  %v4681_v36 = vrot.slane %v10104_v31, 7 }
 0x2b6   : > { %v6041_v2 = vadd.f32 %v9856_v17, %v6001_v11  ;;  %v5543_v26 = vadd.f32 %v10034_v35, %v5444_v54  ;;  %v4399_v49 = vor.u32 %v4398_v39, %v4395_v5  ;;  %v3943_v54 = vrot.slane %v10093_v22, 6  ;;  %v7467_v5 = vld [vmem:[#allocation2 + $0x40c] sm:$0xf] }
 0x2b7   : > { %v5347_v23 = vpop.f32.mrf.mxu2  ;;  %v3942_v11 = vrot.slane %v3940_v3, 4  ;;  %v7028_v39 = vor.u32 %v7469_v7, %v7027_v25 }
 0x2b8   : > { %6077 = vst [vmem:[%s9870_s12 + $0x40] sm:$0xff] %v6041_v2  ;;  %v5619_v59 = vadd.f32 %v5543_v26, %v9211_v63  ;;  %5485 = vmatmul.bf16.gmra.mxu3 %v7012_v4  ;;  %v10087_v32 = vpop.f32.mrf.mxu0  ;;  %v3939_v4 = vrot.slane %v3937_v9, 4  ;;  %v7219_v2 = vld [vmem:[#allocation2 + $0x400] sm:$0xf]  ;;  %v7517_v26 = vld [vmem:[#allocation2 + $0x420] sm:$0xf0]  ;;  %v4400_v1 = vsel %vm9348_vm14, %v4391_v55, %v4399_v49 }
 0x2b9   : > { %v10090_v27 = vpop.f32.mrf.mxu1  ;;  %v4401_v50 = vrot.slane %v4399_v49, 4  ;;  %v3944_v38 = vsel %vm8339_vm8, %v3942_v11, %v3943_v54  ;;  %v4677_v9 = vrot.slane %v4675_v21, 4  ;;  %4499 = vst [vmem:[#allocation2 + $0x49c] sm:$0xf] %v4400_v1  ;;  %v7471_v1 = vld [vmem:[#allocation2 + $0x470] sm:$0xf0] }
 0x2ba   : > { %v5966_v35 = vmul.f32 %v9824_v46, %v5619_v59  ;;  %v3941_v6 = vsel %vm8339_vm8, %v3939_v4, %v3940_v3  ;;  %v4678_v59 = vrot.slane %v4536_v60, 7  ;;  %v7220_v3 = vor.u32 %v7517_v26, %v7219_v2  ;;  %4020 = vst [vmem:[#allocation2 + $0x4bc] sm:$0xf] %v3944_v38  ;;  %v4059_v4 = vld [vmem:[%s7763_s30 + $0xa0] sm:$0x7] }
 0x2bb   : > { %v5446_v30 = vpop.f32.mrf.mxu3  ;;  %4019 = vst [vmem:[#allocation2 + $0x498] sm:$0xf] %v3941_v6  ;;  %v4410_v53 = vsel %vm9348_vm14, %v4401_v50, %v10096_v10  ;;  %v3803_v26 = vld [vmem:[%s7763_s30 + $0x9c] sm:$0xf]  ;;  %v3804_v38 = vld [vmem:[%s7763_s30 + $0xa0] sm:$0x3] }
 0x2bc   : > { %v6002_v63 = vadd.f32 %v5966_v35, %v10037_v47  ;;  %v5447_v13 = vadd.f32 %v5446_v30, %v5347_v23  ;;  %v4680_v35 = vrot.slane %v4678_v59, 4  ;;  %v7024_v30 = vor.u32 %v7467_v5, %v7021_v52  ;;  %4500 = vst [vmem:[#allocation2 + $0x4c0] sm:$0xf] %v4410_v53  ;;  %v7031_v52 = vld [vmem:[#allocation2 + $0x450] sm:$0xf] }
 0x2bd   : > { %v7472_v53 = vld [vmem:[#allocation2 + $0x478] sm:$0xf0] }
 0x2be   : > { %v6042_v51 = vadd.f32 %v9856_v17, %v6002_v63  ;;  %v5546_v47 = vadd.f32 %v5545_v43, %v5447_v13  ;;  %v4682_v63 = vsel %vm9363_vm1, %v4680_v35, %v4681_v36  ;;  %v4058_v13 = vld [vmem:[%s7763_s30 + $0x9c] sm:$0xf]  ;;  %v3945_v35 = vrot.slane %v3943_v54, 4 }
 0x2bf   : > { %v5349_v23 = vpop.f32.mrf.mxu2  ;;  %v4413_v25 = vshrl.u32 %v4058_v13, 16  ;;  %v4416_v7 = vshll.u32 %v4058_v13, 16  ;;  %4758 = vst [vmem:[#allocation2 + $0x4c4] sm:$0xf] %v4682_v63 }
 0x2c0   : > { %6078 = vst [vmem:[%s9870_s12 + $0x48] sm:$0xff] %v6042_v51  ;;  %v5620_v43 = vadd.f32 %v5546_v47, %v9243_v61  ;;  %v5550_v44 = vpop.f32.mrf.mxu0  ;;  %v4679_v61 = vsel %vm9363_vm1, %v4677_v9, %v4678_v59  ;;  %v4423_v47 = vshrl.u32 %v4059_v4, 16 }
 0x2c1   : > { %v10124_v21 = vpop.f32.mrf.mxu1  ;;  %4757 = vst [vmem:[#allocation2 + $0x4a0] sm:$0xf] %v4679_v61  ;;  %v4415_v55 = vrot.slane %v4413_v25, 6  ;;  %v4418_v51 = vrot.slane %v4416_v7, 7  ;;  %v4538_v61 = vld [vmem:[%s7763_s30 + $0x9c] sm:$0xf]  ;;  %v7032_v25 = vor.u32 %v7471_v1, %v7031_v52 }
 0x2c2   : > { %v5967_v8 = vmul.f32 %v9824_v46, %v5620_v43  ;;  %v4425_v5 = vrot.slane %v4423_v47, 6  ;;  %v7223_v7 = vld [vmem:[#allocation2 + $0x448] sm:$0xf]  ;;  %v4684_v47 = vrot.slane %v4538_v61, 7  ;;  %v7474_v61 = vld [vmem:[#allocation2 + $0x4b8] sm:$0xf0] }
 0x2c3   : > { %v5448_v49 = vpop.f32.mrf.mxu3  ;;  %5589 = vmatmul.bf16.gmra.mxu0 %v7028_v39  ;;  %v4419_v9 = vor.u32 %v4418_v51, %v4415_v55 }
 0x2c4   : > { %v6003_v40 = vadd.f32 %v5967_v8, %v10071_v33  ;;  %v5449_v56 = vadd.f32 %v5448_v49, %v5349_v23  ;;  %5391 = vmatmul.bf16.gmra.mxu2 %v7020_v18  ;;  %5932 = vmatmul.bf16.gmra.mxu1 %v7220_v3  ;;  %v4426_v18 = vshll.u32 %v4059_v4, 16  ;;  %v3946_v23 = vrot.slane %v3803_v26, 6  ;;  %v7039_v3 = vld [vmem:[#allocation2 + $0x458] sm:$0xf]  ;;  %v7470_v4 = vld [vmem:[#allocation2 + $0x454] sm:$0xf] }
 0x2c6   : > { %v6043_v60 = vadd.f32 %v9856_v17, %v6003_v40  ;;  %v5548_v33 = vadd.f32 %v10087_v32, %v5449_v56  ;;  %v4428_v39 = vrot.slane %v4426_v18, 7  ;;  %v3948_v49 = vrot.slane %v3946_v23, 4  ;;  %v4539_v56 = vld [vmem:[%s7763_s30 + $0xa0] sm:$0x7]  ;;  %s7547_s30 = smul.u32 288, %s7710_s22 }
 0x2c7   : > { %v5352_v11 = vpop.f32.mrf.mxu2  ;;  %v4411_v40 = vrot.slane %v10096_v10, 4  ;;  %v3947_v22 = vsel %vm8339_vm8, %v3945_v35, %v3946_v23  ;;  %v4683_v10 = vrot.slane %v4681_v36, 4  ;;  %v4687_v18 = vrot.slane %v4539_v56, 7 }
 0x2c8   : > { %6079 = vst [vmem:[%s9870_s12 + $0x50] sm:$0xff] %v6043_v60  ;;  %v5621_v2 = vadd.f32 %v5548_v33, %v9269_v41  ;;  %5490 = vmatmul.bf16.gmra.mxu3 %v7024_v30  ;;  %v5552_v50 = vpop.f32.mrf.mxu0  ;;  %v4429_v8 = vor.u32 %v4428_v39, %v4425_v5  ;;  %v3949_v30 = vrot.slane %v3804_v38, 6  ;;  %v4421_v60 = vrot.slane %v4419_v9, 4  ;;  %v7051_v35 = vld [vmem:[#allocation2 + $0x4a0] sm:$0xf]  ;;  %s6117_s15 = scalar_lea.hbm %s10309_s5, %s7547_s30 }
 0x2c9   : > { %v10141_v6 = vpop.f32.mrf.mxu1  ;;  %v4420_v51 = vsel %vm9348_vm14, %v4411_v40, %v4419_v9  ;;  %4021 = vst [vmem:[#allocation2 + $0x4e0] sm:$0xf] %v3947_v22  ;;  %v4685_v31 = vsel %vm9363_vm1, %v4683_v10, %v4684_v47  ;;  %v7227_v40 = vld [vmem:[#allocation2 + $0x490] sm:$0xf]  ;;  %s6120_s22 = sshll.u32 %s6117_s15, 4  ;;  %s6121_s22 = int_to_ptr.hbm [resolvable:$true] %s6120_s22 }
 0x2ca   : > { %v5968_v32 = vmul.f32 %v9824_v46, %v5621_v2  ;;  %v3950_v54 = vsel %vm8339_vm8, %v3948_v49, %v3949_v30  ;;  %v4430_v23 = vsel %vm9348_vm14, %v4421_v60, %v4429_v8  ;;  %4501 = vst [vmem:[#allocation2 + $0x4e4] sm:$0xf] %v4420_v51  ;;  %v7043_v8 = vld [vmem:[#allocation2 + $0x498] sm:$0xf]  ;;  %s7607_s25 = sshra.s32 %s6121_s22, 4  ;;  %s7608_s25 = int_to_ptr.hbm [resolvable:$true] %s7607_s25 }
 0x2cb   : > { %v5451_v43 = vpop.f32.mrf.mxu3  ;;  %4022 = vst [vmem:[#allocation2 + $0x504] sm:$0xf] %v3950_v54  ;;  %s7609_s16 = scalar_lea.hbm %s7608_s25, 288  ;;  %p7614_p0 = scmp.lt.s32.totalorder %s7608_s25, %s10309_s5 }
 0x2cc   : > { %v6004_v59 = vadd.f32 %v5968_v32, %v10090_v27  ;;  %v5452_v41 = vadd.f32 %v5451_v43, %v5352_v11  ;;  %v7518_v27 = vld [vmem:[#allocation2 + $0x468] sm:$0xf0]  ;;  %v7040_v11 = vor.u32 %v7472_v53, %v7039_v3  ;;  %4502 = vst [vmem:[#allocation2 + $0x508] sm:$0xf] %v4430_v23  ;;  %p7610_p11 = scmp.ne.s32.totalorder %s7608_s25, %s7609_s16  ;;  %p7615_p1 = scmp.lt.s32.totalorder %s7613_s7, %s7609_s16 }
 0x2cd   : > { %v7224_v26 = vor.u32 %v7518_v27, %v7223_v7  ;;  %4759 = vst [vmem:[#allocation2 + $0x4e8] sm:$0xf] %v4685_v31  ;;  %v7473_v27 = vld [vmem:[#allocation2 + $0x49c] sm:$0xf] }
 0x2ce   : > { %v6044_v63 = vadd.f32 %v9856_v17, %v6004_v59  ;;  %v5551_v13 = vadd.f32 %v5550_v44, %v5452_v41  ;;  %v7033_v44 = vld [vmem:[#allocation2 + $0x474] sm:$0xf0]  ;;  %p7611_p12 = pnand %p7610_p11, %p7727_p5  ;;  %p7616_p2 = por %p7615_p1, %p7614_p0 }
 0x2cf   : > { %v5354_v33 = vpop.f32.mrf.mxu2  ;;  %v7036_v39 = vor.u32 %v7470_v4, %v7033_v44 }
 0x2d0   : > { %6080 = vst [vmem:[%s9870_s12 + $0x58] sm:$0xff] %v6044_v63  ;;  %v5622_v55 = vadd.f32 %v5551_v13, %v9300_v45  ;;  %v5555_v2 = vpop.f32.mrf.mxu0  ;;  %v4686_v45 = vrot.slane %v4684_v47, 4  ;;  %v10385_v63 = vld [vmem:[#allocation14_spill] sm:$0xff]  ;;  %p7612_p13 = pneg %p7611_p12 }
 0x2d1   : > { %v5898_v5 = vpop.f32.mrf.mxu1 }
 0x2d2   : > { %v5969_v48 = vmul.f32 %v9824_v46, %v5622_v55  ;;  %v4688_v29 = vsel %vm9363_vm1, %v4686_v45, %v4687_v18  ;;  %v10386_v18 = vld [vmem:[#allocation15_spill] sm:$0xff]  ;;  %p7617_p3 = pnand %p7616_p2, %p7612_p13 }
 0x2d3   : > { %v5453_v36 = vpop.f32.mrf.mxu3  ;;  %5594 = vmatmul.bf16.gmra.mxu0 %v7040_v11  ;;  %4760 = vst [vmem:[#allocation2 + $0x50c] sm:$0xf] %v4688_v29 }
 0x2d4   : > { %v6005_v32 = vadd.f32 %v5969_v48, %v10124_v21  ;;  %v5454_v38 = vadd.f32 %v5453_v36, %v5354_v33  ;;  %5396 = vmatmul.bf16.gmra.mxu2 %v7032_v25  ;;  %5937 = vmatmul.bf16.gmra.mxu1 %v7224_v26  ;;  %v10178_v33 = vld [vmem:[%s9484_s6] ss:$0 sm:$0xff] }
 0x2d5   : > { %v7055_v36 = vld [vmem:[#allocation2 + $0x4e0] sm:$0xf] }
 0x2d6   : > { %v6045_v9 = vadd.f32 %v9856_v17, %v6005_v32  ;;  %v5553_v43 = vadd.f32 %v5552_v50, %v5454_v38  ;;  %v7475_v50 = vld [vmem:[#allocation2 + $0x4c0] sm:$0xf0]  ;;  %v7063_v32 = vld [vmem:[#allocation2 + $0x4e8] sm:$0xf] }
 0x2d7   : > { %v5357_v52 = vpop.f32.mrf.mxu2  ;;  %v7052_v25 = vor.u32 %v7475_v50, %v7051_v35 }
 0x2d8   : > { %6081 = vst [vmem:[%s9870_s12 + $0x60] sm:$0xff] %v6045_v9  ;;  %v5623_v1 = vadd.f32 %v5553_v43, %v9327_v0  ;;  %5495 = vmatmul.bf16.gmra.mxu3 %v7036_v39  ;;  %v5557_v21 = vpop.f32.mrf.mxu0  ;;  %v7519_v0 = vld [vmem:[#allocation2 + $0x4b0] sm:$0xf0]  ;;  %v7477_v39 = vld [vmem:[#allocation2 + $0x500] sm:$0xf0] }
 0x2d9   : > { %v5900_v41 = vpop.f32.mrf.mxu1  ;;  %v7228_v60 = vor.u32 %v7519_v0, %v7227_v40  ;;  %v7231_v43 = vld [vmem:[#allocation2 + $0x4d8] sm:$0xf] }
 0x2da   : > { %v5970_v59 = vmul.f32 %v9824_v46, %v5623_v1  ;;  %v7044_v46 = vor.u32 %v7474_v61, %v7043_v8  ;;  %v7478_v38 = vld [vmem:[#allocation2 + $0x508] sm:$0xf0] }
 0x2db   : > { %v5456_v3 = vpop.f32.mrf.mxu3 }
 0x2dc   : > { %v6006_v58 = vadd.f32 %v5970_v59, %v10141_v6  ;;  %v5457_v53 = vadd.f32 %v5456_v3, %v5357_v52  ;;  %v7045_v6 = vld [vmem:[#allocation2 + $0x4bc] sm:$0xf0]  ;;  %v7520_v52 = vld [vmem:[#allocation2 + $0x4f8] sm:$0xf0]  ;;  %v7056_v59 = vor.u32 %v7477_v39, %v7055_v36  ;;  %v7064_v3 = vor.u32 %v7478_v38, %v7063_v32 }
 0x2dd   : > { %v7048_v55 = vor.u32 %v7473_v27, %v7045_v6  ;;  %v7232_v8 = vor.u32 %v7520_v52, %v7231_v43 }
 0x2de   : > { %v6046_v49 = vadd.f32 %v9856_v17, %v6006_v58  ;;  %v5556_v30 = vadd.f32 %v5555_v2, %v5457_v53  ;;  %v7057_v53 = vld [vmem:[#allocation2 + $0x504] sm:$0xf0] }
 0x2df   : > { %v5359_v56 = vpop.f32.mrf.mxu2 }
 0x2e0   : > { %6082 = vst [vmem:[%s9870_s12 + $0x68] sm:$0xff] %v6046_v49  ;;  %v5624_v13 = vadd.f32 %v5556_v30, %v10385_v63  ;;  %v5560_v7 = vpop.f32.mrf.mxu0 }
 0x2e1   : > { %v5903_v11 = vpop.f32.mrf.mxu1 }
 0x2e2   : > { %v5971_v4 = vmul.f32 %v10178_v33, %v5624_v13 }
 0x2e3   : > { %v5458_v22 = vpop.f32.mrf.mxu3  ;;  %5599 = vmatmul.bf16.gmra.mxu0 %v7052_v25 }
 0x2e4   : > { %v6007_v54 = vadd.f32 %v5971_v4, %v5898_v5  ;;  %v5459_v10 = vadd.f32 %v5458_v22, %v5359_v56  ;;  %5401 = vmatmul.bf16.gmra.mxu2 %v7044_v46  ;;  %5942 = vmatmul.bf16.gmra.mxu1 %v7228_v60 }
 0x2e6   : > { %v6047_v44 = vadd.f32 %v9856_v17, %v6007_v54  ;;  %v5558_v51 = vadd.f32 %v5557_v21, %v5459_v10  ;;  %v10186_v17 = vld [vmem:[%s9500_s9] ss:$0 sm:$0xff] }
 0x2e7   : > { %v5362_v47 = vpop.f32.mrf.mxu2 }
 0x2e8   : > { %6083 = vst [vmem:[%s9870_s12 + $0x70] sm:$0xff] %v6047_v44  ;;  %v5625_v2 = vadd.f32 %v5558_v51, %v10386_v18  ;;  %5500 = vmatmul.bf16.gmra.mxu3 %v7048_v55  ;;  %v5562_v26 = vpop.f32.mrf.mxu0 }
 0x2e9   : > { %v5905_v48 = vpop.f32.mrf.mxu1 }
 0x2ea   : > { %v5972_v23 = vmul.f32 %v10178_v33, %v5625_v2 }
 0x2eb   : > { %v5461_v5 = vpop.f32.mrf.mxu3 }
 0x2ec   : > { %v6008_v31 = vadd.f32 %v5972_v23, %v5900_v41  ;;  %v5462_v45 = vadd.f32 %v5461_v5, %v5362_v47  ;;  %v7476_v41 = vld [vmem:[#allocation2 + $0x4e4] sm:$0xf] }
 0x2ed   : > { %v7060_v40 = vor.u32 %v7476_v41, %v7057_v53 }
 0x2ee   : > { %v6048_v29 = vadd.f32 %v10186_v17, %v6008_v31  ;;  %v5561_v9 = vadd.f32 %v5560_v7, %v5462_v45 }
 0x2ef   : > { %v5364_v1 = vpop.f32.mrf.mxu2 }
 0x2f0   : > { %6084 = vst [vmem:[%s9870_s12 + $0x78] sm:$0xff] %v6048_v29  ;;  %v5626_v21 = vadd.f32 %v5561_v9, %v9406_v14  ;;  %v5565_v58 = vpop.f32.mrf.mxu0 }
 0x2f1   : > { %v5908_v35 = vpop.f32.mrf.mxu1 }
 0x2f2   : > { %v5973_v61 = vmul.f32 %v10178_v33, %v5626_v21 }
 0x2f3   : > { %v5463_v50 = vpop.f32.mrf.mxu3  ;;  %5604 = vmatmul.bf16.gmra.mxu0 %v7064_v3 }
 0x2f4   : > { %v6009_v49 = vadd.f32 %v5973_v61, %v5903_v11  ;;  %v5464_v30 = vadd.f32 %v5463_v50, %v5364_v1  ;;  %5406 = vmatmul.bf16.gmra.mxu2 %v7056_v59  ;;  %5947 = vmatmul.bf16.gmra.mxu1 %v7232_v8 }
 0x2f6   : > { %v6049_v14 = vadd.f32 %v10186_v17, %v6009_v49  ;;  %v5563_v0 = vadd.f32 %v5562_v26, %v5464_v30 }
 0x2f7   : > { %v5367_v56 = vpop.f32.mrf.mxu2 }
 0x2f8   : > { %6085 = vst [vmem:[%s9870_s12 + $0x80] sm:$0xff] %v6049_v14  ;;  %v5627_v63 = vadd.f32 %v5563_v0, %v9419_v20  ;;  %5505 = vmatmul.bf16.gmra.mxu3 %v7060_v40  ;;  %v5567_v13 = vpop.f32.mrf.mxu0 }
 0x2f9   : > { %v5910_v25 = vpop.f32.mrf.mxu1 }
 0x2fa   : > { %v5974_v46 = vmul.f32 %v10178_v33, %v5627_v63 }
 0x2fb   : > { %v5466_v7 = vpop.f32.mrf.mxu3 }
 0x2fc   : > { %v6010_v27 = vadd.f32 %v5974_v46, %v5905_v48  ;;  %v5467_v6 = vadd.f32 %v5466_v7, %v5367_v56 }
 0x2fe   : > { %v6050_v60 = vadd.f32 %v10186_v17, %v6010_v27  ;;  %v5566_v4 = vadd.f32 %v5565_v58, %v5467_v6 }
 0x2ff   : > { %v5369_v11 = vpop.f32.mrf.mxu2 }
 0x300   : > { %6086 = vst [vmem:[%s9870_s12 + $0x88] sm:$0xff] %v6050_v60  ;;  %v5628_v22 = vadd.f32 %v5566_v4, %v9448_v15  ;;  %v5570_v54 = vpop.f32.mrf.mxu0 }
 0x301   : > { %v5913_v20 = vpop.f32.mrf.mxu1 }
 0x302   : > { %v5975_v10 = vmul.f32 %v10178_v33, %v5628_v22 }
 0x303   : > { %v5468_v55 = vpop.f32.mrf.mxu3 }
 0x304   : > { %v6011_v44 = vadd.f32 %v5975_v10, %v5908_v35  ;;  %v5469_v51 = vadd.f32 %v5468_v55, %v5369_v11 }
 0x306   : > { %v6051_v47 = vadd.f32 %v10186_v17, %v6011_v44  ;;  %v5568_v18 = vadd.f32 %v5567_v13, %v5469_v51 }
 0x307   : > { %v5372_v2 = vpop.f32.mrf.mxu2 }
 0x308   : > { %6087 = vst [vmem:[%s9870_s12 + $0x90] sm:$0xff] %v6051_v47  ;;  %v5629_v26 = vadd.f32 %v5568_v18, %v9459_v37  ;;  %v5572_v23 = vpop.f32.mrf.mxu0 }
 0x309   : > { %v5915_v5 = vpop.f32.mrf.mxu1 }
 0x30a   : > { %v5976_v48 = vmul.f32 %v10178_v33, %v5629_v26 }
 0x30b   : > { %v5471_v15 = vpop.f32.mrf.mxu3 }
 0x30c   : > { %v6012_v31 = vadd.f32 %v5976_v48, %v5910_v25  ;;  %v5472_v45 = vadd.f32 %v5471_v15, %v5372_v2 }
 0x30e   : > { %v6052_v36 = vadd.f32 %v10186_v17, %v6012_v31  ;;  %v5571_v39 = vadd.f32 %v5570_v54, %v5472_v45 }
 0x30f   : > { %v5374_v32 = vpop.f32.mrf.mxu2 }
 0x310   : > { %6088 = vst [vmem:[%s9870_s12 + $0x98] sm:$0xff] %v6052_v36  ;;  %v5630_v38 = vadd.f32 %v5571_v39, %v9502_v24  ;;  %v5575_v29 = vpop.f32.mrf.mxu0 }
 0x311   : > { %v5918_v43 = vpop.f32.mrf.mxu1 }
 0x312   : > { %v5977_v9 = vmul.f32 %v10178_v33, %v5630_v38 }
 0x313   : > { %v5473_v37 = vpop.f32.mrf.mxu3 }
 0x314   : > { %v6013_v52 = vadd.f32 %v5977_v9, %v5913_v20  ;;  %v5474_v1 = vadd.f32 %v5473_v37, %v5374_v32 }
 0x316   : > { %v6053_v21 = vadd.f32 %v10186_v17, %v6013_v52  ;;  %v5573_v59 = vadd.f32 %v5572_v23, %v5474_v1 }
 0x317   : > { %v5377_v3 = vpop.f32.mrf.mxu2 }
 0x318   : > { %6089 = vst [vmem:[%s9870_s12 + $0xa0] sm:$0xff] %v6053_v21  ;;  %v5631_v58 = vadd.f32 %v5573_v59, %v9513_v12  ;;  %v5577_v41 = vpop.f32.mrf.mxu0 }
 0x319   : > { %v5920_v8 = vpop.f32.mrf.mxu1 }
 0x31a   : > { %v5978_v53 = vmul.f32 %v10178_v33, %v5631_v58 }
 0x31b   : > { %v5476_v24 = vpop.f32.mrf.mxu3 }
 0x31c   : > { %v6014_v61 = vadd.f32 %v5978_v53, %v5915_v5  ;;  %v5477_v35 = vadd.f32 %v5476_v24, %v5377_v3 }
 0x31e   : > { %v6054_v50 = vadd.f32 %v10186_v17, %v6014_v61  ;;  %v5576_v49 = vadd.f32 %v5575_v29, %v5477_v35 }
 0x31f   : > { %v5379_v30 = vpop.f32.mrf.mxu2 }
 0x320   : > { %6090 = vst [vmem:[%s9870_s12 + $0xa8] sm:$0xff] %v6054_v50  ;;  %v5632_v40 = vadd.f32 %v5576_v49, %v9544_v62  ;;  %v5580_v14 = vpop.f32.mrf.mxu0 }
 0x321   : > { %v5923_v56 = vpop.f32.mrf.mxu1 }
 0x322   : > { %v5979_v0 = vmul.f32 %v10178_v33, %v5632_v40 }
 0x323   : > { %v5478_v12 = vpop.f32.mrf.mxu3 }
 0x324   : > { %v6015_v63 = vadd.f32 %v5979_v0, %v5918_v43  ;;  %v5479_v13 = vadd.f32 %v5478_v12, %v5379_v30 }
 0x326   : > { %v6055_v46 = vadd.f32 %v10186_v17, %v6015_v63  ;;  %v5578_v25 = vadd.f32 %v5577_v41, %v5479_v13 }
 0x327   : > { %v5382_v7 = vpop.f32.mrf.mxu2 }
 0x328   : > { %6091 = vst [vmem:[%s9870_s12 + $0xb0] sm:$0xff] %v6055_v46  ;;  %v5633_v27 = vadd.f32 %v5578_v25, %v9555_v42  ;;  %v5582_v6 = vpop.f32.mrf.mxu0  ;;  %v10387_v25 = vld [vmem:[#allocation6_spill] sm:$0xff] }
 0x329   : > { %v5925_v4 = vpop.f32.mrf.mxu1 }
 0x32a   : > { %v5980_v60 = vmul.f32 %v10178_v33, %v5633_v27 }
 0x32b   : > { %v5481_v62 = vpop.f32.mrf.mxu3 }
 0x32c   : > { %v6016_v11 = vadd.f32 %v5980_v60, %v5920_v8  ;;  %v5482_v22 = vadd.f32 %v5481_v62, %v5382_v7 }
 0x32e   : > { %v6056_v54 = vadd.f32 %v10186_v17, %v6016_v11  ;;  %v5581_v10 = vadd.f32 %v5580_v14, %v5482_v22 }
 0x32f   : > { %v5384_v20 = vpop.f32.mrf.mxu2 }
 0x330   : > { %6092 = vst [vmem:[%s9870_s12 + $0xb8] sm:$0xff] %v6056_v54  ;;  %v5634_v55 = vadd.f32 %v5581_v10, %v9586_v57  ;;  %v5585_v44 = vpop.f32.mrf.mxu0  ;;  %v10388_v10 = vld [vmem:[#allocation7_spill] sm:$0xff] }
 0x331   : > { %v5928_v47 = vpop.f32.mrf.mxu1 }
 0x332   : > { %v5981_v51 = vmul.f32 %v10178_v33, %v5634_v55 }
 0x333   : > { %v5483_v42 = vpop.f32.mrf.mxu3 }
 0x334   : > { %v6017_v18 = vadd.f32 %v5981_v51, %v5923_v56  ;;  %v5484_v2 = vadd.f32 %v5483_v42, %v5384_v20 }
 0x336   : > { %v6057_v26 = vadd.f32 %v10186_v17, %v6017_v18  ;;  %v5583_v23 = vadd.f32 %v5582_v6, %v5484_v2 }
 0x337   : > { %v5387_v48 = vpop.f32.mrf.mxu2 }
 0x338   : > { %6093 = vst [vmem:[%s9870_s12 + $0xc0] sm:$0xff] %v6057_v26  ;;  %v5635_v5 = vadd.f32 %v5583_v23, %v9597_v19  ;;  %v5587_v15 = vpop.f32.mrf.mxu0 }
 0x339   : > { %v5930_v57 = vpop.f32.mrf.mxu1 }
 0x33a   : > { %v5982_v31 = vmul.f32 %v10178_v33, %v5635_v5 }
 0x33b   : > { %v5486_v45 = vpop.f32.mrf.mxu3 }
 0x33c   : > { %v6018_v36 = vadd.f32 %v5982_v31, %v5925_v4  ;;  %v5487_v39 = vadd.f32 %v5486_v45, %v5387_v48  ;;  %v10389_v48 = vld [vmem:[#allocation8_spill] sm:$0xff] }
 0x33e   : > { %v6058_v32 = vadd.f32 %v10186_v17, %v6018_v36  ;;  %v5586_v38 = vadd.f32 %v5585_v44, %v5487_v39 }
 0x33f   : > { %v5389_v29 = vpop.f32.mrf.mxu2 }
 0x340   : > { %6094 = vst [vmem:[%s9870_s12 + $0xc8] sm:$0xff] %v6058_v32  ;;  %v5636_v9 = vadd.f32 %v5586_v38, %v9628_v16  ;;  %v5590_v43 = vpop.f32.mrf.mxu0 }
 0x341   : > { %v5933_v21 = vpop.f32.mrf.mxu1 }
 0x342   : > { %v5983_v37 = vmul.f32 %v10178_v33, %v5636_v9 }
 0x343   : > { %v5488_v52 = vpop.f32.mrf.mxu3 }
 0x344   : > { %v6019_v19 = vadd.f32 %v5983_v37, %v5928_v47  ;;  %v5489_v1 = vadd.f32 %v5488_v52, %v5389_v29  ;;  %v10390_v29 = vld [vmem:[#allocation9_spill] sm:$0xff] }
 0x346   : > { %v6059_v59 = vadd.f32 %v10186_v17, %v6019_v19  ;;  %v5588_v3 = vadd.f32 %v5587_v15, %v5489_v1 }
 0x347   : > { %v5392_v58 = vpop.f32.mrf.mxu2 }
 0x348   : > { %6095 = vst [vmem:[%s9870_s12 + $0xd0] sm:$0xff] %v6059_v59  ;;  %v5637_v41 = vadd.f32 %v5588_v3, %v9639_v28  ;;  %v5592_v53 = vpop.f32.mrf.mxu0 }
 0x349   : > { %v5935_v30 = vpop.f32.mrf.mxu1 }
 0x34a   : > { %v5984_v8 = vmul.f32 %v10178_v33, %v5637_v41  ;;  %v10391_v41 = vld [vmem:[#allocation10_spill] sm:$0xff] }
 0x34b   : > { %v5491_v24 = vpop.f32.mrf.mxu3 }
 0x34c   : > { %v6020_v16 = vadd.f32 %v5984_v8, %v5930_v57  ;;  %v5492_v61 = vadd.f32 %v5491_v24, %v5392_v58 }
 0x34e   : > { %v6060_v35 = vadd.f32 %v10186_v17, %v6020_v16  ;;  %v5591_v50 = vadd.f32 %v5590_v43, %v5492_v61 }
 0x34f   : > { %v5394_v49 = vpop.f32.mrf.mxu2 }
 0x350   : > { %6096 = vst [vmem:[%s9870_s12 + $0xd8] sm:$0xff] %v6060_v35  ;;  %v5638_v40 = vadd.f32 %v5591_v50, %v9670_v34  ;;  %v5595_v56 = vpop.f32.mrf.mxu0 }
 0x351   : > { %v5938_v27 = vpop.f32.mrf.mxu1 }
 0x352   : > { %v5985_v14 = vmul.f32 %v10178_v33, %v5638_v40 }
 0x353   : > { %v5493_v0 = vpop.f32.mrf.mxu3 }
 0x354   : > { %v6021_v28 = vadd.f32 %v5985_v14, %v5933_v21  ;;  %v5494_v12 = vadd.f32 %v5493_v0, %v5394_v49 }
 0x356   : > { %v6061_v63 = vadd.f32 %v10186_v17, %v6021_v28  ;;  %v5593_v13 = vadd.f32 %v5592_v53, %v5494_v12 }
 0x357   : > { %v5397_v46 = vpop.f32.mrf.mxu2 }
 0x358   : > { %6097 = vst [vmem:[%s9870_s12 + $0xe0] sm:$0xff] %v6061_v63  ;;  %v5639_v7 = vadd.f32 %v5593_v13, %v10387_v25  ;;  %v5597_v62 = vpop.f32.mrf.mxu0 }
 0x359   : > { %v5940_v51 = vpop.f32.mrf.mxu1 }
 0x35a   : > { %v5986_v6 = vmul.f32 %v10178_v33, %v5639_v7  ;;  %v10393_v7 = vld [vmem:[#allocation12_spill] sm:$0xff] }
 0x35b   : > { %v5496_v60 = vpop.f32.mrf.mxu3 }
 0x35c   : > { %v6022_v4 = vadd.f32 %v5986_v6, %v5935_v30  ;;  %v5497_v34 = vadd.f32 %v5496_v60, %v5397_v46  ;;  %v10392_v30 = vld [vmem:[#allocation11_spill] sm:$0xff] }
 0x35e   : > { %v6062_v11 = vadd.f32 %v10186_v17, %v6022_v4  ;;  %v5596_v22 = vadd.f32 %v5595_v56, %v5497_v34 }
 0x35f   : > { %v5399_v54 = vpop.f32.mrf.mxu2 }
 0x360   : > { %6098 = vst [vmem:[%s9870_s12 + $0xe8] sm:$0xff] %v6062_v11  ;;  %v5640_v20 = vadd.f32 %v5596_v22, %v10388_v10  ;;  %v5600_v26 = vpop.f32.mrf.mxu0 }
 0x361   : > { %v5943_v36 = vpop.f32.mrf.mxu1 }
 0x362   : > { %v5987_v55 = vmul.f32 %v10178_v33, %v5640_v20 }
 0x363   : > { %v5498_v44 = vpop.f32.mrf.mxu3 }
 0x364   : > { %v6023_v47 = vadd.f32 %v5987_v55, %v5938_v27  ;;  %v5499_v42 = vadd.f32 %v5498_v44, %v5399_v54 }
 0x366   : > { %v6063_v18 = vadd.f32 %v10186_v17, %v6023_v47  ;;  %v5598_v2 = vadd.f32 %v5597_v62, %v5499_v42 }
 0x367   : > { %v5402_v23 = vpop.f32.mrf.mxu2 }
 0x368   : > { %6099 = vst [vmem:[%s9870_s12 + $0xf0] sm:$0xff] %v6063_v18  ;;  %v5641_v5 = vadd.f32 %v5598_v2, %v10389_v48  ;;  %v5602_v43 = vpop.f32.mrf.mxu0 }
 0x369   : > { %v5945_v3 = vpop.f32.mrf.mxu1 }
 0x36a   : > { %v5988_v15 = vmul.f32 %v10178_v33, %v5641_v5 }
 0x36b   : > { %v5501_v31 = vpop.f32.mrf.mxu3 }
 0x36c   : > { %v6024_v45 = vadd.f32 %v5988_v15, %v5940_v51  ;;  %v5502_v57 = vadd.f32 %v5501_v31, %v5402_v23 }
 0x36e   : > { %v6064_v39 = vadd.f32 %v10186_v17, %v6024_v45  ;;  %v5601_v32 = vadd.f32 %v5600_v26, %v5502_v57 }
 0x36f   : > { %v5404_v38 = vpop.f32.mrf.mxu2 }
 0x370   : > { %6100 = vst [vmem:[%s9870_s12 + $0xf8] sm:$0xff] %v6064_v39  ;;  %v5642_v9 = vadd.f32 %v5601_v32, %v10390_v29  ;;  %v5605_v24 = vpop.f32.mrf.mxu0 }
 0x371   : > { %v5948_v14 = vpop.f32.mrf.mxu1 }
 0x372   : > { %v5989_v37 = vmul.f32 %v10178_v33, %v5642_v9 }
 0x373   : > { %v5503_v52 = vpop.f32.mrf.mxu3 }
 0x374   : > { %v6025_v19 = vadd.f32 %v5989_v37, %v5943_v36  ;;  %v5504_v1 = vadd.f32 %v5503_v52, %v5404_v38 }
 0x376   : > { %v6065_v21 = vadd.f32 %v10186_v17, %v6025_v19  ;;  %v5603_v59 = vadd.f32 %v5602_v43, %v5504_v1 }
 0x377   : > { %v5407_v58 = vpop.f32.mrf.mxu2 }
 0x378   : > { %6101 = vst [vmem:[%s9870_s12 + $0x100] sm:$0xff] %v6065_v21  ;;  %v5643_v53 = vadd.f32 %v5603_v59, %v10391_v41  ;;  %v5607_v13 = vpop.f32.mrf.mxu0 }
 0x379   : > { %v5950_v60 = vpop.f32.mrf.mxu1 }
 0x37a   : > { %v5990_v8 = vmul.f32 %v10178_v33, %v5643_v53 }
 0x37b   : > { %v5506_v16 = vpop.f32.mrf.mxu3 }
 0x37c   : > { %v6026_v61 = vadd.f32 %v5990_v8, %v5945_v3  ;;  %v5507_v35 = vadd.f32 %v5506_v16, %v5407_v58 }
 0x37e   : > { %v6066_v50 = vadd.f32 %v10186_v17, %v6026_v61  ;;  %v5606_v49 = vadd.f32 %v5605_v24, %v5507_v35 }
 0x37f   : > { %v5409_v0 = vpop.f32.mrf.mxu2 }
 0x380   : > { %6102 = vst [vmem:[%s9870_s12 + $0x108] sm:$0xff] %v6066_v50  ;;  %v5644_v40 = vadd.f32 %v5606_v49, %v10392_v30 }
 0x382   : > { %v5991_v56 = vmul.f32 %v10178_v33, %v5644_v40 }
 0x383   : > { %v5508_v28 = vpop.f32.mrf.mxu3 }
 0x384   : > { %v6027_v12 = vadd.f32 %v5991_v56, %v5948_v14  ;;  %v5509_v63 = vadd.f32 %v5508_v28, %v5409_v0 }
 0x386   : > { %v6067_v46 = vadd.f32 %v10186_v17, %v6027_v12  ;;  %v5608_v25 = vadd.f32 %v5607_v13, %v5509_v63 }
 0x388   : > { %6103 = vst [vmem:[%s9870_s12 + $0x110] sm:$0xff] %v6067_v46  ;;  %v5645_v27 = vadd.f32 %v5608_v25, %v10393_v7 }
 0x38a   : > { %v5992_v6 = vmul.f32 %v10178_v33, %v5645_v27 }
 0x38c   : > { %v6028_v4 = vadd.f32 %v5992_v6, %v5950_v60 }
 0x38e   : > { %v6068_v34 = vadd.f32 %v10186_v17, %v6028_v4 }
 0x390   : > { %6104 = vst [vmem:[%s9870_s12 + $0x118] sm:$0xff] %v6068_v34 }
 0x391   : > { %7620 = shalt.err (!%p7617_p3)
}
 0x392   : > { %s7657_s11 = smov 128   ;;  %s7658_s10 = smov 8  }
 0x393   : > { %7548 = dma.vmem_to_hbm [thread:$0]  (%p7727_p5), %s6119_s17, 4608, %s6121_s22, %s6106_s23, %s7657_s11, %s7657_s11, %s7658_s10  }
 0x394 PF: > { %p7554_p4 = scmp.ge.s32.totalorder %s7655_s21, 2  ;;  %s6135_s12 = sand.u32 1, %s7643_s18  }
 0x395   : > { %s6136_s30 = scalar_lea.sflag [#allocation4], %s6135_s12 }
 0x396   : > { %p7551_p7 = pnand %p7554_p4, %p7731_p6 }
 0x398   : > { %p7552_p8 = pneg %p7551_p7 }
 0x39a   : > { %7638 = dma.done.wait (%p7552_p8), %s6136_s30, 4608  }
 0x39b   : > { %7640 = vsyncadd (%p7552_p8), %s6136_s30, 4294962688  ;;  %p15_p9 = scmp.ge.s32.totalorder %s7714_s24, 6   ;;  %s10394_s18 = smov %s7647_s19 }
 0x39c   : > { %s10395_s19 = smov %s7651_s20  ;;  %s10396_s20 = smov %s7725_s27 }
 0x39d   : > { %s10397_s21 = smov %s7714_s24  ;;  %17 = sbr.rel (!%p15_p9) target bundleno = 3 (0x3), region = 84 }
 0x3a2   :  { %6142 = vsyncpa [#allocation4], 1 }
 0x3a3   :  { %6144 = vsyncpa [#allocation4 + $0x1], 1 }

</bundles_post_ra>
